<compile_context>
chip_gen: v7x
topology: tpu7x:2x2x1
jax: 0.10.0
libtpu: 0.0.40
codegen_flags: <defaults>
</compile_context>

<pallas_src>
import functools
import math

import jax
import jax.numpy as jnp
from jax import lax
from jax.experimental import pallas as pl
from jax.experimental.pallas import tpu as pltpu


def _erf_approx(x):
    """erf via Abramowitz & Stegun 7.1.26 (|err| < 1.5e-7).

    Uses only VPU ops + one EUP exp so it is guaranteed to lower inside
    Mosaic; matches torch's exact-erf nn.GELU to ~1e-7.
    """
    a1, a2, a3, a4, a5 = (0.254829592, -0.284496736, 1.421413741,
                          -1.453152027, 1.061405429)
    p = 0.3275911
    sgn = jnp.where(x >= 0.0, 1.0, -1.0)
    ax = jnp.abs(x)
    t = 1.0 / (1.0 + p * ax)
    poly = ((((a5 * t + a4) * t + a3) * t + a2) * t + a1) * t
    return sgn * (1.0 - poly * jnp.exp(-ax * ax))


# ---------------------------------------------------------------------------
# Fused (LayerNorm?) -> matmul(bf16 on MXU, f32 acc) -> +bias -> (GELU|tanh)?
#       -> (+residual)?   epilogue, all epilogue math in f32
# ---------------------------------------------------------------------------
def _matmul_kernel(x_ref, w_ref, b_ref, *refs, activation, has_residual,
                   has_ln, ln_eps, multi_k):
    idx = 0
    if has_ln:
        g_ref, beta_ref = refs[0], refs[1]
        idx = 2
    if has_residual:
        r_ref = refs[idx]
        idx += 1
    o_ref = refs[idx]
    idx += 1
    acc_ref = refs[idx] if multi_k else None

    x = x_ref[...]
    if has_ln:
        # LayerNorm prologue in f32, cast back to bf16 for the MXU.
        xf = x.astype(jnp.float32)
        mu = jnp.mean(xf, axis=-1, keepdims=True)
        xc = xf - mu
        var = jnp.mean(xc * xc, axis=-1, keepdims=True)
        xf = (xc * lax.rsqrt(var + ln_eps)) * g_ref[...] + beta_ref[...]
        x = xf.astype(x_ref.dtype)

    part = jnp.dot(x, w_ref[...], preferred_element_type=jnp.float32)

    def _epilogue(acc):
        y = acc + b_ref[...]
        if activation == "gelu":          # erf-form GELU (torch nn.GELU default)
            y = 0.5 * y * (1.0 + _erf_approx(y * (1.0 / math.sqrt(2.0))))
        elif activation == "tanh":
            y = jnp.tanh(y)
        if has_residual:
            y = y + r_ref[...].astype(jnp.float32)
        o_ref[...] = y.astype(o_ref.dtype)

    if multi_k:
        @pl.when(pl.program_id(2) == 0)
        def _():
            acc_ref[...] = jnp.zeros_like(acc_ref)

        acc_ref[...] += part

        @pl.when(pl.program_id(2) == pl.num_programs(2) - 1)
        def _():
            _epilogue(acc_ref[...])
    else:
        _epilogue(part)


def matmul(x, w, bias=None, *, activation="none", residual=None, ln=None,
           ln_eps=1e-6, out_dtype=jnp.bfloat16):
    """y = act(LN?(x) @ w + bias) [+ residual].  x:(M,K), w:(K,N).

    bf16 MXU operands, f32 accumulation/epilogue.  No padding/slicing: dims
    that are not (8,128)-aligned use full-extent blocks (allowed by Mosaic).
    """
    M, K = x.shape
    Kw, N = w.shape
    assert K == Kw
    x = x.astype(jnp.bfloat16)
    w = w.astype(jnp.bfloat16)

    # Tile selection: grow tiles toward VMEM (tiny model => single M/K tiles),
    # split N into >=2 parallel steps when possible (v7x second TensorCore),
    # prefer 256-wide N tiles for the 256x256 MXU on v6e/v7x.
    tm = M if (M <= 1024 or M % 256 != 0) else 256
    if ln is not None or K <= 1024:
        tk = K
    elif K % 512 == 0:
        tk = 512
    elif K % 256 == 0:
        tk = 256
    else:
        tk = K
    if N % 256 == 0 and N > 256:
        tn = 256
    elif N % 128 == 0 and N > 128:
        tn = 128
    else:
        tn = N

    grid = (M // tm, N // tn, K // tk)
    multi_k = grid[2] > 1
    has_ln = ln is not None
    has_res = residual is not None
    assert not (has_ln and multi_k)     # LN prologue needs the full row in one tile

    bias2 = (jnp.zeros((1, N), jnp.float32) if bias is None
             else bias.reshape(1, N).astype(jnp.float32))

    operands = [x, w, bias2]
    in_specs = [
        pl.BlockSpec((tm, tk), lambda i, j, k: (i, k)),
        pl.BlockSpec((tk, tn), lambda i, j, k: (k, j)),
        pl.BlockSpec((1, tn), lambda i, j, k: (0, j)),
    ]
    if has_ln:
        g, b = ln
        operands += [g.reshape(1, K).astype(jnp.float32),
                     b.reshape(1, K).astype(jnp.float32)]
        in_specs += [pl.BlockSpec((1, tk), lambda i, j, k: (0, k)),
                     pl.BlockSpec((1, tk), lambda i, j, k: (0, k))]
    if has_res:
        operands.append(residual)
        in_specs.append(pl.BlockSpec((tm, tn), lambda i, j, k: (i, j)))

    scratch = [pltpu.VMEM((tm, tn), jnp.float32)] if multi_k else []

    return pl.pallas_call(
        functools.partial(_matmul_kernel, activation=activation,
                          has_residual=has_res, has_ln=has_ln,
                          ln_eps=ln_eps, multi_k=multi_k),
        out_shape=jax.ShapeDtypeStruct((M, N), out_dtype),
        grid_spec=pltpu.PrefetchScalarGridSpec(
            num_scalar_prefetch=0,
            grid=grid,
            in_specs=in_specs,
            out_specs=pl.BlockSpec((tm, tn), lambda i, j, k: (i, j)),
            scratch_shapes=scratch,
        ),
        compiler_params=pltpu.CompilerParams(
            dimension_semantics=("parallel", "parallel", "arbitrary")),
    )(*operands)


# ---------------------------------------------------------------------------
# Lane-dense multi-head attention: grid over batch, (S, D=H*Dh) blocks,
# per-head 2-D dots inside the kernel, one full-width output store.
# The 1/sqrt(Dh) scale is folded into wq at init, so no in-kernel scaling.
# ---------------------------------------------------------------------------
def _attention_kernel(q_ref, k_ref, v_ref, o_ref, *, num_heads):
    q = q_ref[...]                                    # (Sq, D) bf16
    k = k_ref[...]                                    # (Sk, D) bf16
    v = v_ref[...]
    d = q.shape[-1]
    dh = d // num_heads
    outs = []
    for h in range(num_heads):
        sl = slice(h * dh, (h + 1) * dh)
        qh, kh, vh = q[:, sl], k[:, sl], v[:, sl]
        # contract last dims directly -> no explicit transpose of K
        s = lax.dot_general(qh, kh, (((1,), (1,)), ((), ())),
                            preferred_element_type=jnp.float32)   # (Sq, Sk) f32
        m = jnp.max(s, axis=-1, keepdims=True)
        p = jnp.exp(s - m)
        l = jnp.sum(p, axis=-1, keepdims=True)
        p = p * pl.reciprocal(l, approx=True)          # divide on the EUP slot
        outs.append(jnp.dot(p.astype(vh.dtype), vh,
                            preferred_element_type=jnp.float32))  # (Sq, Dh) f32
    o_ref[...] = jnp.concatenate(outs, axis=-1).astype(o_ref.dtype)


def attention(q, k, v, num_heads):
    """q:(B,Sq,D), k/v:(B,Sk,D) bf16; one grid step per batch element."""
    B, Sq, D = q.shape
    Sk = k.shape[1]
    return pl.pallas_call(
        functools.partial(_attention_kernel, num_heads=num_heads),
        out_shape=jax.ShapeDtypeStruct((B, Sq, D), jnp.bfloat16),
        grid_spec=pltpu.PrefetchScalarGridSpec(
            num_scalar_prefetch=0,
            grid=(B,),
            in_specs=[pl.BlockSpec((None, Sq, D), lambda b: (b, 0, 0)),
                      pl.BlockSpec((None, Sk, D), lambda b: (b, 0, 0)),
                      pl.BlockSpec((None, Sk, D), lambda b: (b, 0, 0))],
            out_specs=pl.BlockSpec((None, Sq, D), lambda b: (b, 0, 0)),
        ),
        compiler_params=pltpu.CompilerParams(dimension_semantics=("parallel",)),
    )(q, k, v)


# ---------------------------------------------------------------------------
# Model pieces built from the two kernels
# ---------------------------------------------------------------------------
def encoder_block(x, p, num_heads):
    B, S, D = x.shape
    M = B * S
    x2 = x.reshape(M, D)
    # LN1 fused into a single QKV projection (Q weight pre-scaled by 1/sqrt(Dh))
    qkv = matmul(x2, p["w_qkv"], p["b_qkv"], ln=(p["ln1_g"], p["ln1_b"]))
    q = qkv[:, :D].reshape(B, S, D)
    k = qkv[:, D:2 * D].reshape(B, S, D)
    v = qkv[:, 2 * D:].reshape(B, S, D)
    o = attention(q, k, v, num_heads)
    x2 = matmul(o.reshape(M, D), p["w_o"], p["b_o"], residual=x2)
    # LN2 fused into MLP1; GELU fused into its epilogue; residual into MLP2
    h = matmul(x2, p["mlp_w1"], p["mlp_b1"], activation="gelu",
               ln=(p["ln2_g"], p["ln2_b"]))
    out = matmul(h, p["mlp_w2"], p["mlp_b2"], residual=x2)
    return out.reshape(B, S, D)


def encoder_blocks(x, p, num_heads):
    x = (x + p["pos_embedding"]).astype(jnp.bfloat16)
    for blk in p["layers"]:
        x = encoder_block(x, blk, num_heads)
    # NOTE: the final encoder LayerNorm is fused into the cross-attn Q
    # projections (its only consumers), so it is not applied here.
    return x


def cross_attention(tokens, p, num_heads, *, kv=None, msg_bits=None, ln=None):
    """nn.MultiheadAttention(batch_first=True), query=tokens, key=value=kv/msgs."""
    B, Sq, D = tokens.shape
    M = B * Sq
    q = matmul(tokens.reshape(M, D), p["w_q"], p["b_q"], ln=ln).reshape(B, Sq, D)
    if msg_bits is not None:
        # msgs are broadcast constant across the embed dim, so the K/V linear
        # projections collapse to a rank-1 outer product (tiny VPU op); no
        # (B, num_bits, D) broadcast is ever materialized.
        k = (msg_bits[:, :, None] * p["wk_colsum"][None, None, :]
             + p["b_k"][None, None, :]).astype(jnp.bfloat16)
        v = (msg_bits[:, :, None] * p["wv_colsum"][None, None, :]
             + p["b_v"][None, None, :]).astype(jnp.bfloat16)
    else:
        Sk = kv.shape[1]
        kvp = matmul(kv.reshape(B * Sk, D), p["w_kv"], p["b_kv"])   # fused K|V
        k = kvp[:, :D].reshape(B, Sk, D)
        v = kvp[:, D:].reshape(B, Sk, D)
    o = attention(q, k, v, num_heads)
    return matmul(o.reshape(M, D), p["w_o"], p["b_o"]).reshape(B, Sq, D)


def process_input(x, p, patch_size):
    """ViT _process_input: patch-embed conv (stride==kernel) == im2col + matmul."""
    B, C, H, W = x.shape
    ps = patch_size
    h, w = H // ps, W // ps
    patches = x.reshape(B, C, h, ps, w, ps).transpose(0, 2, 4, 1, 3, 5)
    patches = patches.reshape(B * h * w, C * ps * ps)
    tokens = matmul(patches, p["proj_w"], p["proj_b"])
    return tokens.reshape(B, h * w, -1)


def unpatch(x, p, patch_size, h, w, out_chans, last_tanh):
    """ImgEmbed: ConvTranspose2d(D,C,k=ps,stride=ps) == matmul (+tanh) + pixel shuffle."""
    B, S, D = x.shape
    ps = patch_size
    y = matmul(x.reshape(B * S, D), p["w"], p["b"],
               activation="tanh" if last_tanh else "none",
               out_dtype=jnp.float32)
    y = y.reshape(B, h, w, out_chans, ps, ps).transpose(0, 3, 1, 4, 2, 5)
    return y.reshape(B, out_chans, h * ps, w * ps)


def pre_vit_cross_attn_forward(x, msgs, params, *, patch_size, num_heads,
                               end_addition=True, last_tanh=True):
    B = x.shape[0]
    D = params["class_token"].shape[-1]

    tokens = process_input(x, params["patch"], patch_size)               # (B,S,D) bf16
    cls = jnp.broadcast_to(params["class_token"], (B, 1, D)).astype(jnp.bfloat16)
    tokens = jnp.concatenate([cls, tokens], axis=1)                      # (B,S+1,D)
    tokens = encoder_blocks(tokens, params["encoder"], num_heads)
    tokens = tokens[:, 1:, :]                                            # drop class token

    enc_ln = (params["encoder"]["ln_g"], params["encoder"]["ln_b"])      # final LN, fused
    msgs_f32 = msgs.astype(jnp.float32)
    img_w = cross_attention(tokens, params["msg_attn"], num_heads,
                            msg_bits=msgs_f32, ln=enc_ln)
    if end_addition:
        img_w = cross_attention(tokens, params["end_attn"], num_heads,
                                kv=img_w, ln=enc_ln)

    n_p = int(round(tokens.shape[1] ** 0.5))
    return unpatch(img_w, params["unpatch"], patch_size, n_p, n_p,
                   out_chans=3, last_tanh=last_tanh)


# ---------------------------------------------------------------------------
# Deterministic parameter construction (same structure as the torch module);
# weights pre-cast to bf16, biases / LN params kept f32.
# ---------------------------------------------------------------------------
def _self_attn_params(key, d, num_heads, std=0.02):
    dh = d // num_heads
    scale = 1.0 / math.sqrt(dh)                       # fold softmax scale into Wq
    kq, kk, kv, ko = jax.random.split(key, 4)
    wq = jax.random.normal(kq, (d, d), jnp.float32) * std * scale
    wk = jax.random.normal(kk, (d, d), jnp.float32) * std
    wv = jax.random.normal(kv, (d, d), jnp.float32) * std
    return dict(
        w_qkv=jnp.concatenate([wq, wk, wv], axis=1).astype(jnp.bfloat16),
        b_qkv=jnp.zeros((3 * d,), jnp.float32),       # Q-part of bias is pre-scaled (zero here)
        w_o=(jax.random.normal(ko, (d, d), jnp.float32) * std).astype(jnp.bfloat16),
        b_o=jnp.zeros((d,), jnp.float32),
    )


def _msg_attn_params(key, d, num_heads, std=0.02):
    dh = d // num_heads
    scale = 1.0 / math.sqrt(dh)
    kq, kk, kv, ko = jax.random.split(key, 4)
    wk = jax.random.normal(kk, (d, d), jnp.float32) * std
    wv = jax.random.normal(kv, (d, d), jnp.float32) * std
    return dict(
        w_q=(jax.random.normal(kq, (d, d), jnp.float32) * std * scale).astype(jnp.bfloat16),
        b_q=jnp.zeros((d,), jnp.float32),
        wk_colsum=wk.sum(axis=0),                     # rank-1 algebraic K/V projection
        b_k=jnp.zeros((d,), jnp.float32),
        wv_colsum=wv.sum(axis=0),
        b_v=jnp.zeros((d,), jnp.float32),
        w_o=(jax.random.normal(ko, (d, d), jnp.float32) * std).astype(jnp.bfloat16),
        b_o=jnp.zeros((d,), jnp.float32),
    )


def _cross_attn_params(key, d, num_heads, std=0.02):
    dh = d // num_heads
    scale = 1.0 / math.sqrt(dh)
    kq, kk, kv, ko = jax.random.split(key, 4)
    wk = jax.random.normal(kk, (d, d), jnp.float32) * std
    wv = jax.random.normal(kv, (d, d), jnp.float32) * std
    return dict(
        w_q=(jax.random.normal(kq, (d, d), jnp.float32) * std * scale).astype(jnp.bfloat16),
        b_q=jnp.zeros((d,), jnp.float32),
        w_kv=jnp.concatenate([wk, wv], axis=1).astype(jnp.bfloat16),
        b_kv=jnp.zeros((2 * d,), jnp.float32),
        w_o=(jax.random.normal(ko, (d, d), jnp.float32) * std).astype(jnp.bfloat16),
        b_o=jnp.zeros((d,), jnp.float32),
    )


def _block_params(key, d, mlp_dim, num_heads, std=0.02):
    k1, k2, k3 = jax.random.split(key, 3)
    p = dict(
        ln1_g=jnp.ones((d,), jnp.float32), ln1_b=jnp.zeros((d,), jnp.float32),
        ln2_g=jnp.ones((d,), jnp.float32), ln2_b=jnp.zeros((d,), jnp.float32),
        mlp_w1=(jax.random.normal(k2, (d, mlp_dim), jnp.float32) * std).astype(jnp.bfloat16),
        mlp_b1=jnp.zeros((mlp_dim,), jnp.float32),
        mlp_w2=(jax.random.normal(k3, (mlp_dim, d), jnp.float32) * std).astype(jnp.bfloat16),
        mlp_b2=jnp.zeros((d,), jnp.float32),
    )
    p.update(_self_attn_params(k1, d, num_heads, std))
    return p


def init_params(key, *, embed_dim, patch_size, in_chans, img_size, depth,
                mlp_dim, num_heads, std=0.02):
    d, ps = embed_dim, patch_size
    seq = (img_size // ps) ** 2 + 1
    keys = jax.random.split(key, depth + 7)
    unpatch_bias_c = jax.random.normal(keys[6 + depth], (in_chans,), jnp.float32) * std
    return dict(
        class_token=(jax.random.normal(keys[0], (1, 1, d), jnp.float32) * std
                     ).astype(jnp.bfloat16),
        patch=dict(
            proj_w=(jax.random.normal(keys[1], (in_chans * ps * ps, d), jnp.float32)
                    * std).astype(jnp.bfloat16),
            proj_b=jnp.zeros((d,), jnp.float32),
        ),
        encoder=dict(
            pos_embedding=(jax.random.normal(keys[2], (1, seq, d), jnp.float32)
                           * std).astype(jnp.bfloat16),
            layers=[_block_params(keys[3 + i], d, mlp_dim, num_heads)
                    for i in range(depth)],
            ln_g=jnp.ones((d,), jnp.float32), ln_b=jnp.zeros((d,), jnp.float32),
        ),
        msg_attn=_msg_attn_params(keys[3 + depth], d, num_heads),
        end_attn=_cross_attn_params(keys[4 + depth], d, num_heads),
        unpatch=dict(
            w=(jax.random.normal(keys[5 + depth], (d, in_chans * ps * ps), jnp.float32)
               * std).astype(jnp.bfloat16),
            # ConvTranspose bias is per output channel -> repeat over the patch
            b=jnp.repeat(unpatch_bias_c, ps * ps),
        ),
    )


if __name__ == "__main__":
    # Small deterministic config consistent with the module
    # (scaled-down ViT: embed_dim=128 keeps the lane dimension dense).
    B, C, IMG = 2, 3, 32
    PATCH = 8
    D = 128
    HEADS = 4
    DEPTH = 2
    MLP_DIM = 4 * D
    NUM_BITS = 16

    key = jax.random.PRNGKey(0)
    k_p, k_x, k_m = jax.random.split(key, 3)

    params = init_params(k_p, embed_dim=D, patch_size=PATCH, in_chans=C,
                         img_size=IMG, depth=DEPTH, mlp_dim=MLP_DIM,
                         num_heads=HEADS)
    x = jax.random.normal(k_x, (B, C, IMG, IMG), jnp.float32)
    msgs = jax.random.bernoulli(k_m, 0.5, (B, NUM_BITS)).astype(jnp.float32) * 2.0 - 1.0

    fwd = jax.jit(functools.partial(
        pre_vit_cross_attn_forward, patch_size=PATCH, num_heads=HEADS,
        end_addition=True, last_tanh=True))

    out = fwd(x, msgs, params)
    jax.block_until_ready(out)
    assert out.shape == (B, C, IMG, IMG)
    assert bool(jnp.all(jnp.isfinite(out)))
    print("KERNEL_OK")
</pallas_src>

<mosaic_0001>
module attributes {stable_mosaic.version = 11 : i64} {
  func.func @_matmul_kernel(%arg0: i32, %arg1: i32, %arg2: i32, %arg3: memref<32x192xbf16, #tpu.memory_space<vmem>>, %arg4: memref<192x128xbf16, #tpu.memory_space<vmem>>, %arg5: memref<1x128xf32, #tpu.memory_space<vmem>>, %arg6: memref<32x128xbf16, #tpu.memory_space<vmem>>) attributes {dimension_semantics = [#tpu.dimension_semantics<parallel>, #tpu.dimension_semantics<parallel>, #tpu.dimension_semantics<arbitrary>], iteration_bounds = array<i64: 1, 1, 1>, scalar_prefetch = 0 : i64, scratch_operands = 0 : i64, tpu.core_type = #tpu.core_type<tc>, window_params = [{transform_indices = @transform_0, window_bounds = array<i64: 32, 192>}, {transform_indices = @transform_1, window_bounds = array<i64: 192, 128>}, {transform_indices = @transform_2, window_bounds = array<i64: 1, 128>}, {transform_indices = @transform_3, window_bounds = array<i64: 32, 128>}]} {
    %c0 = arith.constant 0 : index
    %c0_0 = arith.constant 0 : index
    %0 = vector.load %arg3[%c0, %c0_0] : memref<32x192xbf16, #tpu.memory_space<vmem>>, vector<32x192xbf16>
    %c0_1 = arith.constant 0 : index
    %c0_2 = arith.constant 0 : index
    %1 = vector.load %arg4[%c0_1, %c0_2] : memref<192x128xbf16, #tpu.memory_space<vmem>>, vector<192x128xbf16>
    %cst = arith.constant dense<0.000000e+00> : vector<32x128xf32>
    %2 = tpu.matmul %0, %1, %cst {dimension_numbers = #tpu.dot_dimension_numbers<[1], [0], [0], [1], [0, 0, 1, 1], [], []>} : vector<32x192xbf16>, vector<192x128xbf16>, vector<32x128xf32> -> vector<32x128xf32>
    %c0_3 = arith.constant 0 : index
    %c0_4 = arith.constant 0 : index
    %3 = vector.load %arg5[%c0_3, %c0_4] : memref<1x128xf32, #tpu.memory_space<vmem>>, vector<1x128xf32>
    %4 = vector.broadcast %3 : vector<1x128xf32> to vector<32x128xf32>
    %5 = arith.addf %2, %4 : vector<32x128xf32>
    %6 = arith.truncf %5 : vector<32x128xf32> to vector<32x128xbf16>
    %c0_5 = arith.constant 0 : index
    %c0_6 = arith.constant 0 : index
    %7 = vector.load %arg6[%c0_5, %c0_6] : memref<32x128xbf16, #tpu.memory_space<vmem>>, vector<32x128xbf16>
    tpu.vector_store %arg6[%c0_5, %c0_6], %6 {strides = array<i32>} : memref<32x128xbf16, #tpu.memory_space<vmem>>, vector<32x128xbf16>,
    return
  }
  func.func @transform_0(%arg0: i32, %arg1: i32, %arg2: i32) -> (i32, i32) {
    %c0_i32 = arith.constant 0 : i32
    return %arg0, %arg2 : i32, i32
  }
  func.func @transform_1(%arg0: i32, %arg1: i32, %arg2: i32) -> (i32, i32) {
    %c0_i32 = arith.constant 0 : i32
    return %arg2, %arg1 : i32, i32
  }
  func.func @transform_2(%arg0: i32, %arg1: i32, %arg2: i32) -> (i32, i32) {
    %c0_i32 = arith.constant 0 : i32
    %c0_i32_0 = arith.constant 0 : i32
    return %c0_i32, %arg1 : i32, i32
  }
  func.func @transform_3(%arg0: i32, %arg1: i32, %arg2: i32) -> (i32, i32) {
    %c0_i32 = arith.constant 0 : i32
    return %arg0, %arg1 : i32, i32
  }
}

module attributes {stable_mosaic.version = 11 : i64} {
  func.func @_matmul_kernel(%arg0: i32, %arg1: i32, %arg2: i32, %arg3: memref<34x128xbf16, #tpu.memory_space<vmem>>, %arg4: memref<128x128xbf16, #tpu.memory_space<vmem>>, %arg5: memref<1x128xf32, #tpu.memory_space<vmem>>, %arg6: memref<1x128xf32, #tpu.memory_space<vmem>>, %arg7: memref<1x128xf32, #tpu.memory_space<vmem>>, %arg8: memref<34x128xbf16, #tpu.memory_space<vmem>>) attributes {dimension_semantics = [#tpu.dimension_semantics<parallel>, #tpu.dimension_semantics<parallel>, #tpu.dimension_semantics<arbitrary>], iteration_bounds = array<i64: 1, 3, 1>, scalar_prefetch = 0 : i64, scratch_operands = 0 : i64, tpu.core_type = #tpu.core_type<tc>, window_params = [{transform_indices = @transform_0, window_bounds = array<i64: 34, 128>}, {transform_indices = @transform_1, window_bounds = array<i64: 128, 128>}, {transform_indices = @transform_2, window_bounds = array<i64: 1, 128>}, {transform_indices = @transform_3, window_bounds = array<i64: 1, 128>}, {transform_indices = @transform_4, window_bounds = array<i64: 1, 128>}, {transform_indices = @transform_5, window_bounds = array<i64: 34, 128>}]} {
    %c0 = arith.constant 0 : index
    %c0_0 = arith.constant 0 : index
    %0 = vector.load %arg3[%c0, %c0_0] : memref<34x128xbf16, #tpu.memory_space<vmem>>, vector<34x128xbf16>
    %1 = arith.extf %0 : vector<34x128xbf16> to vector<34x128xf32>
    %cst = arith.constant dense<0.000000e+00> : vector<34xf32>
    %2 = vector.multi_reduction <add>, %1, %cst [1] : vector<34x128xf32> to vector<34xf32>
    %3 = vector.shape_cast %2 : vector<34xf32> to vector<34x1xf32>
    %cst_1 = arith.constant 1.280000e+02 : f32
    %4 = vector.broadcast %cst_1 : f32 to vector<34x1xf32>
    %5 = arith.divf %3, %4 : vector<34x1xf32>
    %6 = vector.broadcast %5 : vector<34x1xf32> to vector<34x128xf32>
    %7 = arith.subf %1, %6 : vector<34x128xf32>
    %8 = arith.mulf %7, %7 : vector<34x128xf32>
    %cst_2 = arith.constant dense<0.000000e+00> : vector<34xf32>
    %9 = vector.multi_reduction <add>, %8, %cst_2 [1] : vector<34x128xf32> to vector<34xf32>
    %10 = vector.shape_cast %9 : vector<34xf32> to vector<34x1xf32>
    %cst_3 = arith.constant 1.280000e+02 : f32
    %11 = vector.broadcast %cst_3 : f32 to vector<34x1xf32>
    %12 = arith.divf %10, %11 : vector<34x1xf32>
    %cst_4 = arith.constant 9.99999997E-7 : f32
    %13 = vector.broadcast %cst_4 : f32 to vector<34x1xf32>
    %14 = arith.addf %12, %13 : vector<34x1xf32>
    %15 = math.rsqrt %14 : vector<34x1xf32>
    %16 = vector.broadcast %15 : vector<34x1xf32> to vector<34x128xf32>
    %17 = arith.mulf %7, %16 : vector<34x128xf32>
    %c0_5 = arith.constant 0 : index
    %c0_6 = arith.constant 0 : index
    %18 = vector.load %arg6[%c0_5, %c0_6] : memref<1x128xf32, #tpu.memory_space<vmem>>, vector<1x128xf32>
    %19 = vector.broadcast %18 : vector<1x128xf32> to vector<34x128xf32>
    %20 = arith.mulf %17, %19 : vector<34x128xf32>
    %c0_7 = arith.constant 0 : index
    %c0_8 = arith.constant 0 : index
    %21 = vector.load %arg7[%c0_7, %c0_8] : memref<1x128xf32, #tpu.memory_space<vmem>>, vector<1x128xf32>
    %22 = vector.broadcast %21 : vector<1x128xf32> to vector<34x128xf32>
    %23 = arith.addf %20, %22 : vector<34x128xf32>
    %24 = arith.truncf %23 : vector<34x128xf32> to vector<34x128xbf16>
    %c0_9 = arith.constant 0 : index
    %c0_10 = arith.constant 0 : index
    %25 = vector.load %arg4[%c0_9, %c0_10] : memref<128x128xbf16, #tpu.memory_space<vmem>>, vector<128x128xbf16>
    %cst_11 = arith.constant dense<0.000000e+00> : vector<34x128xf32>
    %26 = tpu.matmul %24, %25, %cst_11 {dimension_numbers = #tpu.dot_dimension_numbers<[1], [0], [0], [1], [0, 0, 1, 1], [], []>} : vector<34x128xbf16>, vector<128x128xbf16>, vector<34x128xf32> -> vector<34x128xf32>
    %c0_12 = arith.constant 0 : index
    %c0_13 = arith.constant 0 : index
    %27 = vector.load %arg5[%c0_12, %c0_13] : memref<1x128xf32, #tpu.memory_space<vmem>>, vector<1x128xf32>
    %28 = vector.broadcast %27 : vector<1x128xf32> to vector<34x128xf32>
    %29 = arith.addf %26, %28 : vector<34x128xf32>
    %30 = arith.truncf %29 : vector<34x128xf32> to vector<34x128xbf16>
    %c0_14 = arith.constant 0 : index
    %c0_15 = arith.constant 0 : index
    %31 = vector.load %arg8[%c0_14, %c0_15] : memref<34x128xbf16, #tpu.memory_space<vmem>>, vector<34x128xbf16>
    tpu.vector_store %arg8[%c0_14, %c0_15], %30 {strides = array<i32>} : memref<34x128xbf16, #tpu.memory_space<vmem>>, vector<34x128xbf16>,
    return
  }
  func.func @transform_0(%arg0: i32, %arg1: i32, %arg2: i32) -> (i32, i32) {
    %c0_i32 = arith.constant 0 : i32
    return %arg0, %arg2 : i32, i32
  }
  func.func @transform_1(%arg0: i32, %arg1: i32, %arg2: i32) -> (i32, i32) {
    %c0_i32 = arith.constant 0 : i32
    return %arg2, %arg1 : i32, i32
  }
  func.func @transform_2(%arg0: i32, %arg1: i32, %arg2: i32) -> (i32, i32) {
    %c0_i32 = arith.constant 0 : i32
    %c0_i32_0 = arith.constant 0 : i32
    return %c0_i32, %arg1 : i32, i32
  }
  func.func @transform_3(%arg0: i32, %arg1: i32, %arg2: i32) -> (i32, i32) {
    %c0_i32 = arith.constant 0 : i32
    %c0_i32_0 = arith.constant 0 : i32
    return %c0_i32, %arg2 : i32, i32
  }
  func.func @transform_4(%arg0: i32, %arg1: i32, %arg2: i32) -> (i32, i32) {
    %c0_i32 = arith.constant 0 : i32
    %c0_i32_0 = arith.constant 0 : i32
    return %c0_i32, %arg2 : i32, i32
  }
  func.func @transform_5(%arg0: i32, %arg1: i32, %arg2: i32) -> (i32, i32) {
    %c0_i32 = arith.constant 0 : i32
    return %arg0, %arg1 : i32, i32
  }
}

module attributes {stable_mosaic.version = 11 : i64} {
  func.func @_matmul_kernel(%arg0: i32, %arg1: i32, %arg2: i32, %arg3: memref<34x128xbf16, #tpu.memory_space<vmem>>, %arg4: memref<128x128xbf16, #tpu.memory_space<vmem>>, %arg5: memref<1x128xf32, #tpu.memory_space<vmem>>, %arg6: memref<34x128xbf16, #tpu.memory_space<vmem>>, %arg7: memref<34x128xbf16, #tpu.memory_space<vmem>>) attributes {dimension_semantics = [#tpu.dimension_semantics<parallel>, #tpu.dimension_semantics<parallel>, #tpu.dimension_semantics<arbitrary>], iteration_bounds = array<i64: 1, 1, 1>, scalar_prefetch = 0 : i64, scratch_operands = 0 : i64, tpu.core_type = #tpu.core_type<tc>, window_params = [{transform_indices = @transform_0, window_bounds = array<i64: 34, 128>}, {transform_indices = @transform_1, window_bounds = array<i64: 128, 128>}, {transform_indices = @transform_2, window_bounds = array<i64: 1, 128>}, {transform_indices = @transform_3, window_bounds = array<i64: 34, 128>}, {transform_indices = @transform_4, window_bounds = array<i64: 34, 128>}]} {
    %c0 = arith.constant 0 : index
    %c0_0 = arith.constant 0 : index
    %0 = vector.load %arg3[%c0, %c0_0] : memref<34x128xbf16, #tpu.memory_space<vmem>>, vector<34x128xbf16>
    %c0_1 = arith.constant 0 : index
    %c0_2 = arith.constant 0 : index
    %1 = vector.load %arg4[%c0_1, %c0_2] : memref<128x128xbf16, #tpu.memory_space<vmem>>, vector<128x128xbf16>
    %cst = arith.constant dense<0.000000e+00> : vector<34x128xf32>
    %2 = tpu.matmul %0, %1, %cst {dimension_numbers = #tpu.dot_dimension_numbers<[1], [0], [0], [1], [0, 0, 1, 1], [], []>} : vector<34x128xbf16>, vector<128x128xbf16>, vector<34x128xf32> -> vector<34x128xf32>
    %c0_3 = arith.constant 0 : index
    %c0_4 = arith.constant 0 : index
    %3 = vector.load %arg5[%c0_3, %c0_4] : memref<1x128xf32, #tpu.memory_space<vmem>>, vector<1x128xf32>
    %4 = vector.broadcast %3 : vector<1x128xf32> to vector<34x128xf32>
    %5 = arith.addf %2, %4 : vector<34x128xf32>
    %c0_5 = arith.constant 0 : index
    %c0_6 = arith.constant 0 : index
    %6 = vector.load %arg6[%c0_5, %c0_6] : memref<34x128xbf16, #tpu.memory_space<vmem>>, vector<34x128xbf16>
    %7 = arith.extf %6 : vector<34x128xbf16> to vector<34x128xf32>
    %8 = arith.addf %5, %7 : vector<34x128xf32>
    %9 = arith.truncf %8 : vector<34x128xf32> to vector<34x128xbf16>
    %c0_7 = arith.constant 0 : index
    %c0_8 = arith.constant 0 : index
    %10 = vector.load %arg7[%c0_7, %c0_8] : memref<34x128xbf16, #tpu.memory_space<vmem>>, vector<34x128xbf16>
    tpu.vector_store %arg7[%c0_7, %c0_8], %9 {strides = array<i32>} : memref<34x128xbf16, #tpu.memory_space<vmem>>, vector<34x128xbf16>,
    return
  }
  func.func @transform_0(%arg0: i32, %arg1: i32, %arg2: i32) -> (i32, i32) {
    %c0_i32 = arith.constant 0 : i32
    return %arg0, %arg2 : i32, i32
  }
  func.func @transform_1(%arg0: i32, %arg1: i32, %arg2: i32) -> (i32, i32) {
    %c0_i32 = arith.constant 0 : i32
    return %arg2, %arg1 : i32, i32
  }
  func.func @transform_2(%arg0: i32, %arg1: i32, %arg2: i32) -> (i32, i32) {
    %c0_i32 = arith.constant 0 : i32
    %c0_i32_0 = arith.constant 0 : i32
    return %c0_i32, %arg1 : i32, i32
  }
  func.func @transform_3(%arg0: i32, %arg1: i32, %arg2: i32) -> (i32, i32) {
    %c0_i32 = arith.constant 0 : i32
    return %arg0, %arg1 : i32, i32
  }
  func.func @transform_4(%arg0: i32, %arg1: i32, %arg2: i32) -> (i32, i32) {
    %c0_i32 = arith.constant 0 : i32
    return %arg0, %arg1 : i32, i32
  }
}

module attributes {stable_mosaic.version = 11 : i64} {
  func.func @_attention_kernel(%arg0: i32, %arg1: memref<1x17x128xbf16, #tpu.memory_space<vmem>>, %arg2: memref<1x17x128xbf16, #tpu.memory_space<vmem>>, %arg3: memref<1x17x128xbf16, #tpu.memory_space<vmem>>, %arg4: memref<1x17x128xbf16, #tpu.memory_space<vmem>>) attributes {dimension_semantics = [#tpu.dimension_semantics<parallel>], iteration_bounds = array<i64: 2>, scalar_prefetch = 0 : i64, scratch_operands = 0 : i64, tpu.core_type = #tpu.core_type<tc>, window_params = [{transform_indices = @transform_0, window_bounds = array<i64: 1, 17, 128>}, {transform_indices = @transform_1, window_bounds = array<i64: 1, 17, 128>}, {transform_indices = @transform_2, window_bounds = array<i64: 1, 17, 128>}, {transform_indices = @transform_3, window_bounds = array<i64: 1, 17, 128>}]} {
    %c0 = arith.constant 0 : index
    %c0_0 = arith.constant 0 : index
    %c0_1 = arith.constant 0 : index
    %0 = vector.load %arg1[%c0, %c0_0, %c0_1] : memref<1x17x128xbf16, #tpu.memory_space<vmem>>, vector<1x17x128xbf16>
    %1 = vector.shape_cast %0 : vector<1x17x128xbf16> to vector<17x128xbf16>
    %c0_2 = arith.constant 0 : index
    %c0_3 = arith.constant 0 : index
    %c0_4 = arith.constant 0 : index
    %2 = vector.load %arg2[%c0_2, %c0_3, %c0_4] : memref<1x17x128xbf16, #tpu.memory_space<vmem>>, vector<1x17x128xbf16>
    %3 = vector.shape_cast %2 : vector<1x17x128xbf16> to vector<17x128xbf16>
    %c0_5 = arith.constant 0 : index
    %c0_6 = arith.constant 0 : index
    %c0_7 = arith.constant 0 : index
    %4 = vector.load %arg3[%c0_5, %c0_6, %c0_7] : memref<1x17x128xbf16, #tpu.memory_space<vmem>>, vector<1x17x128xbf16>
    %5 = vector.shape_cast %4 : vector<1x17x128xbf16> to vector<17x128xbf16>
    %6 = vector.extract_strided_slice %1 {offsets = [0, 0], sizes = [17, 32], strides = [1, 1]} : vector<17x128xbf16> to vector<17x32xbf16>
    %7 = vector.extract_strided_slice %3 {offsets = [0, 0], sizes = [17, 32], strides = [1, 1]} : vector<17x128xbf16> to vector<17x32xbf16>
    %8 = vector.extract_strided_slice %5 {offsets = [0, 0], sizes = [17, 32], strides = [1, 1]} : vector<17x128xbf16> to vector<17x32xbf16>
    %cst = arith.constant dense<0.000000e+00> : vector<17x17xf32>
    %9 = tpu.matmul %6, %7, %cst {dimension_numbers = #tpu.dot_dimension_numbers<[1], [1], [0], [0], [0, 0, 1, 0], [], []>} : vector<17x32xbf16>, vector<17x32xbf16>, vector<17x17xf32> -> vector<17x17xf32>
    %cst_8 = arith.constant dense<0xFF800000> : vector<17xf32>
    %10 = vector.multi_reduction <maximumf>, %9, %cst_8 [1] : vector<17x17xf32> to vector<17xf32>
    %11 = vector.shape_cast %10 : vector<17xf32> to vector<17x1xf32>
    %12 = vector.broadcast %11 : vector<17x1xf32> to vector<17x17xf32>
    %13 = arith.subf %9, %12 : vector<17x17xf32>
    %14 = math.exp %13 : vector<17x17xf32>
    %cst_9 = arith.constant dense<0.000000e+00> : vector<17xf32>
    %15 = vector.multi_reduction <add>, %14, %cst_9 [1] : vector<17x17xf32> to vector<17xf32>
    %16 = vector.shape_cast %15 : vector<17xf32> to vector<17x1xf32>
    %17 = tpu.reciprocal %16 {approx = true} : vector<17x1xf32> -> vector<17x1xf32>
    %18 = vector.broadcast %17 : vector<17x1xf32> to vector<17x17xf32>
    %19 = arith.mulf %14, %18 : vector<17x17xf32>
    %20 = arith.truncf %19 : vector<17x17xf32> to vector<17x17xbf16>
    %cst_10 = arith.constant dense<0.000000e+00> : vector<17x32xf32>
    %21 = tpu.matmul %20, %8, %cst_10 {dimension_numbers = #tpu.dot_dimension_numbers<[1], [0], [0], [1], [0, 0, 1, 1], [], []>} : vector<17x17xbf16>, vector<17x32xbf16>, vector<17x32xf32> -> vector<17x32xf32>
    %22 = vector.extract_strided_slice %1 {offsets = [0, 32], sizes = [17, 32], strides = [1, 1]} : vector<17x128xbf16> to vector<17x32xbf16>
    %23 = vector.extract_strided_slice %3 {offsets = [0, 32], sizes = [17, 32], strides = [1, 1]} : vector<17x128xbf16> to vector<17x32xbf16>
    %24 = vector.extract_strided_slice %5 {offsets = [0, 32], sizes = [17, 32], strides = [1, 1]} : vector<17x128xbf16> to vector<17x32xbf16>
    %cst_11 = arith.constant dense<0.000000e+00> : vector<17x17xf32>
    %25 = tpu.matmul %22, %23, %cst_11 {dimension_numbers = #tpu.dot_dimension_numbers<[1], [1], [0], [0], [0, 0, 1, 0], [], []>} : vector<17x32xbf16>, vector<17x32xbf16>, vector<17x17xf32> -> vector<17x17xf32>
    %cst_12 = arith.constant dense<0xFF800000> : vector<17xf32>
    %26 = vector.multi_reduction <maximumf>, %25, %cst_12 [1] : vector<17x17xf32> to vector<17xf32>
    %27 = vector.shape_cast %26 : vector<17xf32> to vector<17x1xf32>
    %28 = vector.broadcast %27 : vector<17x1xf32> to vector<17x17xf32>
    %29 = arith.subf %25, %28 : vector<17x17xf32>
    %30 = math.exp %29 : vector<17x17xf32>
    %cst_13 = arith.constant dense<0.000000e+00> : vector<17xf32>
    %31 = vector.multi_reduction <add>, %30, %cst_13 [1] : vector<17x17xf32> to vector<17xf32>
    %32 = vector.shape_cast %31 : vector<17xf32> to vector<17x1xf32>
    %33 = tpu.reciprocal %32 {approx = true} : vector<17x1xf32> -> vector<17x1xf32>
    %34 = vector.broadcast %33 : vector<17x1xf32> to vector<17x17xf32>
    %35 = arith.mulf %30, %34 : vector<17x17xf32>
    %36 = arith.truncf %35 : vector<17x17xf32> to vector<17x17xbf16>
    %cst_14 = arith.constant dense<0.000000e+00> : vector<17x32xf32>
    %37 = tpu.matmul %36, %24, %cst_14 {dimension_numbers = #tpu.dot_dimension_numbers<[1], [0], [0], [1], [0, 0, 1, 1], [], []>} : vector<17x17xbf16>, vector<17x32xbf16>, vector<17x32xf32> -> vector<17x32xf32>
    %38 = vector.extract_strided_slice %1 {offsets = [0, 64], sizes = [17, 32], strides = [1, 1]} : vector<17x128xbf16> to vector<17x32xbf16>
    %39 = vector.extract_strided_slice %3 {offsets = [0, 64], sizes = [17, 32], strides = [1, 1]} : vector<17x128xbf16> to vector<17x32xbf16>
    %40 = vector.extract_strided_slice %5 {offsets = [0, 64], sizes = [17, 32], strides = [1, 1]} : vector<17x128xbf16> to vector<17x32xbf16>
    %cst_15 = arith.constant dense<0.000000e+00> : vector<17x17xf32>
    %41 = tpu.matmul %38, %39, %cst_15 {dimension_numbers = #tpu.dot_dimension_numbers<[1], [1], [0], [0], [0, 0, 1, 0], [], []>} : vector<17x32xbf16>, vector<17x32xbf16>, vector<17x17xf32> -> vector<17x17xf32>
    %cst_16 = arith.constant dense<0xFF800000> : vector<17xf32>
    %42 = vector.multi_reduction <maximumf>, %41, %cst_16 [1] : vector<17x17xf32> to vector<17xf32>
    %43 = vector.shape_cast %42 : vector<17xf32> to vector<17x1xf32>
    %44 = vector.broadcast %43 : vector<17x1xf32> to vector<17x17xf32>
    %45 = arith.subf %41, %44 : vector<17x17xf32>
    %46 = math.exp %45 : vector<17x17xf32>
    %cst_17 = arith.constant dense<0.000000e+00> : vector<17xf32>
    %47 = vector.multi_reduction <add>, %46, %cst_17 [1] : vector<17x17xf32> to vector<17xf32>
    %48 = vector.shape_cast %47 : vector<17xf32> to vector<17x1xf32>
    %49 = tpu.reciprocal %48 {approx = true} : vector<17x1xf32> -> vector<17x1xf32>
    %50 = vector.broadcast %49 : vector<17x1xf32> to vector<17x17xf32>
    %51 = arith.mulf %46, %50 : vector<17x17xf32>
    %52 = arith.truncf %51 : vector<17x17xf32> to vector<17x17xbf16>
    %cst_18 = arith.constant dense<0.000000e+00> : vector<17x32xf32>
    %53 = tpu.matmul %52, %40, %cst_18 {dimension_numbers = #tpu.dot_dimension_numbers<[1], [0], [0], [1], [0, 0, 1, 1], [], []>} : vector<17x17xbf16>, vector<17x32xbf16>, vector<17x32xf32> -> vector<17x32xf32>
    %54 = vector.extract_strided_slice %1 {offsets = [0, 96], sizes = [17, 32], strides = [1, 1]} : vector<17x128xbf16> to vector<17x32xbf16>
    %55 = vector.extract_strided_slice %3 {offsets = [0, 96], sizes = [17, 32], strides = [1, 1]} : vector<17x128xbf16> to vector<17x32xbf16>
    %56 = vector.extract_strided_slice %5 {offsets = [0, 96], sizes = [17, 32], strides = [1, 1]} : vector<17x128xbf16> to vector<17x32xbf16>
    %cst_19 = arith.constant dense<0.000000e+00> : vector<17x17xf32>
    %57 = tpu.matmul %54, %55, %cst_19 {dimension_numbers = #tpu.dot_dimension_numbers<[1], [1], [0], [0], [0, 0, 1, 0], [], []>} : vector<17x32xbf16>, vector<17x32xbf16>, vector<17x17xf32> -> vector<17x17xf32>
    %cst_20 = arith.constant dense<0xFF800000> : vector<17xf32>
    %58 = vector.multi_reduction <maximumf>, %57, %cst_20 [1] : vector<17x17xf32> to vector<17xf32>
    %59 = vector.shape_cast %58 : vector<17xf32> to vector<17x1xf32>
    %60 = vector.broadcast %59 : vector<17x1xf32> to vector<17x17xf32>
    %61 = arith.subf %57, %60 : vector<17x17xf32>
    %62 = math.exp %61 : vector<17x17xf32>
    %cst_21 = arith.constant dense<0.000000e+00> : vector<17xf32>
    %63 = vector.multi_reduction <add>, %62, %cst_21 [1] : vector<17x17xf32> to vector<17xf32>
    %64 = vector.shape_cast %63 : vector<17xf32> to vector<17x1xf32>
    %65 = tpu.reciprocal %64 {approx = true} : vector<17x1xf32> -> vector<17x1xf32>
    %66 = vector.broadcast %65 : vector<17x1xf32> to vector<17x17xf32>
    %67 = arith.mulf %62, %66 : vector<17x17xf32>
    %68 = arith.truncf %67 : vector<17x17xf32> to vector<17x17xbf16>
    %cst_22 = arith.constant dense<0.000000e+00> : vector<17x32xf32>
    %69 = tpu.matmul %68, %56, %cst_22 {dimension_numbers = #tpu.dot_dimension_numbers<[1], [0], [0], [1], [0, 0, 1, 1], [], []>} : vector<17x17xbf16>, vector<17x32xbf16>, vector<17x32xf32> -> vector<17x32xf32>
    %70 = tpu.concatenate %21, %37, %53, %69 in 1 : vector<17x32xf32>, vector<17x32xf32>, vector<17x32xf32>, vector<17x32xf32> -> vector<17x128xf32>
    %71 = arith.truncf %70 : vector<17x128xf32> to vector<17x128xbf16>
    %c0_23 = arith.constant 0 : index
    %c0_24 = arith.constant 0 : index
    %c0_25 = arith.constant 0 : index
    %72 = vector.load %arg4[%c0_23, %c0_24, %c0_25] : memref<1x17x128xbf16, #tpu.memory_space<vmem>>, vector<1x17x128xbf16>
    %73 = vector.shape_cast %72 : vector<1x17x128xbf16> to vector<17x128xbf16>
    %74 = vector.shape_cast %71 : vector<17x128xbf16> to vector<1x17x128xbf16>
    tpu.vector_store %arg4[%c0_23, %c0_24, %c0_25], %74 {strides = array<i32>} : memref<1x17x128xbf16, #tpu.memory_space<vmem>>, vector<1x17x128xbf16>,
    return
  }
  func.func @transform_0(%arg0: i32) -> (i32, i32, i32) {
    %c0_i32 = arith.constant 0 : i32
    %c0_i32_0 = arith.constant 0 : i32
    %c0_i32_1 = arith.constant 0 : i32
    return %arg0, %c0_i32, %c0_i32_0 : i32, i32, i32
  }
  func.func @transform_1(%arg0: i32) -> (i32, i32, i32) {
    %c0_i32 = arith.constant 0 : i32
    %c0_i32_0 = arith.constant 0 : i32
    %c0_i32_1 = arith.constant 0 : i32
    return %arg0, %c0_i32, %c0_i32_0 : i32, i32, i32
  }
  func.func @transform_2(%arg0: i32) -> (i32, i32, i32) {
    %c0_i32 = arith.constant 0 : i32
    %c0_i32_0 = arith.constant 0 : i32
    %c0_i32_1 = arith.constant 0 : i32
    return %arg0, %c0_i32, %c0_i32_0 : i32, i32, i32
  }
  func.func @transform_3(%arg0: i32) -> (i32, i32, i32) {
    %c0_i32 = arith.constant 0 : i32
    %c0_i32_0 = arith.constant 0 : i32
    %c0_i32_1 = arith.constant 0 : i32
    return %arg0, %c0_i32, %c0_i32_0 : i32, i32, i32
  }
}

module attributes {stable_mosaic.version = 11 : i64} {
  func.func @_matmul_kernel(%arg0: i32, %arg1: i32, %arg2: i32, %arg3: memref<32x128xbf16, #tpu.memory_space<vmem>>, %arg4: memref<128x128xbf16, #tpu.memory_space<vmem>>, %arg5: memref<1x128xf32, #tpu.memory_space<vmem>>, %arg6: memref<1x128xf32, #tpu.memory_space<vmem>>, %arg7: memref<1x128xf32, #tpu.memory_space<vmem>>, %arg8: memref<32x128xbf16, #tpu.memory_space<vmem>>) attributes {dimension_semantics = [#tpu.dimension_semantics<parallel>, #tpu.dimension_semantics<parallel>, #tpu.dimension_semantics<arbitrary>], iteration_bounds = array<i64: 1, 1, 1>, scalar_prefetch = 0 : i64, scratch_operands = 0 : i64, tpu.core_type = #tpu.core_type<tc>, window_params = [{transform_indices = @transform_0, window_bounds = array<i64: 32, 128>}, {transform_indices = @transform_1, window_bounds = array<i64: 128, 128>}, {transform_indices = @transform_2, window_bounds = array<i64: 1, 128>}, {transform_indices = @transform_3, window_bounds = array<i64: 1, 128>}, {transform_indices = @transform_4, window_bounds = array<i64: 1, 128>}, {transform_indices = @transform_5, window_bounds = array<i64: 32, 128>}]} {
    %c0 = arith.constant 0 : index
    %c0_0 = arith.constant 0 : index
    %0 = vector.load %arg3[%c0, %c0_0] : memref<32x128xbf16, #tpu.memory_space<vmem>>, vector<32x128xbf16>
    %1 = arith.extf %0 : vector<32x128xbf16> to vector<32x128xf32>
    %cst = arith.constant dense<0.000000e+00> : vector<32xf32>
    %2 = vector.multi_reduction <add>, %1, %cst [1] : vector<32x128xf32> to vector<32xf32>
    %3 = vector.shape_cast %2 : vector<32xf32> to vector<32x1xf32>
    %cst_1 = arith.constant 1.280000e+02 : f32
    %4 = vector.broadcast %cst_1 : f32 to vector<32x1xf32>
    %5 = arith.divf %3, %4 : vector<32x1xf32>
    %6 = vector.broadcast %5 : vector<32x1xf32> to vector<32x128xf32>
    %7 = arith.subf %1, %6 : vector<32x128xf32>
    %8 = arith.mulf %7, %7 : vector<32x128xf32>
    %cst_2 = arith.constant dense<0.000000e+00> : vector<32xf32>
    %9 = vector.multi_reduction <add>, %8, %cst_2 [1] : vector<32x128xf32> to vector<32xf32>
    %10 = vector.shape_cast %9 : vector<32xf32> to vector<32x1xf32>
    %cst_3 = arith.constant 1.280000e+02 : f32
    %11 = vector.broadcast %cst_3 : f32 to vector<32x1xf32>
    %12 = arith.divf %10, %11 : vector<32x1xf32>
    %cst_4 = arith.constant 9.99999997E-7 : f32
    %13 = vector.broadcast %cst_4 : f32 to vector<32x1xf32>
    %14 = arith.addf %12, %13 : vector<32x1xf32>
    %15 = math.rsqrt %14 : vector<32x1xf32>
    %16 = vector.broadcast %15 : vector<32x1xf32> to vector<32x128xf32>
    %17 = arith.mulf %7, %16 : vector<32x128xf32>
    %c0_5 = arith.constant 0 : index
    %c0_6 = arith.constant 0 : index
    %18 = vector.load %arg6[%c0_5, %c0_6] : memref<1x128xf32, #tpu.memory_space<vmem>>, vector<1x128xf32>
    %19 = vector.broadcast %18 : vector<1x128xf32> to vector<32x128xf32>
    %20 = arith.mulf %17, %19 : vector<32x128xf32>
    %c0_7 = arith.constant 0 : index
    %c0_8 = arith.constant 0 : index
    %21 = vector.load %arg7[%c0_7, %c0_8] : memref<1x128xf32, #tpu.memory_space<vmem>>, vector<1x128xf32>
    %22 = vector.broadcast %21 : vector<1x128xf32> to vector<32x128xf32>
    %23 = arith.addf %20, %22 : vector<32x128xf32>
    %24 = arith.truncf %23 : vector<32x128xf32> to vector<32x128xbf16>
    %c0_9 = arith.constant 0 : index
    %c0_10 = arith.constant 0 : index
    %25 = vector.load %arg4[%c0_9, %c0_10] : memref<128x128xbf16, #tpu.memory_space<vmem>>, vector<128x128xbf16>
    %cst_11 = arith.constant dense<0.000000e+00> : vector<32x128xf32>
    %26 = tpu.matmul %24, %25, %cst_11 {dimension_numbers = #tpu.dot_dimension_numbers<[1], [0], [0], [1], [0, 0, 1, 1], [], []>} : vector<32x128xbf16>, vector<128x128xbf16>, vector<32x128xf32> -> vector<32x128xf32>
    %c0_12 = arith.constant 0 : index
    %c0_13 = arith.constant 0 : index
    %27 = vector.load %arg5[%c0_12, %c0_13] : memref<1x128xf32, #tpu.memory_space<vmem>>, vector<1x128xf32>
    %28 = vector.broadcast %27 : vector<1x128xf32> to vector<32x128xf32>
    %29 = arith.addf %26, %28 : vector<32x128xf32>
    %30 = arith.truncf %29 : vector<32x128xf32> to vector<32x128xbf16>
    %c0_14 = arith.constant 0 : index
    %c0_15 = arith.constant 0 : index
    %31 = vector.load %arg8[%c0_14, %c0_15] : memref<32x128xbf16, #tpu.memory_space<vmem>>, vector<32x128xbf16>
    tpu.vector_store %arg8[%c0_14, %c0_15], %30 {strides = array<i32>} : memref<32x128xbf16, #tpu.memory_space<vmem>>, vector<32x128xbf16>,
    return
  }
  func.func @transform_0(%arg0: i32, %arg1: i32, %arg2: i32) -> (i32, i32) {
    %c0_i32 = arith.constant 0 : i32
    return %arg0, %arg2 : i32, i32
  }
  func.func @transform_1(%arg0: i32, %arg1: i32, %arg2: i32) -> (i32, i32) {
    %c0_i32 = arith.constant 0 : i32
    return %arg2, %arg1 : i32, i32
  }
  func.func @transform_2(%arg0: i32, %arg1: i32, %arg2: i32) -> (i32, i32) {
    %c0_i32 = arith.constant 0 : i32
    %c0_i32_0 = arith.constant 0 : i32
    return %c0_i32, %arg1 : i32, i32
  }
  func.func @transform_3(%arg0: i32, %arg1: i32, %arg2: i32) -> (i32, i32) {
    %c0_i32 = arith.constant 0 : i32
    %c0_i32_0 = arith.constant 0 : i32
    return %c0_i32, %arg2 : i32, i32
  }
  func.func @transform_4(%arg0: i32, %arg1: i32, %arg2: i32) -> (i32, i32) {
    %c0_i32 = arith.constant 0 : i32
    %c0_i32_0 = arith.constant 0 : i32
    return %c0_i32, %arg2 : i32, i32
  }
  func.func @transform_5(%arg0: i32, %arg1: i32, %arg2: i32) -> (i32, i32) {
    %c0_i32 = arith.constant 0 : i32
    return %arg0, %arg1 : i32, i32
  }
}

module attributes {stable_mosaic.version = 11 : i64} {
  func.func @_matmul_kernel(%arg0: i32, %arg1: i32, %arg2: i32, %arg3: memref<34x128xbf16, #tpu.memory_space<vmem>>, %arg4: memref<128x256xbf16, #tpu.memory_space<vmem>>, %arg5: memref<1x256xf32, #tpu.memory_space<vmem>>, %arg6: memref<1x128xf32, #tpu.memory_space<vmem>>, %arg7: memref<1x128xf32, #tpu.memory_space<vmem>>, %arg8: memref<34x256xbf16, #tpu.memory_space<vmem>>) attributes {dimension_semantics = [#tpu.dimension_semantics<parallel>, #tpu.dimension_semantics<parallel>, #tpu.dimension_semantics<arbitrary>], iteration_bounds = array<i64: 1, 2, 1>, scalar_prefetch = 0 : i64, scratch_operands = 0 : i64, tpu.core_type = #tpu.core_type<tc>, window_params = [{transform_indices = @transform_0, window_bounds = array<i64: 34, 128>}, {transform_indices = @transform_1, window_bounds = array<i64: 128, 256>}, {transform_indices = @transform_2, window_bounds = array<i64: 1, 256>}, {transform_indices = @transform_3, window_bounds = array<i64: 1, 128>}, {transform_indices = @transform_4, window_bounds = array<i64: 1, 128>}, {transform_indices = @transform_5, window_bounds = array<i64: 34, 256>}]} {
    %c0 = arith.constant 0 : index
    %c0_0 = arith.constant 0 : index
    %0 = vector.load %arg3[%c0, %c0_0] : memref<34x128xbf16, #tpu.memory_space<vmem>>, vector<34x128xbf16>
    %1 = arith.extf %0 : vector<34x128xbf16> to vector<34x128xf32>
    %cst = arith.constant dense<0.000000e+00> : vector<34xf32>
    %2 = vector.multi_reduction <add>, %1, %cst [1] : vector<34x128xf32> to vector<34xf32>
    %3 = vector.shape_cast %2 : vector<34xf32> to vector<34x1xf32>
    %cst_1 = arith.constant 1.280000e+02 : f32
    %4 = vector.broadcast %cst_1 : f32 to vector<34x1xf32>
    %5 = arith.divf %3, %4 : vector<34x1xf32>
    %6 = vector.broadcast %5 : vector<34x1xf32> to vector<34x128xf32>
    %7 = arith.subf %1, %6 : vector<34x128xf32>
    %8 = arith.mulf %7, %7 : vector<34x128xf32>
    %cst_2 = arith.constant dense<0.000000e+00> : vector<34xf32>
    %9 = vector.multi_reduction <add>, %8, %cst_2 [1] : vector<34x128xf32> to vector<34xf32>
    %10 = vector.shape_cast %9 : vector<34xf32> to vector<34x1xf32>
    %cst_3 = arith.constant 1.280000e+02 : f32
    %11 = vector.broadcast %cst_3 : f32 to vector<34x1xf32>
    %12 = arith.divf %10, %11 : vector<34x1xf32>
    %cst_4 = arith.constant 9.99999997E-7 : f32
    %13 = vector.broadcast %cst_4 : f32 to vector<34x1xf32>
    %14 = arith.addf %12, %13 : vector<34x1xf32>
    %15 = math.rsqrt %14 : vector<34x1xf32>
    %16 = vector.broadcast %15 : vector<34x1xf32> to vector<34x128xf32>
    %17 = arith.mulf %7, %16 : vector<34x128xf32>
    %c0_5 = arith.constant 0 : index
    %c0_6 = arith.constant 0 : index
    %18 = vector.load %arg6[%c0_5, %c0_6] : memref<1x128xf32, #tpu.memory_space<vmem>>, vector<1x128xf32>
    %19 = vector.broadcast %18 : vector<1x128xf32> to vector<34x128xf32>
    %20 = arith.mulf %17, %19 : vector<34x128xf32>
    %c0_7 = arith.constant 0 : index
    %c0_8 = arith.constant 0 : index
    %21 = vector.load %arg7[%c0_7, %c0_8] : memref<1x128xf32, #tpu.memory_space<vmem>>, vector<1x128xf32>
    %22 = vector.broadcast %21 : vector<1x128xf32> to vector<34x128xf32>
    %23 = arith.addf %20, %22 : vector<34x128xf32>
    %24 = arith.truncf %23 : vector<34x128xf32> to vector<34x128xbf16>
    %c0_9 = arith.constant 0 : index
    %c0_10 = arith.constant 0 : index
    %25 = vector.load %arg4[%c0_9, %c0_10] : memref<128x256xbf16, #tpu.memory_space<vmem>>, vector<128x256xbf16>
    %cst_11 = arith.constant dense<0.000000e+00> : vector<34x256xf32>
    %26 = tpu.matmul %24, %25, %cst_11 {dimension_numbers = #tpu.dot_dimension_numbers<[1], [0], [0], [1], [0, 0, 1, 1], [], []>} : vector<34x128xbf16>, vector<128x256xbf16>, vector<34x256xf32> -> vector<34x256xf32>
    %c0_12 = arith.constant 0 : index
    %c0_13 = arith.constant 0 : index
    %27 = vector.load %arg5[%c0_12, %c0_13] : memref<1x256xf32, #tpu.memory_space<vmem>>, vector<1x256xf32>
    %28 = vector.broadcast %27 : vector<1x256xf32> to vector<34x256xf32>
    %29 = arith.addf %26, %28 : vector<34x256xf32>
    %cst_14 = arith.constant 5.000000e-01 : f32
    %30 = vector.broadcast %cst_14 : f32 to vector<34x256xf32>
    %31 = arith.mulf %30, %29 : vector<34x256xf32>
    %cst_15 = arith.constant 0.707106769 : f32
    %32 = vector.broadcast %cst_15 : f32 to vector<34x256xf32>
    %33 = arith.mulf %29, %32 : vector<34x256xf32>
    %cst_16 = arith.constant 0.000000e+00 : f32
    %34 = vector.broadcast %cst_16 : f32 to vector<34x256xf32>
    %35 = arith.cmpf oge, %33, %34 : vector<34x256xf32>
    %cst_17 = arith.constant 1.000000e+00 : f32
    %cst_18 = arith.constant -1.000000e+00 : f32
    %36 = vector.broadcast %cst_17 : f32 to vector<34x256xf32>
    %37 = vector.broadcast %cst_18 : f32 to vector<34x256xf32>
    %38 = arith.select %35, %36, %37 : vector<34x256xi1>, vector<34x256xf32>
    %39 = math.absf %33 : vector<34x256xf32>
    %cst_19 = arith.constant 0.327591091 : f32
    %40 = vector.broadcast %cst_19 : f32 to vector<34x256xf32>
    %41 = arith.mulf %40, %39 : vector<34x256xf32>
    %cst_20 = arith.constant 1.000000e+00 : f32
    %42 = vector.broadcast %cst_20 : f32 to vector<34x256xf32>
    %43 = arith.addf %42, %41 : vector<34x256xf32>
    %cst_21 = arith.constant 1.000000e+00 : f32
    %44 = vector.broadcast %cst_21 : f32 to vector<34x256xf32>
    %45 = arith.divf %44, %43 : vector<34x256xf32>
    %cst_22 = arith.constant 1.06140542 : f32
    %46 = vector.broadcast %cst_22 : f32 to vector<34x256xf32>
    %47 = arith.mulf %46, %45 : vector<34x256xf32>
    %cst_23 = arith.constant -1.45315206 : f32
    %48 = vector.broadcast %cst_23 : f32 to vector<34x256xf32>
    %49 = arith.addf %47, %48 : vector<34x256xf32>
    %50 = arith.mulf %49, %45 : vector<34x256xf32>
    %cst_24 = arith.constant 1.42141378 : f32
    %51 = vector.broadcast %cst_24 : f32 to vector<34x256xf32>
    %52 = arith.addf %50, %51 : vector<34x256xf32>
    %53 = arith.mulf %52, %45 : vector<34x256xf32>
    %cst_25 = arith.constant -0.284496725 : f32
    %54 = vector.broadcast %cst_25 : f32 to vector<34x256xf32>
    %55 = arith.addf %53, %54 : vector<34x256xf32>
    %56 = arith.mulf %55, %45 : vector<34x256xf32>
    %cst_26 = arith.constant 0.254829586 : f32
    %57 = vector.broadcast %cst_26 : f32 to vector<34x256xf32>
    %58 = arith.addf %56, %57 : vector<34x256xf32>
    %59 = arith.mulf %58, %45 : vector<34x256xf32>
    %cst_27 = arith.constant 0.000000e+00 : f32
    %60 = vector.broadcast %cst_27 : f32 to vector<34x256xf32>
    %61 = arith.subf %60, %39 : vector<34x256xf32>
    %62 = arith.mulf %61, %39 : vector<34x256xf32>
    %63 = math.exp %62 : vector<34x256xf32>
    %64 = arith.mulf %59, %63 : vector<34x256xf32>
    %cst_28 = arith.constant 1.000000e+00 : f32
    %65 = vector.broadcast %cst_28 : f32 to vector<34x256xf32>
    %66 = arith.subf %65, %64 : vector<34x256xf32>
    %67 = arith.mulf %38, %66 : vector<34x256xf32>
    %cst_29 = arith.constant 1.000000e+00 : f32
    %68 = vector.broadcast %cst_29 : f32 to vector<34x256xf32>
    %69 = arith.addf %68, %67 : vector<34x256xf32>
    %70 = arith.mulf %31, %69 : vector<34x256xf32>
    %71 = arith.truncf %70 : vector<34x256xf32> to vector<34x256xbf16>
    %c0_30 = arith.constant 0 : index
    %c0_31 = arith.constant 0 : index
    %72 = vector.load %arg8[%c0_30, %c0_31] : memref<34x256xbf16, #tpu.memory_space<vmem>>, vector<34x256xbf16>
    tpu.vector_store %arg8[%c0_30, %c0_31], %71 {strides = array<i32>} : memref<34x256xbf16, #tpu.memory_space<vmem>>, vector<34x256xbf16>,
    return
  }
  func.func @transform_0(%arg0: i32, %arg1: i32, %arg2: i32) -> (i32, i32) {
    %c0_i32 = arith.constant 0 : i32
    return %arg0, %arg2 : i32, i32
  }
  func.func @transform_1(%arg0: i32, %arg1: i32, %arg2: i32) -> (i32, i32) {
    %c0_i32 = arith.constant 0 : i32
    return %arg2, %arg1 : i32, i32
  }
  func.func @transform_2(%arg0: i32, %arg1: i32, %arg2: i32) -> (i32, i32) {
    %c0_i32 = arith.constant 0 : i32
    %c0_i32_0 = arith.constant 0 : i32
    return %c0_i32, %arg1 : i32, i32
  }
  func.func @transform_3(%arg0: i32, %arg1: i32, %arg2: i32) -> (i32, i32) {
    %c0_i32 = arith.constant 0 : i32
    %c0_i32_0 = arith.constant 0 : i32
    return %c0_i32, %arg2 : i32, i32
  }
  func.func @transform_4(%arg0: i32, %arg1: i32, %arg2: i32) -> (i32, i32) {
    %c0_i32 = arith.constant 0 : i32
    %c0_i32_0 = arith.constant 0 : i32
    return %c0_i32, %arg2 : i32, i32
  }
  func.func @transform_5(%arg0: i32, %arg1: i32, %arg2: i32) -> (i32, i32) {
    %c0_i32 = arith.constant 0 : i32
    return %arg0, %arg1 : i32, i32
  }
}

module attributes {stable_mosaic.version = 11 : i64} {
  func.func @_matmul_kernel(%arg0: i32, %arg1: i32, %arg2: i32, %arg3: memref<34x512xbf16, #tpu.memory_space<vmem>>, %arg4: memref<512x128xbf16, #tpu.memory_space<vmem>>, %arg5: memref<1x128xf32, #tpu.memory_space<vmem>>, %arg6: memref<34x128xbf16, #tpu.memory_space<vmem>>, %arg7: memref<34x128xbf16, #tpu.memory_space<vmem>>) attributes {dimension_semantics = [#tpu.dimension_semantics<parallel>, #tpu.dimension_semantics<parallel>, #tpu.dimension_semantics<arbitrary>], iteration_bounds = array<i64: 1, 1, 1>, scalar_prefetch = 0 : i64, scratch_operands = 0 : i64, tpu.core_type = #tpu.core_type<tc>, window_params = [{transform_indices = @transform_0, window_bounds = array<i64: 34, 512>}, {transform_indices = @transform_1, window_bounds = array<i64: 512, 128>}, {transform_indices = @transform_2, window_bounds = array<i64: 1, 128>}, {transform_indices = @transform_3, window_bounds = array<i64: 34, 128>}, {transform_indices = @transform_4, window_bounds = array<i64: 34, 128>}]} {
    %c0 = arith.constant 0 : index
    %c0_0 = arith.constant 0 : index
    %0 = vector.load %arg3[%c0, %c0_0] : memref<34x512xbf16, #tpu.memory_space<vmem>>, vector<34x512xbf16>
    %c0_1 = arith.constant 0 : index
    %c0_2 = arith.constant 0 : index
    %1 = vector.load %arg4[%c0_1, %c0_2] : memref<512x128xbf16, #tpu.memory_space<vmem>>, vector<512x128xbf16>
    %cst = arith.constant dense<0.000000e+00> : vector<34x128xf32>
    %2 = tpu.matmul %0, %1, %cst {dimension_numbers = #tpu.dot_dimension_numbers<[1], [0], [0], [1], [0, 0, 1, 1], [], []>} : vector<34x512xbf16>, vector<512x128xbf16>, vector<34x128xf32> -> vector<34x128xf32>
    %c0_3 = arith.constant 0 : index
    %c0_4 = arith.constant 0 : index
    %3 = vector.load %arg5[%c0_3, %c0_4] : memref<1x128xf32, #tpu.memory_space<vmem>>, vector<1x128xf32>
    %4 = vector.broadcast %3 : vector<1x128xf32> to vector<34x128xf32>
    %5 = arith.addf %2, %4 : vector<34x128xf32>
    %c0_5 = arith.constant 0 : index
    %c0_6 = arith.constant 0 : index
    %6 = vector.load %arg6[%c0_5, %c0_6] : memref<34x128xbf16, #tpu.memory_space<vmem>>, vector<34x128xbf16>
    %7 = arith.extf %6 : vector<34x128xbf16> to vector<34x128xf32>
    %8 = arith.addf %5, %7 : vector<34x128xf32>
    %9 = arith.truncf %8 : vector<34x128xf32> to vector<34x128xbf16>
    %c0_7 = arith.constant 0 : index
    %c0_8 = arith.constant 0 : index
    %10 = vector.load %arg7[%c0_7, %c0_8] : memref<34x128xbf16, #tpu.memory_space<vmem>>, vector<34x128xbf16>
    tpu.vector_store %arg7[%c0_7, %c0_8], %9 {strides = array<i32>} : memref<34x128xbf16, #tpu.memory_space<vmem>>, vector<34x128xbf16>,
    return
  }
  func.func @transform_0(%arg0: i32, %arg1: i32, %arg2: i32) -> (i32, i32) {
    %c0_i32 = arith.constant 0 : i32
    return %arg0, %arg2 : i32, i32
  }
  func.func @transform_1(%arg0: i32, %arg1: i32, %arg2: i32) -> (i32, i32) {
    %c0_i32 = arith.constant 0 : i32
    return %arg2, %arg1 : i32, i32
  }
  func.func @transform_2(%arg0: i32, %arg1: i32, %arg2: i32) -> (i32, i32) {
    %c0_i32 = arith.constant 0 : i32
    %c0_i32_0 = arith.constant 0 : i32
    return %c0_i32, %arg1 : i32, i32
  }
  func.func @transform_3(%arg0: i32, %arg1: i32, %arg2: i32) -> (i32, i32) {
    %c0_i32 = arith.constant 0 : i32
    return %arg0, %arg1 : i32, i32
  }
  func.func @transform_4(%arg0: i32, %arg1: i32, %arg2: i32) -> (i32, i32) {
    %c0_i32 = arith.constant 0 : i32
    return %arg0, %arg1 : i32, i32
  }
}

module attributes {stable_mosaic.version = 11 : i64} {
  func.func @_attention_kernel(%arg0: i32, %arg1: memref<1x16x128xbf16, #tpu.memory_space<vmem>>, %arg2: memref<1x16x128xbf16, #tpu.memory_space<vmem>>, %arg3: memref<1x16x128xbf16, #tpu.memory_space<vmem>>, %arg4: memref<1x16x128xbf16, #tpu.memory_space<vmem>>) attributes {dimension_semantics = [#tpu.dimension_semantics<parallel>], iteration_bounds = array<i64: 2>, scalar_prefetch = 0 : i64, scratch_operands = 0 : i64, tpu.core_type = #tpu.core_type<tc>, window_params = [{transform_indices = @transform_0, window_bounds = array<i64: 1, 16, 128>}, {transform_indices = @transform_1, window_bounds = array<i64: 1, 16, 128>}, {transform_indices = @transform_2, window_bounds = array<i64: 1, 16, 128>}, {transform_indices = @transform_3, window_bounds = array<i64: 1, 16, 128>}]} {
    %c0 = arith.constant 0 : index
    %c0_0 = arith.constant 0 : index
    %c0_1 = arith.constant 0 : index
    %0 = vector.load %arg1[%c0, %c0_0, %c0_1] : memref<1x16x128xbf16, #tpu.memory_space<vmem>>, vector<1x16x128xbf16>
    %1 = vector.shape_cast %0 : vector<1x16x128xbf16> to vector<16x128xbf16>
    %c0_2 = arith.constant 0 : index
    %c0_3 = arith.constant 0 : index
    %c0_4 = arith.constant 0 : index
    %2 = vector.load %arg2[%c0_2, %c0_3, %c0_4] : memref<1x16x128xbf16, #tpu.memory_space<vmem>>, vector<1x16x128xbf16>
    %3 = vector.shape_cast %2 : vector<1x16x128xbf16> to vector<16x128xbf16>
    %c0_5 = arith.constant 0 : index
    %c0_6 = arith.constant 0 : index
    %c0_7 = arith.constant 0 : index
    %4 = vector.load %arg3[%c0_5, %c0_6, %c0_7] : memref<1x16x128xbf16, #tpu.memory_space<vmem>>, vector<1x16x128xbf16>
    %5 = vector.shape_cast %4 : vector<1x16x128xbf16> to vector<16x128xbf16>
    %6 = vector.extract_strided_slice %1 {offsets = [0, 0], sizes = [16, 32], strides = [1, 1]} : vector<16x128xbf16> to vector<16x32xbf16>
    %7 = vector.extract_strided_slice %3 {offsets = [0, 0], sizes = [16, 32], strides = [1, 1]} : vector<16x128xbf16> to vector<16x32xbf16>
    %8 = vector.extract_strided_slice %5 {offsets = [0, 0], sizes = [16, 32], strides = [1, 1]} : vector<16x128xbf16> to vector<16x32xbf16>
    %cst = arith.constant dense<0.000000e+00> : vector<16x16xf32>
    %9 = tpu.matmul %6, %7, %cst {dimension_numbers = #tpu.dot_dimension_numbers<[1], [1], [0], [0], [0, 0, 1, 0], [], []>} : vector<16x32xbf16>, vector<16x32xbf16>, vector<16x16xf32> -> vector<16x16xf32>
    %cst_8 = arith.constant dense<0xFF800000> : vector<16xf32>
    %10 = vector.multi_reduction <maximumf>, %9, %cst_8 [1] : vector<16x16xf32> to vector<16xf32>
    %11 = vector.shape_cast %10 : vector<16xf32> to vector<16x1xf32>
    %12 = vector.broadcast %11 : vector<16x1xf32> to vector<16x16xf32>
    %13 = arith.subf %9, %12 : vector<16x16xf32>
    %14 = math.exp %13 : vector<16x16xf32>
    %cst_9 = arith.constant dense<0.000000e+00> : vector<16xf32>
    %15 = vector.multi_reduction <add>, %14, %cst_9 [1] : vector<16x16xf32> to vector<16xf32>
    %16 = vector.shape_cast %15 : vector<16xf32> to vector<16x1xf32>
    %17 = tpu.reciprocal %16 {approx = true} : vector<16x1xf32> -> vector<16x1xf32>
    %18 = vector.broadcast %17 : vector<16x1xf32> to vector<16x16xf32>
    %19 = arith.mulf %14, %18 : vector<16x16xf32>
    %20 = arith.truncf %19 : vector<16x16xf32> to vector<16x16xbf16>
    %cst_10 = arith.constant dense<0.000000e+00> : vector<16x32xf32>
    %21 = tpu.matmul %20, %8, %cst_10 {dimension_numbers = #tpu.dot_dimension_numbers<[1], [0], [0], [1], [0, 0, 1, 1], [], []>} : vector<16x16xbf16>, vector<16x32xbf16>, vector<16x32xf32> -> vector<16x32xf32>
    %22 = vector.extract_strided_slice %1 {offsets = [0, 32], sizes = [16, 32], strides = [1, 1]} : vector<16x128xbf16> to vector<16x32xbf16>
    %23 = vector.extract_strided_slice %3 {offsets = [0, 32], sizes = [16, 32], strides = [1, 1]} : vector<16x128xbf16> to vector<16x32xbf16>
    %24 = vector.extract_strided_slice %5 {offsets = [0, 32], sizes = [16, 32], strides = [1, 1]} : vector<16x128xbf16> to vector<16x32xbf16>
    %cst_11 = arith.constant dense<0.000000e+00> : vector<16x16xf32>
    %25 = tpu.matmul %22, %23, %cst_11 {dimension_numbers = #tpu.dot_dimension_numbers<[1], [1], [0], [0], [0, 0, 1, 0], [], []>} : vector<16x32xbf16>, vector<16x32xbf16>, vector<16x16xf32> -> vector<16x16xf32>
    %cst_12 = arith.constant dense<0xFF800000> : vector<16xf32>
    %26 = vector.multi_reduction <maximumf>, %25, %cst_12 [1] : vector<16x16xf32> to vector<16xf32>
    %27 = vector.shape_cast %26 : vector<16xf32> to vector<16x1xf32>
    %28 = vector.broadcast %27 : vector<16x1xf32> to vector<16x16xf32>
    %29 = arith.subf %25, %28 : vector<16x16xf32>
    %30 = math.exp %29 : vector<16x16xf32>
    %cst_13 = arith.constant dense<0.000000e+00> : vector<16xf32>
    %31 = vector.multi_reduction <add>, %30, %cst_13 [1] : vector<16x16xf32> to vector<16xf32>
    %32 = vector.shape_cast %31 : vector<16xf32> to vector<16x1xf32>
    %33 = tpu.reciprocal %32 {approx = true} : vector<16x1xf32> -> vector<16x1xf32>
    %34 = vector.broadcast %33 : vector<16x1xf32> to vector<16x16xf32>
    %35 = arith.mulf %30, %34 : vector<16x16xf32>
    %36 = arith.truncf %35 : vector<16x16xf32> to vector<16x16xbf16>
    %cst_14 = arith.constant dense<0.000000e+00> : vector<16x32xf32>
    %37 = tpu.matmul %36, %24, %cst_14 {dimension_numbers = #tpu.dot_dimension_numbers<[1], [0], [0], [1], [0, 0, 1, 1], [], []>} : vector<16x16xbf16>, vector<16x32xbf16>, vector<16x32xf32> -> vector<16x32xf32>
    %38 = vector.extract_strided_slice %1 {offsets = [0, 64], sizes = [16, 32], strides = [1, 1]} : vector<16x128xbf16> to vector<16x32xbf16>
    %39 = vector.extract_strided_slice %3 {offsets = [0, 64], sizes = [16, 32], strides = [1, 1]} : vector<16x128xbf16> to vector<16x32xbf16>
    %40 = vector.extract_strided_slice %5 {offsets = [0, 64], sizes = [16, 32], strides = [1, 1]} : vector<16x128xbf16> to vector<16x32xbf16>
    %cst_15 = arith.constant dense<0.000000e+00> : vector<16x16xf32>
    %41 = tpu.matmul %38, %39, %cst_15 {dimension_numbers = #tpu.dot_dimension_numbers<[1], [1], [0], [0], [0, 0, 1, 0], [], []>} : vector<16x32xbf16>, vector<16x32xbf16>, vector<16x16xf32> -> vector<16x16xf32>
    %cst_16 = arith.constant dense<0xFF800000> : vector<16xf32>
    %42 = vector.multi_reduction <maximumf>, %41, %cst_16 [1] : vector<16x16xf32> to vector<16xf32>
    %43 = vector.shape_cast %42 : vector<16xf32> to vector<16x1xf32>
    %44 = vector.broadcast %43 : vector<16x1xf32> to vector<16x16xf32>
    %45 = arith.subf %41, %44 : vector<16x16xf32>
    %46 = math.exp %45 : vector<16x16xf32>
    %cst_17 = arith.constant dense<0.000000e+00> : vector<16xf32>
    %47 = vector.multi_reduction <add>, %46, %cst_17 [1] : vector<16x16xf32> to vector<16xf32>
    %48 = vector.shape_cast %47 : vector<16xf32> to vector<16x1xf32>
    %49 = tpu.reciprocal %48 {approx = true} : vector<16x1xf32> -> vector<16x1xf32>
    %50 = vector.broadcast %49 : vector<16x1xf32> to vector<16x16xf32>
    %51 = arith.mulf %46, %50 : vector<16x16xf32>
    %52 = arith.truncf %51 : vector<16x16xf32> to vector<16x16xbf16>
    %cst_18 = arith.constant dense<0.000000e+00> : vector<16x32xf32>
    %53 = tpu.matmul %52, %40, %cst_18 {dimension_numbers = #tpu.dot_dimension_numbers<[1], [0], [0], [1], [0, 0, 1, 1], [], []>} : vector<16x16xbf16>, vector<16x32xbf16>, vector<16x32xf32> -> vector<16x32xf32>
    %54 = vector.extract_strided_slice %1 {offsets = [0, 96], sizes = [16, 32], strides = [1, 1]} : vector<16x128xbf16> to vector<16x32xbf16>
    %55 = vector.extract_strided_slice %3 {offsets = [0, 96], sizes = [16, 32], strides = [1, 1]} : vector<16x128xbf16> to vector<16x32xbf16>
    %56 = vector.extract_strided_slice %5 {offsets = [0, 96], sizes = [16, 32], strides = [1, 1]} : vector<16x128xbf16> to vector<16x32xbf16>
    %cst_19 = arith.constant dense<0.000000e+00> : vector<16x16xf32>
    %57 = tpu.matmul %54, %55, %cst_19 {dimension_numbers = #tpu.dot_dimension_numbers<[1], [1], [0], [0], [0, 0, 1, 0], [], []>} : vector<16x32xbf16>, vector<16x32xbf16>, vector<16x16xf32> -> vector<16x16xf32>
    %cst_20 = arith.constant dense<0xFF800000> : vector<16xf32>
    %58 = vector.multi_reduction <maximumf>, %57, %cst_20 [1] : vector<16x16xf32> to vector<16xf32>
    %59 = vector.shape_cast %58 : vector<16xf32> to vector<16x1xf32>
    %60 = vector.broadcast %59 : vector<16x1xf32> to vector<16x16xf32>
    %61 = arith.subf %57, %60 : vector<16x16xf32>
    %62 = math.exp %61 : vector<16x16xf32>
    %cst_21 = arith.constant dense<0.000000e+00> : vector<16xf32>
    %63 = vector.multi_reduction <add>, %62, %cst_21 [1] : vector<16x16xf32> to vector<16xf32>
    %64 = vector.shape_cast %63 : vector<16xf32> to vector<16x1xf32>
    %65 = tpu.reciprocal %64 {approx = true} : vector<16x1xf32> -> vector<16x1xf32>
    %66 = vector.broadcast %65 : vector<16x1xf32> to vector<16x16xf32>
    %67 = arith.mulf %62, %66 : vector<16x16xf32>
    %68 = arith.truncf %67 : vector<16x16xf32> to vector<16x16xbf16>
    %cst_22 = arith.constant dense<0.000000e+00> : vector<16x32xf32>
    %69 = tpu.matmul %68, %56, %cst_22 {dimension_numbers = #tpu.dot_dimension_numbers<[1], [0], [0], [1], [0, 0, 1, 1], [], []>} : vector<16x16xbf16>, vector<16x32xbf16>, vector<16x32xf32> -> vector<16x32xf32>
    %70 = tpu.concatenate %21, %37, %53, %69 in 1 : vector<16x32xf32>, vector<16x32xf32>, vector<16x32xf32>, vector<16x32xf32> -> vector<16x128xf32>
    %71 = arith.truncf %70 : vector<16x128xf32> to vector<16x128xbf16>
    %c0_23 = arith.constant 0 : index
    %c0_24 = arith.constant 0 : index
    %c0_25 = arith.constant 0 : index
    %72 = vector.load %arg4[%c0_23, %c0_24, %c0_25] : memref<1x16x128xbf16, #tpu.memory_space<vmem>>, vector<1x16x128xbf16>
    %73 = vector.shape_cast %72 : vector<1x16x128xbf16> to vector<16x128xbf16>
    %74 = vector.shape_cast %71 : vector<16x128xbf16> to vector<1x16x128xbf16>
    tpu.vector_store %arg4[%c0_23, %c0_24, %c0_25], %74 {strides = array<i32>} : memref<1x16x128xbf16, #tpu.memory_space<vmem>>, vector<1x16x128xbf16>,
    return
  }
  func.func @transform_0(%arg0: i32) -> (i32, i32, i32) {
    %c0_i32 = arith.constant 0 : i32
    %c0_i32_0 = arith.constant 0 : i32
    %c0_i32_1 = arith.constant 0 : i32
    return %arg0, %c0_i32, %c0_i32_0 : i32, i32, i32
  }
  func.func @transform_1(%arg0: i32) -> (i32, i32, i32) {
    %c0_i32 = arith.constant 0 : i32
    %c0_i32_0 = arith.constant 0 : i32
    %c0_i32_1 = arith.constant 0 : i32
    return %arg0, %c0_i32, %c0_i32_0 : i32, i32, i32
  }
  func.func @transform_2(%arg0: i32) -> (i32, i32, i32) {
    %c0_i32 = arith.constant 0 : i32
    %c0_i32_0 = arith.constant 0 : i32
    %c0_i32_1 = arith.constant 0 : i32
    return %arg0, %c0_i32, %c0_i32_0 : i32, i32, i32
  }
  func.func @transform_3(%arg0: i32) -> (i32, i32, i32) {
    %c0_i32 = arith.constant 0 : i32
    %c0_i32_0 = arith.constant 0 : i32
    %c0_i32_1 = arith.constant 0 : i32
    return %arg0, %c0_i32, %c0_i32_0 : i32, i32, i32
  }
}

module attributes {stable_mosaic.version = 11 : i64} {
  func.func @_matmul_kernel(%arg0: i32, %arg1: i32, %arg2: i32, %arg3: memref<32x128xbf16, #tpu.memory_space<vmem>>, %arg4: memref<128x128xbf16, #tpu.memory_space<vmem>>, %arg5: memref<1x128xf32, #tpu.memory_space<vmem>>, %arg6: memref<32x128xbf16, #tpu.memory_space<vmem>>) attributes {dimension_semantics = [#tpu.dimension_semantics<parallel>, #tpu.dimension_semantics<parallel>, #tpu.dimension_semantics<arbitrary>], iteration_bounds = array<i64: 1, 1, 1>, scalar_prefetch = 0 : i64, scratch_operands = 0 : i64, tpu.core_type = #tpu.core_type<tc>, window_params = [{transform_indices = @transform_0, window_bounds = array<i64: 32, 128>}, {transform_indices = @transform_1, window_bounds = array<i64: 128, 128>}, {transform_indices = @transform_2, window_bounds = array<i64: 1, 128>}, {transform_indices = @transform_3, window_bounds = array<i64: 32, 128>}]} {
    %c0 = arith.constant 0 : index
    %c0_0 = arith.constant 0 : index
    %0 = vector.load %arg3[%c0, %c0_0] : memref<32x128xbf16, #tpu.memory_space<vmem>>, vector<32x128xbf16>
    %c0_1 = arith.constant 0 : index
    %c0_2 = arith.constant 0 : index
    %1 = vector.load %arg4[%c0_1, %c0_2] : memref<128x128xbf16, #tpu.memory_space<vmem>>, vector<128x128xbf16>
    %cst = arith.constant dense<0.000000e+00> : vector<32x128xf32>
    %2 = tpu.matmul %0, %1, %cst {dimension_numbers = #tpu.dot_dimension_numbers<[1], [0], [0], [1], [0, 0, 1, 1], [], []>} : vector<32x128xbf16>, vector<128x128xbf16>, vector<32x128xf32> -> vector<32x128xf32>
    %c0_3 = arith.constant 0 : index
    %c0_4 = arith.constant 0 : index
    %3 = vector.load %arg5[%c0_3, %c0_4] : memref<1x128xf32, #tpu.memory_space<vmem>>, vector<1x128xf32>
    %4 = vector.broadcast %3 : vector<1x128xf32> to vector<32x128xf32>
    %5 = arith.addf %2, %4 : vector<32x128xf32>
    %6 = arith.truncf %5 : vector<32x128xf32> to vector<32x128xbf16>
    %c0_5 = arith.constant 0 : index
    %c0_6 = arith.constant 0 : index
    %7 = vector.load %arg6[%c0_5, %c0_6] : memref<32x128xbf16, #tpu.memory_space<vmem>>, vector<32x128xbf16>
    tpu.vector_store %arg6[%c0_5, %c0_6], %6 {strides = array<i32>} : memref<32x128xbf16, #tpu.memory_space<vmem>>, vector<32x128xbf16>,
    return
  }
  func.func @transform_0(%arg0: i32, %arg1: i32, %arg2: i32) -> (i32, i32) {
    %c0_i32 = arith.constant 0 : i32
    return %arg0, %arg2 : i32, i32
  }
  func.func @transform_1(%arg0: i32, %arg1: i32, %arg2: i32) -> (i32, i32) {
    %c0_i32 = arith.constant 0 : i32
    return %arg2, %arg1 : i32, i32
  }
  func.func @transform_2(%arg0: i32, %arg1: i32, %arg2: i32) -> (i32, i32) {
    %c0_i32 = arith.constant 0 : i32
    %c0_i32_0 = arith.constant 0 : i32
    return %c0_i32, %arg1 : i32, i32
  }
  func.func @transform_3(%arg0: i32, %arg1: i32, %arg2: i32) -> (i32, i32) {
    %c0_i32 = arith.constant 0 : i32
    return %arg0, %arg1 : i32, i32
  }
}

module attributes {stable_mosaic.version = 11 : i64} {
  func.func @_matmul_kernel(%arg0: i32, %arg1: i32, %arg2: i32, %arg3: memref<32x128xbf16, #tpu.memory_space<vmem>>, %arg4: memref<128x128xbf16, #tpu.memory_space<vmem>>, %arg5: memref<1x128xf32, #tpu.memory_space<vmem>>, %arg6: memref<32x128xbf16, #tpu.memory_space<vmem>>) attributes {dimension_semantics = [#tpu.dimension_semantics<parallel>, #tpu.dimension_semantics<parallel>, #tpu.dimension_semantics<arbitrary>], iteration_bounds = array<i64: 1, 2, 1>, scalar_prefetch = 0 : i64, scratch_operands = 0 : i64, tpu.core_type = #tpu.core_type<tc>, window_params = [{transform_indices = @transform_0, window_bounds = array<i64: 32, 128>}, {transform_indices = @transform_1, window_bounds = array<i64: 128, 128>}, {transform_indices = @transform_2, window_bounds = array<i64: 1, 128>}, {transform_indices = @transform_3, window_bounds = array<i64: 32, 128>}]} {
    %c0 = arith.constant 0 : index
    %c0_0 = arith.constant 0 : index
    %0 = vector.load %arg3[%c0, %c0_0] : memref<32x128xbf16, #tpu.memory_space<vmem>>, vector<32x128xbf16>
    %c0_1 = arith.constant 0 : index
    %c0_2 = arith.constant 0 : index
    %1 = vector.load %arg4[%c0_1, %c0_2] : memref<128x128xbf16, #tpu.memory_space<vmem>>, vector<128x128xbf16>
    %cst = arith.constant dense<0.000000e+00> : vector<32x128xf32>
    %2 = tpu.matmul %0, %1, %cst {dimension_numbers = #tpu.dot_dimension_numbers<[1], [0], [0], [1], [0, 0, 1, 1], [], []>} : vector<32x128xbf16>, vector<128x128xbf16>, vector<32x128xf32> -> vector<32x128xf32>
    %c0_3 = arith.constant 0 : index
    %c0_4 = arith.constant 0 : index
    %3 = vector.load %arg5[%c0_3, %c0_4] : memref<1x128xf32, #tpu.memory_space<vmem>>, vector<1x128xf32>
    %4 = vector.broadcast %3 : vector<1x128xf32> to vector<32x128xf32>
    %5 = arith.addf %2, %4 : vector<32x128xf32>
    %6 = arith.truncf %5 : vector<32x128xf32> to vector<32x128xbf16>
    %c0_5 = arith.constant 0 : index
    %c0_6 = arith.constant 0 : index
    %7 = vector.load %arg6[%c0_5, %c0_6] : memref<32x128xbf16, #tpu.memory_space<vmem>>, vector<32x128xbf16>
    tpu.vector_store %arg6[%c0_5, %c0_6], %6 {strides = array<i32>} : memref<32x128xbf16, #tpu.memory_space<vmem>>, vector<32x128xbf16>,
    return
  }
  func.func @transform_0(%arg0: i32, %arg1: i32, %arg2: i32) -> (i32, i32) {
    %c0_i32 = arith.constant 0 : i32
    return %arg0, %arg2 : i32, i32
  }
  func.func @transform_1(%arg0: i32, %arg1: i32, %arg2: i32) -> (i32, i32) {
    %c0_i32 = arith.constant 0 : i32
    return %arg2, %arg1 : i32, i32
  }
  func.func @transform_2(%arg0: i32, %arg1: i32, %arg2: i32) -> (i32, i32) {
    %c0_i32 = arith.constant 0 : i32
    %c0_i32_0 = arith.constant 0 : i32
    return %c0_i32, %arg1 : i32, i32
  }
  func.func @transform_3(%arg0: i32, %arg1: i32, %arg2: i32) -> (i32, i32) {
    %c0_i32 = arith.constant 0 : i32
    return %arg0, %arg1 : i32, i32
  }
}

module attributes {stable_mosaic.version = 11 : i64} {
  func.func @_matmul_kernel(%arg0: i32, %arg1: i32, %arg2: i32, %arg3: memref<32x128xbf16, #tpu.memory_space<vmem>>, %arg4: memref<128x192xbf16, #tpu.memory_space<vmem>>, %arg5: memref<1x192xf32, #tpu.memory_space<vmem>>, %arg6: memref<32x192xf32, #tpu.memory_space<vmem>>) attributes {dimension_semantics = [#tpu.dimension_semantics<parallel>, #tpu.dimension_semantics<parallel>, #tpu.dimension_semantics<arbitrary>], iteration_bounds = array<i64: 1, 1, 1>, scalar_prefetch = 0 : i64, scratch_operands = 0 : i64, tpu.core_type = #tpu.core_type<tc>, window_params = [{transform_indices = @transform_0, window_bounds = array<i64: 32, 128>}, {transform_indices = @transform_1, window_bounds = array<i64: 128, 192>}, {transform_indices = @transform_2, window_bounds = array<i64: 1, 192>}, {transform_indices = @transform_3, window_bounds = array<i64: 32, 192>}]} {
    %c0 = arith.constant 0 : index
    %c0_0 = arith.constant 0 : index
    %0 = vector.load %arg3[%c0, %c0_0] : memref<32x128xbf16, #tpu.memory_space<vmem>>, vector<32x128xbf16>
    %c0_1 = arith.constant 0 : index
    %c0_2 = arith.constant 0 : index
    %1 = vector.load %arg4[%c0_1, %c0_2] : memref<128x192xbf16, #tpu.memory_space<vmem>>, vector<128x192xbf16>
    %cst = arith.constant dense<0.000000e+00> : vector<32x192xf32>
    %2 = tpu.matmul %0, %1, %cst {dimension_numbers = #tpu.dot_dimension_numbers<[1], [0], [0], [1], [0, 0, 1, 1], [], []>} : vector<32x128xbf16>, vector<128x192xbf16>, vector<32x192xf32> -> vector<32x192xf32>
    %c0_3 = arith.constant 0 : index
    %c0_4 = arith.constant 0 : index
    %3 = vector.load %arg5[%c0_3, %c0_4] : memref<1x192xf32, #tpu.memory_space<vmem>>, vector<1x192xf32>
    %4 = vector.broadcast %3 : vector<1x192xf32> to vector<32x192xf32>
    %5 = arith.addf %2, %4 : vector<32x192xf32>
    %6 = math.tanh %5 : vector<32x192xf32>
    %c0_5 = arith.constant 0 : index
    %c0_6 = arith.constant 0 : index
    %7 = vector.load %arg6[%c0_5, %c0_6] : memref<32x192xf32, #tpu.memory_space<vmem>>, vector<32x192xf32>
    tpu.vector_store %arg6[%c0_5, %c0_6], %6 {strides = array<i32>} : memref<32x192xf32, #tpu.memory_space<vmem>>, vector<32x192xf32>,
    return
  }
  func.func @transform_0(%arg0: i32, %arg1: i32, %arg2: i32) -> (i32, i32) {
    %c0_i32 = arith.constant 0 : i32
    return %arg0, %arg2 : i32, i32
  }
  func.func @transform_1(%arg0: i32, %arg1: i32, %arg2: i32) -> (i32, i32) {
    %c0_i32 = arith.constant 0 : i32
    return %arg2, %arg1 : i32, i32
  }
  func.func @transform_2(%arg0: i32, %arg1: i32, %arg2: i32) -> (i32, i32) {
    %c0_i32 = arith.constant 0 : i32
    %c0_i32_0 = arith.constant 0 : i32
    return %c0_i32, %arg1 : i32, i32
  }
  func.func @transform_3(%arg0: i32, %arg1: i32, %arg2: i32) -> (i32, i32) {
    %c0_i32 = arith.constant 0 : i32
    return %arg0, %arg1 : i32, i32
  }
}

</mosaic_0001>

<bundles_post_ra>
// kernel: pre_vit_cross_attn_forward.19
= control target key start
LH: loop header
LB: loop body
LE: loop exit
PB: predicated region body
PF: predicated region fallthrough
CT: control target
= control target key end

     0   :  { %v301_v0 = vmov 0   ;;  %vm140_vm0 = vcmask 523264   ;;  %s403_s1 = inlined_call_operand.vmem [shape: bf16[192,128], index: 1, kind: input, shape index: {}]   ;;  %s404_s0 = inlined_call_operand.vmem [shape: bf16[32,192], index: 0, kind: input, shape index: {}]   ;;  %s405_s2 = inlined_call_operand.vmem [shape: f32[1,128], index: 2, kind: input, shape index: {}]   ;;  %s406_s3 = inlined_call_operand.vmem [shape: bf16[32,128], index: 3, kind: output, shape index: {}]  }
   0x1   :  { %147 = vmatprep.subr.bf16.mxu0 %v301_v0  ;;  %258 = vmatprep.subr.bf16.mxu1 %v301_v0  ;;  %v283_v1 = vld [vmem:[%s403_s1] sm:$0xff]   ;;  %v284_v2 = vld [vmem:[%s403_s1 + $0x8] sm:$0xff]   ;;  %v285_v3 = vld [vmem:[%s403_s1 + $0x10] sm:$0xff]  }
   0x2   :  { %148 = vmatpush1.bf16.msra.mxu0 %v283_v1  ;;  %270 = vmatpush1.bf16.msra.mxu1 %v283_v1  ;;  %v286_v4 = vld [vmem:[%s403_s1 + $0x18] sm:$0xff]   ;;  %v297_v5 = vld [vmem:[%s404_s0 + $0x4] ss:$8 sps:$4 sm:$0xff]   ;;  %v289_v9 = vld [vmem:[%s403_s1 + $0x30] sm:$0xff]  }
   0x3   :  { %149 = vmatprep.subr.bf16.mxu0 %v301_v0  ;;  %259 = vmatprep.subr.bf16.mxu1 %v301_v0  ;;  %v287_v6 = vld [vmem:[%s403_s1 + $0x20] sm:$0xff]   ;;  %v300_v7 = vld [vmem:[%s404_s0 + $0x14] ss:$8 sps:$4 sm:$0xff]   ;;  %v288_v8 = vld [vmem:[%s403_s1 + $0x28] sm:$0xff]  }
   0x4   :  { %237 = vmatprep.mubr.msk.bf16.mxu0 %vm140_vm0, %v297_v5  ;;  %238 = vmatprep.mubr.msk.bf16.mxu1 %vm140_vm0, %v300_v7  ;;  %v290_v10 = vld [vmem:[%s403_s1 + $0x38] sm:$0xff]   ;;  %v291_v11 = vld [vmem:[%s403_s1 + $0x40] sm:$0xff]   ;;  %v292_v12 = vld [vmem:[%s403_s1 + $0x48] sm:$0xff]  }
   0x5   :  { %v293_v13 = vld [vmem:[%s403_s1 + $0x50] sm:$0xff]   ;;  %v294_v14 = vld [vmem:[%s403_s1 + $0x58] sm:$0xff]   ;;  %v295_v15 = vld [vmem:[%s404_s0] ss:$8 sps:$4 sm:$0xff]  }
   0x6   :  { %150 = vmatpush1.bf16.msra.mxu0 %v284_v2  ;;  %271 = vmatpush1.bf16.msra.mxu1 %v284_v2  ;;  %v298_v16 = vld [vmem:[%s404_s0 + $0x10] ss:$8 sps:$4 sm:$0xff]   ;;  %v220_v17 = vld [vmem:[%s405_s2] ss:$0 sm:$0xff] }
   0x7   :  { %151 = vmatprep.subr.bf16.mxu0 %v301_v0  ;;  %260 = vmatprep.subr.bf16.mxu1 %v301_v0 }
   0xa   :  { %152 = vmatpush1.bf16.msra.mxu0 %v285_v3  ;;  %272 = vmatpush1.bf16.msra.mxu1 %v285_v3 }
   0xb   :  { %153 = vmatprep.subr.bf16.mxu0 %v301_v0  ;;  %261 = vmatprep.subr.bf16.mxu1 %v301_v0 }
   0xe   :  { %154 = vmatpush1.bf16.msra.mxu0 %v286_v4  ;;  %273 = vmatpush1.bf16.msra.mxu1 %v286_v4 }
   0xf   :  { %155 = vmatprep.subr.bf16.mxu0 %v301_v0  ;;  %262 = vmatprep.subr.bf16.mxu1 %v301_v0 }
  0x12   :  { %156 = vmatpush1.bf16.msra.mxu0 %v287_v6  ;;  %274 = vmatpush1.bf16.msra.mxu1 %v287_v6 }
  0x13   :  { %157 = vmatprep.subr.bf16.mxu0 %v301_v0  ;;  %263 = vmatprep.subr.bf16.mxu1 %v301_v0 }
  0x16   :  { %158 = vmatpush1.bf16.msra.mxu0 %v288_v8  ;;  %275 = vmatpush1.bf16.msra.mxu1 %v288_v8 }
  0x17   :  { %159 = vmatprep.subr.bf16.mxu0 %v301_v0  ;;  %264 = vmatprep.subr.bf16.mxu1 %v301_v0 }
  0x1a   :  { %160 = vmatpush1.bf16.msra.mxu0 %v289_v9  ;;  %276 = vmatpush1.bf16.msra.mxu1 %v289_v9 }
  0x1b   :  { %161 = vmatprep.subr.bf16.mxu0 %v301_v0  ;;  %265 = vmatprep.subr.bf16.mxu1 %v301_v0 }
  0x1e   :  { %162 = vmatpush1.bf16.msra.mxu0 %v290_v10  ;;  %277 = vmatpush1.bf16.msra.mxu1 %v290_v10 }
  0x1f   :  { %163 = vmatprep.subr.bf16.mxu0 %v301_v0  ;;  %266 = vmatprep.subr.bf16.mxu1 %v301_v0 }
  0x22   :  { %164 = vmatpush1.bf16.msra.mxu0 %v291_v11  ;;  %278 = vmatpush1.bf16.msra.mxu1 %v291_v11 }
  0x23   :  { %165 = vmatprep.subr.bf16.mxu0 %v301_v0  ;;  %267 = vmatprep.subr.bf16.mxu1 %v301_v0 }
  0x26   :  { %166 = vmatpush1.bf16.msra.mxu0 %v292_v12  ;;  %279 = vmatpush1.bf16.msra.mxu1 %v292_v12 }
  0x27   :  { %167 = vmatprep.subr.bf16.mxu0 %v301_v0  ;;  %268 = vmatprep.subr.bf16.mxu1 %v301_v0 }
  0x2a   :  { %168 = vmatpush1.bf16.msra.mxu0 %v293_v13  ;;  %280 = vmatpush1.bf16.msra.mxu1 %v293_v13 }
  0x2b   :  { %169 = vmatprep.subr.bf16.mxu0 %v301_v0  ;;  %269 = vmatprep.subr.bf16.mxu1 %v301_v0 }
  0x2e   :  { %170 = vmatpush1.bf16.msra.mxu0 %v294_v14  ;;  %281 = vmatpush1.bf16.msra.mxu1 %v294_v14 }
  0x31   :  { %180 = vmatmul.mubr.bf16.vlgmr.msra.gmra.mrb[0].mxu0 %v295_v15  ;;  %188 = vmatmul.mubr.bf16.vlgmr.msra.gmra.mrb[0].mxu1 %v298_v16 }
 0x104   :  { %v181_v18 = vpop.f32.mrb[0].mxu0  ;;  %v189_v19 = vpop.f32.mrb[0].mxu1 }
 0x105   :  { %v183_v20 = vpop.f32.mrb[1].mxu0  ;;  %v191_v21 = vpop.f32.mrb[1].mxu1  ;;  %v182_v24 = vadd.f32 %v220_v17, %v181_v18  ;;  %v190_v25 = vadd.f32 %v220_v17, %v189_v19 }
 0x106   :  { %v184_v22 = vpop.f32.mrb[2].mxu0  ;;  %v192_v23 = vpop.f32.mrb[2].mxu1 }
 0x107   :  { %v185_v26 = vadd.f32 %v220_v17, %v184_v22  ;;  %v193_v27 = vadd.f32 %v220_v17, %v192_v23  ;;  %v186_v28 = vpop.f32.mrb[3].mxu0  ;;  %v194_v29 = vpop.f32.mrb[3].mxu1 }
 0x109   :  { %v250_v30 = vpack.c.bf16 %v185_v26, %v182_v24  ;;  %v255_v31 = vpack.c.bf16 %v193_v27, %v190_v25 }
 0x10b   :  { %251 = vst [vmem:[%s406_s3] sm:$0xff] %v250_v30   ;;  %257 = vst [vmem:[%s406_s3 + $0x8] sm:$0xff] %v255_v31  }

// kernel: pre_vit_cross_attn_forward.20
= control target key start
LH: loop header
LB: loop body
LE: loop exit
PB: predicated region body
PF: predicated region fallthrough
CT: control target
= control target key end

     0   :  { %s1106_s18 = smov 0   ;;  %s1108_s19 = smov 0   ;;  %s1279_s0 = inlined_call_operand.vmem [shape: bf16[34,128], index: 0, kind: input, shape index: {}]   ;;  %s1280_s1 = inlined_call_operand.vmem [shape: bf16[128,384], index: 1, kind: input, shape index: {}]   ;;  %s1281_s2 = inlined_call_operand.vmem [shape: f32[1,384], index: 2, kind: input, shape index: {}]   ;;  %s1282_s3 = inlined_call_operand.vmem [shape: f32[1,128], index: 3, kind: input, shape index: {}]   ;;  %s1283_s4 = inlined_call_operand.vmem [shape: f32[1,128], index: 4, kind: input, shape index: {}]   ;;  %s1284_s5 = inlined_call_operand.vmem [shape: bf16[34,384], index: 5, kind: output, shape index: {}]  }
   0x1   :  { %s1110_s20 = smov 0   ;;  %s1112_s21 = smov 0  }
   0x2   :  { %s1114_s22 = smov 0  }
   0x3 LB: > { %s30_s23 = sadd.s32 1, %s1068_s21  ;;  %s863_s24 = sadd.s32 4294967295, %s1072_s22   ;;  %s1072_s22 = sphi %s1114_s22, %s15_s22   ;;  %s1068_s21 = sphi %s1112_s21, %s1289_s21   ;;  %s1064_s20 = sphi %s1110_s20, %s1288_s20   ;;  %s1060_s19 = sphi %s1108_s19, %s1287_s19   ;;  %s1056_s18 = sphi %s1106_s18, %s1286_s18  }
   0x4   : > { %p32_p0 = scmp.ge.s32.totalorder %s30_s23, 3  ;;  %p78_p1 = scmp.ne.s32.totalorder %s1060_s19, %s1056_s18 }
   0x5   : > { %p79_p2 = scmp.eq.s32.totalorder %s1072_s22, 0  ;;  %p188_p4 = scmp.eq.s32.totalorder %s863_s24, 2 }
   0x6   : > { %s1291_s23 = smov (%p32_p0, %s30_s23), 0  ;;  %s71_s26 = sadd.s32 1, %s1060_s19 }
   0x7   : > { %p80_p3 = por %p79_p2, %p78_p1  ;;  %s67_s25 = ssub.s32 %s1068_s21, %s1291_s23 }
   0x8   : > { %p69_p5 = scmp.eq.s32.totalorder %s67_s25, 0  ;;  %p1141_p6 = por %p188_p4, %p78_p1 }
   0x9   : > { %p869_p7 = scmp.ge.s32.totalorder %s1072_s22, 3 }
   0xa   : > { %s1146_s28 = scalar_select %p69_p5, %s1060_s19, %s71_s26  }
   0xb   : > { %234 = sbr.rel (%p869_p7) target bundleno = 32 (0x20), region = 28 }
  0x12   : > { %237 = sbr.rel (!%p80_p3) target bundleno = 32 (0x20), region = 32  ;;  %s239_s29 = sand.u32 (%p80_p3), 1, %s1060_s19  }
  0x13   : > { %s871_s30 = sshll.u32 (%p80_p3), %s1068_s21, 2  ;;  %s870_s6 = sshll.u32 (%p80_p3), %s239_s29, 6 }
  0x14   : > { %s1154_s9 = scalar_lea.vmem (%p80_p3), %s1280_s1, %s871_s30  ;;  %s241_s10 = scalar_lea.vmem (%p80_p3), [#allocation2], %s870_s6 }
  0x15   : > { %v262_v0 = vld [vmem:[%s1154_s9] sm:$0xf] (%p80_p3)  ;;  %v264_v1 = vld [vmem:[%s1154_s9 + $0xc] sm:$0xf] (%p80_p3)  ;;  %v266_v2 = vld [vmem:[%s1154_s9 + $0x18] sm:$0xf] (%p80_p3) }
  0x16   : > { %263 = vst [vmem:[%s241_s10] sm:$0xf] (%p80_p3), %v262_v0  ;;  %265 = vst [vmem:[%s241_s10 + $0x4] sm:$0xf] (%p80_p3), %v264_v1  ;;  %v268_v3 = vld [vmem:[%s1154_s9 + $0x24] sm:$0xf] (%p80_p3) }
  0x17   : > { %v270_v4 = vld [vmem:[%s1154_s9 + $0x30] sm:$0xf] (%p80_p3)  ;;  %267 = vst [vmem:[%s241_s10 + $0x8] sm:$0xf] (%p80_p3), %v266_v2  ;;  %269 = vst [vmem:[%s241_s10 + $0xc] sm:$0xf] (%p80_p3), %v268_v3 }
  0x18   : > { %271 = vst [vmem:[%s241_s10 + $0x10] sm:$0xf] (%p80_p3), %v270_v4  ;;  %v272_v5 = vld [vmem:[%s1154_s9 + $0x3c] sm:$0xf] (%p80_p3)  ;;  %v274_v6 = vld [vmem:[%s1154_s9 + $0x48] sm:$0xf] (%p80_p3) }
  0x19   : > { %v276_v7 = vld [vmem:[%s1154_s9 + $0x54] sm:$0xf]  ;;  %273 = vst [vmem:[%s241_s10 + $0x14] sm:$0xf] %v272_v5  ;;  %275 = vst [vmem:[%s241_s10 + $0x18] sm:$0xf] %v274_v6 }
  0x1a   : > { %277 = vst [vmem:[%s241_s10 + $0x1c] sm:$0xf] %v276_v7  ;;  %v278_v8 = vld [vmem:[%s1154_s9 + $0x60] sm:$0xf]  ;;  %v280_v9 = vld [vmem:[%s1154_s9 + $0x6c] sm:$0xf] }
  0x1b   : > { %v282_v10 = vld [vmem:[%s1154_s9 + $0x78] sm:$0xf]  ;;  %279 = vst [vmem:[%s241_s10 + $0x20] sm:$0xf] %v278_v8  ;;  %281 = vst [vmem:[%s241_s10 + $0x24] sm:$0xf] %v280_v9 }
  0x1c   : > { %283 = vst [vmem:[%s241_s10 + $0x28] sm:$0xf] %v282_v10  ;;  %v284_v11 = vld [vmem:[%s1154_s9 + $0x84] sm:$0xf]  ;;  %v286_v12 = vld [vmem:[%s1154_s9 + $0x90] sm:$0xf] }
  0x1d   : > { %v288_v13 = vld [vmem:[%s1154_s9 + $0x9c] sm:$0xf]  ;;  %285 = vst [vmem:[%s241_s10 + $0x2c] sm:$0xf] %v284_v11  ;;  %287 = vst [vmem:[%s241_s10 + $0x30] sm:$0xf] %v286_v12 }
  0x1e   : > { %289 = vst [vmem:[%s241_s10 + $0x34] sm:$0xf] %v288_v13  ;;  %v290_v14 = vld [vmem:[%s1154_s9 + $0xa8] sm:$0xf]  ;;  %v292_v15 = vld [vmem:[%s1154_s9 + $0xb4] sm:$0xf] }
  0x1f   : > { %291 = vst [vmem:[%s241_s10 + $0x38] sm:$0xf] %v290_v14  ;;  %293 = vst [vmem:[%s241_s10 + $0x3c] sm:$0xf] %v292_v15 }
  0x20 PF: > { %p872_p8 = scmp.ge.s32.totalorder %s1072_s22, 1  ;;  %p353_p9 = scmp.lt.s32.totalorder %s1072_s22, 4 }
  0x22   : > { %p354_p10 = pnand %p872_p8, %p353_p9 }
  0x23   : > { %v916_v16 = vld [vmem:[%s1279_s0 + $0x8] sm:$0xff] (!%p354_p10)   ;;  %v899_v17 = vld [vmem:[%s1279_s0] sm:$0xff] (!%p354_p10)   ;;  %v428_v20 = vld [vmem:[%s1279_s0 + $0x10] sm:$0x1] (!%p354_p10)  ;;  %vm442_vm0 = vcmask (!%p354_p10), 1041408   ;;  %s360_s17 = sand.u32 (!%p354_p10), 1, %s1056_s18  }
  0x24   : > { %357 = sbr.rel (%p354_p10) target bundleno = 588 (0x24c), region = 77  ;;  %v904_v18 = vunpack.c.l.bf16 (!%p354_p10), %v916_v16  ;;  %v900_v19 = vunpack.c.l.bf16 (!%p354_p10), %v899_v17  ;;  %v905_v21 = vunpack.c.h.bf16 (!%p354_p10), %v916_v16  ;;  %v901_v22 = vunpack.c.h.bf16 (!%p354_p10), %v899_v17  ;;  %s873_s24 = sshll.u32 (!%p354_p10), %s360_s17, 6  ;;  %v874_v8 = vld [vmem:[%s1282_s3] ss:$0 sm:$0xff] (!%p354_p10) }
  0x25   : > { %v433_v23 = vunpack.c.l.bf16 (!%p354_p10), %v428_v20  ;;  %v1074_v25 = vmov (!%p354_p10), 0.0   ;;  %s1189_s25 = scalar_lea.vmem (!%p354_p10), [#allocation2], %s873_s24  ;;  %vm1075_vm1 = vmmov (!%p354_p10), 0   ;;  %v875_v13 = vld [vmem:[%s1283_s4] ss:$0 sm:$0xff] (!%p354_p10)  ;;  %p413_p11 = scmp.lt.s32.totalorder (!%p354_p10), %s1064_s20, 2 }
  0x26   : > { %438 = vadd.xlane.f32.xlu0 (!%p354_p10), %v904_v18  ;;  %434 = vadd.xlane.f32.xlu1 (!%p354_p10), %v900_v19  ;;  %v1016_v26 = vld [vmem:[%s1189_s25] sm:$0xff] (!%p354_p10)   ;;  %v1017_v48 = vld [vmem:[%s1189_s25 + $0x8] sm:$0xff] (!%p354_p10)   ;;  %v1018_v49 = vld [vmem:[%s1189_s25 + $0x10] sm:$0xff] (!%p354_p10)   ;;  %s973_s11 = smul.u32 (!%p354_p10), 20, %s360_s17 }
  0x27   : > { %v443_v24 = vsel (!%p354_p10), %vm442_vm0, %v433_v23, 0.0  ;;  %957 = vmatprep.subr.bf16.mxu1 (!%p354_p10), %v1074_v25  ;;  %929 = vmatprep.subr.bf16.mxu0 (!%p354_p10), %v1074_v25  ;;  %v1019_v50 = vld [vmem:[%s1189_s25 + $0x18] sm:$0xff] (!%p354_p10)   ;;  %v1020_v51 = vld [vmem:[%s1189_s25 + $0x20] sm:$0xff] (!%p354_p10)   ;;  %v1021_v52 = vld [vmem:[%s1189_s25 + $0x28] sm:$0xff] (!%p354_p10)  }
  0x28   : > { %965 = vmatpush3.bf16.msra.mxu1 (!%p354_p10), %v1016_v26  ;;  %930 = vmatpush3.bf16.msra.mxu0 (!%p354_p10), %v1016_v26  ;;  %v1022_v53 = vld [vmem:[%s1189_s25 + $0x30] sm:$0xff] (!%p354_p10)   ;;  %v1023_v54 = vld [vmem:[%s1189_s25 + $0x38] sm:$0xff] (!%p354_p10)   ;;  %s402_s12 = scalar_lea.vmem (!%p354_p10), [#allocation3], %s973_s11 }
  0x29   : > { %958 = vmatprep.subr.bf16.mxu1 (!%p354_p10), %v1074_v25  ;;  %931 = vmatprep.subr.bf16.mxu0 (!%p354_p10), %v1074_v25 }
  0x2a   : > { %440 = vadd.xlane.f32.xlu0 (!%p354_p10), %v905_v21  ;;  %436 = vadd.xlane.f32.xlu1 (!%p354_p10), %v901_v22 }
  0x2b   : > { %949 = vmatprep.mubr.msk.bf16.mxu1 %vm1075_vm1, %v1074_v25  ;;  %945 = vmatprep.mubr.msk.bf16.mxu0 %vm1075_vm1, %v1074_v25  ;;  %s414_s7 = scalar_select %p413_p11, %s1064_s20, 2 }
  0x2c   : > { %966 = vmatpush3.bf16.msra.mxu1 %v1017_v48  ;;  %932 = vmatpush3.bf16.msra.mxu0 %v1017_v48  ;;  %s890_s18 = sshll.u32 (%p1141_p6), %s1064_s20, 2 }
  0x2d   : > { %959 = vmatprep.subr.bf16.mxu1 %v1074_v25  ;;  %933 = vmatprep.subr.bf16.mxu0 %v1074_v25  ;;  %s415_s10 = scalar_lea.vmem %s1281_s2, %s414_s7  ;;  %s684_s15 = scalar_lea.vmem (%p1141_p6), %s1284_s5, %s890_s18 }
  0x2e   : > { %444 = vadd.xlane.f32.xlu0 %v443_v24 }
  0x30   : > { %967 = vmatpush3.bf16.msra.mxu1 %v1018_v49  ;;  %934 = vmatpush3.bf16.msra.mxu0 %v1018_v49 }
  0x31   : > { %960 = vmatprep.subr.bf16.mxu1 %v1074_v25  ;;  %935 = vmatprep.subr.bf16.mxu0 %v1074_v25 }
  0x34   : > { %968 = vmatpush3.bf16.msra.mxu1 %v1019_v50  ;;  %936 = vmatpush3.bf16.msra.mxu0 %v1019_v50 }
  0x35   : > { %961 = vmatprep.subr.bf16.mxu1 %v1074_v25  ;;  %937 = vmatprep.subr.bf16.mxu0 %v1074_v25 }
  0x38   : > { %969 = vmatpush3.bf16.msra.mxu1 %v1020_v51  ;;  %938 = vmatpush3.bf16.msra.mxu0 %v1020_v51 }
  0x39   : > { %962 = vmatprep.subr.bf16.mxu1 %v1074_v25  ;;  %939 = vmatprep.subr.bf16.mxu0 %v1074_v25 }
  0x3c   : > { %970 = vmatpush3.bf16.msra.mxu1 %v1021_v52  ;;  %940 = vmatpush3.bf16.msra.mxu0 %v1021_v52 }
  0x3d   : > { %963 = vmatprep.subr.bf16.mxu1 %v1074_v25  ;;  %941 = vmatprep.subr.bf16.mxu0 %v1074_v25 }
  0x40   : > { %971 = vmatpush3.bf16.msra.mxu1 %v1022_v53  ;;  %942 = vmatpush3.bf16.msra.mxu0 %v1022_v53 }
  0x41   : > { %964 = vmatprep.subr.bf16.mxu1 %v1074_v25  ;;  %943 = vmatprep.subr.bf16.mxu0 %v1074_v25 }
  0x44   : > { %972 = vmatpush3.bf16.msra.mxu1 %v1023_v54  ;;  %944 = vmatpush3.bf16.msra.mxu0 %v1023_v54 }
  0xb3   : > { %v439_v27 = vpop.xlane.xlu0 %438  ;;  %v435_v28 = vpop.xlane.xlu1 %434 }
  0xb4   : > { %v449_v29 = vmul.f32 0.0078125, %v439_v27  ;;  %v447_v30 = vmul.f32 0.0078125, %v435_v28 }
  0xb6   : > { %v1194_v31 = vsub.f32 %v904_v18, %v449_v29  ;;  %v1196_v32 = vsub.f32 %v900_v19, %v447_v30 }
  0xb7   : > { %v441_v33 = vpop.xlane.xlu0 %440  ;;  %v437_v34 = vpop.xlane.xlu1 %436 }
  0xb8   : > { %v450_v35 = vmul.f32 0.0078125, %v441_v33  ;;  %v459_v36 = vmul.f32 %v1194_v31, %v1194_v31  ;;  %v448_v37 = vmul.f32 0.0078125, %v437_v34  ;;  %v457_v40 = vmul.f32 %v1196_v32, %v1196_v32 }
  0xba   : > { %v1200_v38 = vsub.f32 %v905_v21, %v450_v35  ;;  %466 = vadd.xlane.f32.xlu1 %v459_v36  ;;  %v1202_v39 = vsub.f32 %v901_v22, %v448_v37 }
  0xbb   : > { %v445_v41 = vpop.xlane.xlu0 %444 }
  0xbc   : > { %v451_v42 = vmul.f32 0.0078125, %v445_v41  ;;  %v460_v43 = vmul.f32 %v1200_v38, %v1200_v38  ;;  %v458_v45 = vmul.f32 %v1202_v39, %v1202_v39 }
  0xbe   : > { %v1208_v44 = vsub.f32 %v433_v23, %v451_v42  ;;  %468 = vadd.xlane.f32.xlu0 %v460_v43  ;;  %462 = vadd.xlane.f32.xlu1 %v457_v40 }
  0xc0   : > { %v461_v46 = vmul.f32 %v1208_v44, %v1208_v44 }
  0xc2   : > { %464 = vadd.xlane.f32.xlu0 %v458_v45  ;;  %v470_v47 = vsel %vm442_vm0, %v461_v46, 0.0 }
  0xc3   : > { %471 = vadd.xlane.f32.xlu1 %v470_v47 }
 0x147   : > { %v467_v55 = vpop.xlane.xlu1 %466 }
 0x148   : > { %v475_v56 = vmul.f32 0.0078125, %v467_v55 }
 0x14a   : > { %v480_v57 = vadd.f32 1e-06, %v475_v56 }
 0x14b   : > { %v469_v58 = vpop.xlane.xlu0 %468  ;;  %v463_v59 = vpop.xlane.xlu1 %462 }
 0x14c   : > { %1024 = vrsqrt.f32 %v480_v57  ;;  %v476_v60 = vmul.f32 0.0078125, %v469_v58  ;;  %v473_v61 = vmul.f32 0.0078125, %v463_v59 }
 0x14e   : > { %v481_v62 = vadd.f32 1e-06, %v476_v60  ;;  %v478_v63 = vadd.f32 1e-06, %v473_v61 }
 0x14f   : > { %v465_v0 = vpop.xlane.xlu0 %464 }
 0x150   : > { %1026 = vrsqrt.f32 %v481_v62  ;;  %v474_v1 = vmul.f32 0.0078125, %v465_v0  ;;  %v472_v2 = vpop.xlane.xlu1 %471 }
 0x151   : > { %1028 = vrsqrt.f32 %v478_v63  ;;  %v477_v3 = vmul.f32 0.0078125, %v472_v2 }
 0x152   : > { %v479_v4 = vadd.f32 1e-06, %v474_v1 }
 0x153   : > { %v482_v5 = vadd.f32 1e-06, %v477_v3 }
 0x154   : > { %1030 = vrsqrt.f32 %v479_v4 }
 0x155   : > { %1032 = vrsqrt.f32 %v482_v5 }
 0x156   : > { %v1025_v6 = vpop.eup %1024 }
 0x157   : > { %v490_v7 = vmul.f32 %v1025_v6, %v1194_v31 }
 0x159   : > { %v502_v12 = vmul.f32 %v874_v8, %v490_v7 }
 0x15a   : > { %v1027_v9 = vpop.eup %1026 }
 0x15b   : > { %v1029_v10 = vpop.eup %1028  ;;  %v491_v11 = vmul.f32 %v1027_v9, %v1200_v38  ;;  %v514_v18 = vadd.f32 %v875_v13, %v502_v12 }
 0x15c   : > { %v488_v14 = vmul.f32 %v1029_v10, %v1196_v32  ;;  %v876_v32 = vld [vmem:[%s415_s10] ss:$0 sm:$0xff] }
 0x15d   : > { %v503_v15 = vmul.f32 %v874_v8, %v491_v11 }
 0x15e   : > { %v1031_v16 = vpop.eup %1030  ;;  %v500_v21 = vmul.f32 %v874_v8, %v488_v14 }
 0x15f   : > { %v1033_v17 = vpop.eup %1032  ;;  %v515_v19 = vadd.f32 %v875_v13, %v503_v15  ;;  %v489_v20 = vmul.f32 %v1031_v16, %v1202_v39 }
 0x160   : > { %v492_v22 = vmul.f32 %v1033_v17, %v1208_v44  ;;  %v512_v27 = vadd.f32 %v875_v13, %v500_v21 }
 0x161   : > { %v518_v23 = vpack.c.bf16 %v515_v19, %v514_v18  ;;  %v501_v24 = vmul.f32 %v874_v8, %v489_v20 }
 0x162   : > { %v504_v26 = vmul.f32 %v874_v8, %v492_v22 }
 0x163   : > { %950 = vmatmul.mubr.bf16.vlgmr.msra.gmra.mrb[0].mxu1 %v518_v23  ;;  %v513_v28 = vadd.f32 %v875_v13, %v501_v24 }
 0x164   : > { %953 = vmatprep.mubr.msk.bf16.mxu1 %vm1075_vm1, %v1074_v25  ;;  %v516_v30 = vadd.f32 %v875_v13, %v504_v26 }
 0x165   : > { %v517_v29 = vpack.c.bf16 %v513_v28, %v512_v27 }
 0x166   : > { %v519_v31 = vpack.c.bf16 %v516_v30, %v516_v30 }
 0x167   : > { %946 = vmatmul.mubr.bf16.vlgmr.msra.gmra.mrb[0].mxu0 %v517_v29 }
 0x16b   : > { %954 = vmatmul.mubr.bf16.gmra.mrb[4].mxu1 %v519_v31 }
 0x236   : > { %v633_v33 = vpop.f32.mrb[0].mxu1 }
 0x237   : > { %v951_v34 = vpop.f32.mrb[1].mxu1  ;;  %v634_v36 = vadd.f32 %v876_v32, %v633_v33 }
 0x238   : > { %v636_v35 = vpop.f32.mrb[2].mxu1 }
 0x239   : > { %v637_v37 = vadd.f32 %v876_v32, %v636_v35  ;;  %v952_v25 = vpop.f32.mrb[3].mxu1 }
 0x23a   : > { %v625_v38 = vpop.f32.mrb[0].mxu0 }
 0x23b   : > { %v914_v39 = vpack.c.bf16 %v637_v37, %v634_v36  ;;  %v947_v40 = vpop.f32.mrb[1].mxu0  ;;  %v626_v42 = vadd.f32 %v876_v32, %v625_v38 }
 0x23c   : > { %v628_v41 = vpop.f32.mrb[2].mxu0 }
 0x23d   : > { %917 = vst [vmem:[%s402_s12 + $0x8] sm:$0xff] %v914_v39   ;;  %v629_v43 = vadd.f32 %v876_v32, %v628_v41  ;;  %v948_v44 = vpop.f32.mrb[3].mxu0  ;;  %679 = sbr.rel (!%p1141_p6) target bundleno = 588 (0x24c), region = 85 }
 0x23e   : > { %v641_v45 = vpop.f32.mrb[4].mxu1 }
 0x23f   : > { %v909_v46 = vpack.c.bf16 %v629_v43, %v626_v42  ;;  %v642_v47 = vadd.f32 %v876_v32, %v641_v45  ;;  %v955_v48 = vpop.f32.mrb[5].mxu1 }
 0x240   : > { %v644_v49 = vpop.f32.mrb[6].mxu1 }
 0x241   : > { %910 = vst [vmem:[%s402_s12] sm:$0xff] %v909_v46   ;;  %v897_v50 = vpack.c.bf16 %v642_v47, %v642_v47  ;;  %v956_v51 = vpop.f32.mrb[7].mxu1 }
 0x243   : > { %672 = vst [vmem:[%s402_s12 + $0x10] sm:$0x1] %v897_v50 }
 0x244   : > { %v704_v54 = vld [vmem:[%s402_s12 + $0x8] sm:$0xf]  ;;  %v706_v55 = vld [vmem:[%s402_s12 + $0xc] sm:$0xf] }
 0x245   : > { %705 = vst [vmem:[%s684_s15 + $0x18] sm:$0xf] %v704_v54  ;;  %707 = vst [vmem:[%s684_s15 + $0x24] sm:$0xf] %v706_v55 }
 0x248   : > { %v700_v52 = vld [vmem:[%s402_s12] sm:$0xf]  ;;  %v702_v53 = vld [vmem:[%s402_s12 + $0x4] sm:$0xf] }
 0x249   : > { %701 = vst [vmem:[%s684_s15] sm:$0xf] %v700_v52  ;;  %703 = vst [vmem:[%s684_s15 + $0xc] sm:$0xf] %v702_v53 }
 0x24a   : > { %v708_v56 = vld [vmem:[%s402_s12 + $0x10] sm:$0xf] }
 0x24b   : > { %709 = vst [vmem:[%s684_s15 + $0x30] sm:$0xf] %v708_v56 }
 0x24c PF: > { %s15_s22 = sadd.s32 1, %s1072_s22   ;;  %s1286_s18 = smov %s1060_s19 }
 0x24d   : > { %p12_p12 = scmp.ge.s32.totalorder %s15_s22, 5   ;;  %s1287_s19 = smov %s1146_s28 }
 0x24e   : > { %s1288_s20 = smov %s1068_s21  ;;  %s1289_s21 = smov %s1291_s23 }
 0x24f   :  { %14 = sbr.rel (!%p12_p12) target bundleno = 3 (0x3), region = 169 }

// kernel: pre_vit_cross_attn_forward.22
= control target key start
LH: loop header
LB: loop body
LE: loop exit
PB: predicated region body
PF: predicated region fallthrough
CT: control target
= control target key end

     0   :  { %v321_v0 = vmov 0.0   ;;  %vm322_vm0 = vmmov 0   ;;  %s405_s1 = inlined_call_operand.vmem [shape: bf16[128,128], index: 1, kind: input, shape index: {}]   ;;  %s406_s0 = inlined_call_operand.vmem [shape: bf16[34,128], index: 0, kind: input, shape index: {}]   ;;  %s407_s3 = inlined_call_operand.vmem [shape: bf16[34,128], index: 3, kind: input, shape index: {}]   ;;  %s408_s2 = inlined_call_operand.vmem [shape: f32[1,128], index: 2, kind: input, shape index: {}]   ;;  %s409_s4 = inlined_call_operand.vmem [shape: bf16[34,128], index: 4, kind: output, shape index: {}]  }
   0x1   :  { %292 = vmatprep.subr.bf16.mxu1 %v321_v0  ;;  %v310_v1 = vld [vmem:[%s405_s1] sm:$0xff]   ;;  %264 = vmatprep.subr.bf16.mxu0 %v321_v0  ;;  %v311_v2 = vld [vmem:[%s405_s1 + $0x8] sm:$0xff]   ;;  %v312_v3 = vld [vmem:[%s405_s1 + $0x10] sm:$0xff]  }
   0x2   :  { %284 = vmatprep.mubr.msk.bf16.mxu1 %vm322_vm0, %v321_v0  ;;  %280 = vmatprep.mubr.msk.bf16.mxu0 %vm322_vm0, %v321_v0  ;;  %v313_v4 = vld [vmem:[%s405_s1 + $0x18] sm:$0xff]   ;;  %v314_v5 = vld [vmem:[%s405_s1 + $0x20] sm:$0xff]   ;;  %v315_v6 = vld [vmem:[%s405_s1 + $0x28] sm:$0xff]  }
   0x3   :  { %300 = vmatpush3.bf16.msra.mxu1 %v310_v1  ;;  %265 = vmatpush3.bf16.msra.mxu0 %v310_v1  ;;  %v316_v7 = vld [vmem:[%s405_s1 + $0x30] sm:$0xff]   ;;  %v317_v8 = vld [vmem:[%s405_s1 + $0x38] sm:$0xff]   ;;  %v318_v9 = vld [vmem:[%s406_s0 + $0x8] sm:$0xff]  }
   0x4   :  { %293 = vmatprep.subr.bf16.mxu1 %v321_v0  ;;  %266 = vmatprep.subr.bf16.mxu0 %v321_v0  ;;  %v319_v10 = vld [vmem:[%s406_s0] sm:$0xff]   ;;  %v320_v11 = vld [vmem:[%s406_s0 + $0x10] ss:$0 sps:$4 sm:$0x11]   ;;  %v251_v13 = vld [vmem:[%s407_s3 + $0x8] sm:$0xff]  }
   0x5   :  { %v234_v12 = vld [vmem:[%s407_s3] sm:$0xff]   ;;  %v239_v17 = vunpack.c.l.bf16 %v251_v13  ;;  %v240_v21 = vunpack.c.h.bf16 %v251_v13  ;;  %v170_v32 = vld [vmem:[%s407_s3 + $0x10] sm:$0x1] }
   0x6   :  { %v211_v14 = vld [vmem:[%s408_s2] ss:$0 sm:$0xff]  ;;  %v235_v15 = vunpack.c.l.bf16 %v234_v12  ;;  %v236_v24 = vunpack.c.h.bf16 %v234_v12  ;;  %v175_v38 = vunpack.c.l.bf16 %v170_v32 }
   0x7   :  { %301 = vmatpush3.bf16.msra.mxu1 %v311_v2  ;;  %267 = vmatpush3.bf16.msra.mxu0 %v311_v2 }
   0x8   :  { %294 = vmatprep.subr.bf16.mxu1 %v321_v0  ;;  %268 = vmatprep.subr.bf16.mxu0 %v321_v0 }
   0xb   :  { %302 = vmatpush3.bf16.msra.mxu1 %v312_v3  ;;  %269 = vmatpush3.bf16.msra.mxu0 %v312_v3 }
   0xc   :  { %295 = vmatprep.subr.bf16.mxu1 %v321_v0  ;;  %270 = vmatprep.subr.bf16.mxu0 %v321_v0 }
   0xf   :  { %303 = vmatpush3.bf16.msra.mxu1 %v313_v4  ;;  %271 = vmatpush3.bf16.msra.mxu0 %v313_v4 }
  0x10   :  { %296 = vmatprep.subr.bf16.mxu1 %v321_v0  ;;  %272 = vmatprep.subr.bf16.mxu0 %v321_v0 }
  0x13   :  { %304 = vmatpush3.bf16.msra.mxu1 %v314_v5  ;;  %273 = vmatpush3.bf16.msra.mxu0 %v314_v5 }
  0x14   :  { %297 = vmatprep.subr.bf16.mxu1 %v321_v0  ;;  %274 = vmatprep.subr.bf16.mxu0 %v321_v0 }
  0x17   :  { %305 = vmatpush3.bf16.msra.mxu1 %v315_v6  ;;  %275 = vmatpush3.bf16.msra.mxu0 %v315_v6 }
  0x18   :  { %298 = vmatprep.subr.bf16.mxu1 %v321_v0  ;;  %276 = vmatprep.subr.bf16.mxu0 %v321_v0 }
  0x1b   :  { %306 = vmatpush3.bf16.msra.mxu1 %v316_v7  ;;  %277 = vmatpush3.bf16.msra.mxu0 %v316_v7 }
  0x1c   :  { %299 = vmatprep.subr.bf16.mxu1 %v321_v0  ;;  %278 = vmatprep.subr.bf16.mxu0 %v321_v0 }
  0x1f   :  { %307 = vmatpush3.bf16.msra.mxu1 %v317_v8  ;;  %279 = vmatpush3.bf16.msra.mxu0 %v317_v8 }
  0x22   :  { %285 = vmatmul.mubr.bf16.vlgmr.msra.gmra.mrb[0].mxu1 %v318_v9  ;;  %281 = vmatmul.mubr.bf16.vlgmr.msra.gmra.mrb[0].mxu0 %v319_v10 }
  0x23   :  { %288 = vmatprep.mubr.msk.bf16.mxu1 %vm322_vm0, %v321_v0 }
  0x2a   :  { %289 = vmatmul.mubr.bf16.gmra.mrb[4].mxu1 %v320_v11 }
  0xf5   :  { %v152_v16 = vpop.f32.mrb[0].mxu1  ;;  %v144_v18 = vpop.f32.mrb[0].mxu0 }
  0xf6   :  { %v153_v19 = vadd.f32 %v211_v14, %v152_v16  ;;  %v286_v20 = vpop.f32.mrb[1].mxu1  ;;  %v145_v22 = vadd.f32 %v211_v14, %v144_v18  ;;  %v282_v23 = vpop.f32.mrb[1].mxu0 }
  0xf7   :  { %v155_v25 = vpop.f32.mrb[2].mxu1  ;;  %v147_v26 = vpop.f32.mrb[2].mxu0 }
  0xf8   :  { %v156_v27 = vadd.f32 %v211_v14, %v155_v25  ;;  %v176_v28 = vadd.f32 %v235_v15, %v145_v22  ;;  %v287_v29 = vpop.f32.mrb[3].mxu1  ;;  %v148_v30 = vadd.f32 %v211_v14, %v147_v26  ;;  %v283_v31 = vpop.f32.mrb[3].mxu0  ;;  %v178_v33 = vadd.f32 %v239_v17, %v153_v19 }
  0xfa   :  { %v179_v34 = vadd.f32 %v240_v21, %v156_v27  ;;  %v177_v35 = vadd.f32 %v236_v24, %v148_v30 }
  0xfc   :  { %v249_v36 = vpack.c.bf16 %v179_v34, %v178_v33  ;;  %v244_v37 = vpack.c.bf16 %v177_v35, %v176_v28 }
  0xfd   :  { %v160_v39 = vpop.f32.mrb[4].mxu1 }
  0xfe   :  { %252 = vst [vmem:[%s409_s4 + $0x8] sm:$0xff] %v249_v36   ;;  %245 = vst [vmem:[%s409_s4] sm:$0xff] %v244_v37   ;;  %v161_v40 = vadd.f32 %v211_v14, %v160_v39  ;;  %v290_v41 = vpop.f32.mrb[5].mxu1 }
  0xff   :  { %v163_v42 = vpop.f32.mrb[6].mxu1 }
 0x100   :  { %v180_v43 = vadd.f32 %v175_v38, %v161_v40  ;;  %v291_v44 = vpop.f32.mrb[7].mxu1 }
 0x102   :  { %v232_v45 = vpack.c.bf16 %v180_v43, %v180_v43 }
 0x104   :  { %206 = vst [vmem:[%s409_s4 + $0x10] sm:$0x1] %v232_v45 }

// kernel: pre_vit_cross_attn_forward.21
= control target key start
LH: loop header
LB: loop body
LE: loop exit
PB: predicated region body
PF: predicated region fallthrough
CT: control target
= control target key end

     0   :  { %s1308_s12 = smov 0   ;;  %s1488_s0 = inlined_call_operand.vmem [shape: bf16[2,17,128], index: 0, kind: input, shape index: {}]   ;;  %s1489_s1 = inlined_call_operand.vmem [shape: bf16[2,17,128], index: 1, kind: input, shape index: {}]   ;;  %s1490_s2 = inlined_call_operand.vmem [shape: bf16[2,17,128], index: 2, kind: input, shape index: {}]   ;;  %s1491_s3 = inlined_call_operand.vmem [shape: bf16[2,17,128], index: 3, kind: output, shape index: {}]  }
   0x1 LB: > { %s1046_s13 = sadd.s32 4294967295, %s1282_s12   ;;  %p1050_p0 = scmp.ge.s32.totalorder %s1282_s12, 1  ;;  %s1282_s12 = sphi %s1308_s12, %s13_s12  }
   0x2   : > { %p157_p1 = scmp.lt.s32.totalorder %s1282_s12, 3 }
   0x4   : > { %p158_p2 = pnand %p1050_p0, %p157_p1 }
   0x5   : > { %p191_p3 = scmp.lt.s32.totalorder (!%p158_p2), %s1046_s13, 1  ;;  %vm237_vm0 = vcmask (!%p158_p2), 261120   ;;  %vm305_vm1 = vcmask (!%p158_p2), 131072   ;;  %vm298_vm2 = vcmask (!%p158_p2), 138240   ;;  %vm350_vm3 = vcmask (!%p158_p2), 1040384   ;;  %s1284_s24 = smov (!%p158_p2), 96  }
   0x6   : > { %161 = sbr.rel (%p158_p2) target bundleno = 2558 (0x9fe), region = 32  ;;  %v1285_v30 = vmov (!%p158_p2), 0   ;;  %s1286_s25 = smov (!%p158_p2), 64   ;;  %vm938_vm4 = vcmask (!%p158_p2), 523264   ;;  %vm962_vm5 = vsmask.f32 (!%p158_p2), 256 }
   0x7   : > { %v1364_v31 = vsel (!%p158_p2), %vm350_vm3, 65535, %v1285_v30  ;;  %s1287_s26 = smov (!%p158_p2), 32   ;;  %vm942_vm6 = vcmask (!%p158_p2), 785408   ;;  %vm963_vm7 = vmand (!%p158_p2), %vm350_vm3, %vm962_vm5 }
   0xd   : > { %s1493_s13 = smov (!%p191_p3, %s1046_s13), 1 }
   0xe   : > { %s1316_s14 = smul.u32 12, %s1493_s13 }
  0x10   : > { %s200_s17 = scalar_lea.vmem %s1489_s1, %s1316_s14  ;;  %s195_s20 = scalar_lea.vmem %s1488_s0, %s1316_s14 }
  0x11   : > { %v1326_v0 = vld [vmem:[%s200_s17] sm:$0xff]   ;;  %v1328_v1 = vld [vmem:[%s200_s17 + $0x8] ss:$0 sps:$4 sm:$0x11]   ;;  %s205_s23 = scalar_lea.vmem %s1490_s2, %s1316_s14  ;;  %s210_s29 = scalar_lea.vmem %s1491_s3, %s1316_s14 }
  0x12   : > { %v1330_v2 = vld [vmem:[%s195_s20] sm:$0xff]   ;;  %1186 = vmatprep.subr.msk.bf16.mxu0 %vm237_vm0, %v1326_v0  ;;  %v245_v3 = vsel %vm237_vm0, %v1326_v0, 0  ;;  %v248_v4 = vsel %vm237_vm0, %v1328_v1, 0  ;;  %v1342_v5 = vld [vmem:[%s195_s20 + $0x8] ss:$0 sps:$4 sm:$0x11]  }
  0x13   : > { %1123 = vmatpush3.bf16.xpose.msra.mxu0 %v245_v3  ;;  %1126 = vmatprep.mubr.msk.bf16.mxu0 %vm237_vm0, %v1330_v2  ;;  %v1356_v28 = vld [vmem:[%s205_s23] sm:$0xff]   ;;  %v1358_v29 = vld [vmem:[%s205_s23 + $0x8] ss:$0 sps:$4 sm:$0x11]  }
  0x14   : > { %1187 = vmatprep.subr.msk.bf16.mxu0 %vm237_vm0, %v1328_v1  ;;  %1130 = vmatprep.subr.bf16.mxu1 %v1356_v28  ;;  %v354_v32 = vand.u32 %v1358_v29, %v1364_v31 }
  0x15   : > { %1131 = vmatpush3.bf16.msra.mxu1 %v1356_v28 }
  0x16   : > { %1132 = vmatprep.subr.bf16.mxu1 %v354_v32 }
  0x19   : > { %1133 = vmatpush3.bf16.msra.mxu1 %v354_v32 }
  0x1b   : > { %1125 = vmatpush3.bf16.xpose.msra.mxu0 %v248_v4 }
  0x22   : > { %1127 = vmatmul.mubr.msk.bf16.vlgmr.msra.gmra.mrb[0].mxu0 %vm237_vm0, %v1342_v5 }
  0xf5   : > { %v1128_v6 = vpop.f32.mrb[0].mxu0 }
  0xf6   : > { %v284_v7 = vpop.f32.mrb[1].mxu0  ;;  %v306_v8 = vsel %vm305_vm1, %v1128_v6, -inf }
  0xf7   : > { %307 = vmax.xlane.f32.xlu1 %v306_v8  ;;  %v1129_v9 = vpop.f32.mrb[2].mxu0  ;;  %v299_v10 = vsel %vm298_vm2, %v284_v7, -inf }
  0xf8   : > { %300 = vmax.xlane.f32.xlu0 %v299_v10  ;;  %v287_v11 = vpop.f32.mrb[3].mxu0 }
  0xf9   : > { %v302_v12 = vsel %vm298_vm2, %v287_v11, -inf }
  0xfc   : > { %303 = vmax.xlane.f32.xlu0 %v302_v12 }
 0x184   : > { %v308_v13 = vpop.xlane.xlu1 %307 }
 0x185   : > { %v311_v14 = vsub.f32 %v1128_v6, %v308_v13  ;;  %v301_v15 = vpop.xlane.xlu0 %300 }
 0x186   : > { %v309_v16 = vsub.f32 %v284_v7, %v301_v15 }
 0x187   : > { %v316_v17 = vmul.f32 1.442695, %v311_v14 }
 0x188   : > { %v312_v18 = vmul.f32 1.442695, %v309_v16 }
 0x189   : > { %v304_v19 = vpop.xlane.xlu0 %303 }
 0x18a   : > { %1228 = vpow2.f32 %v312_v18  ;;  %v310_v20 = vsub.f32 %v287_v11, %v304_v19 }
 0x18b   : > { %1230 = vpow2.f32 %v316_v17 }
 0x18c   : > { %v314_v21 = vmul.f32 1.442695, %v310_v20 }
 0x18e   : > { %1232 = vpow2.f32 %v314_v21 }
 0x194   : > { %v1229_v22 = vpop.eup %1228 }
 0x195   : > { %v318_v23 = vsel %vm298_vm2, %v1229_v22, 0.0  ;;  %v1231_v24 = vpop.eup %1230 }
 0x196   : > { %319 = vadd.xlane.f32.xlu1 %v318_v23  ;;  %v324_v26 = vsel %vm305_vm1, %v1231_v24, 0.0 }
 0x198   : > { %v1233_v25 = vpop.eup %1232 }
 0x199   : > { %v321_v27 = vsel %vm298_vm2, %v1233_v25, 0.0 }
 0x19a   : > { %325 = vadd.xlane.f32.xlu1 %v324_v26  ;;  %322 = vadd.xlane.f32.xlu0 %v321_v27 }
 0x1ab   : > { %410 = vrot.lane.b32.xlu1 %v1328_v1, %s1284_s24 }
 0x1af   : > { %404 = vrot.lane.b32.xlu1 %v1330_v2, %s1284_s24 }
 0x1b0   : > { %408 = vrot.lane.b32.xlu0 %v1326_v0, %s1284_s24 }
 0x1b3   : > { %406 = vrot.lane.b32.xlu1 %v1342_v5, %s1284_s24 }
 0x223   : > { %v320_v33 = vpop.xlane.xlu1 %319 }
 0x224   : > { %1234 = vrcp.f32 %v320_v33 }
 0x227   : > { %v326_v34 = vpop.xlane.xlu1 %325  ;;  %v323_v35 = vpop.xlane.xlu0 %322 }
 0x228   : > { %1236 = vrcp.f32 %v326_v34 }
 0x229   : > { %1238 = vrcp.f32 %v323_v35 }
 0x22b   : > { %v409_v36 = vpop.permute.xlu0 %408  ;;  %v411_v38 = vpop.permute.xlu1 %410 }
 0x22c   : > { %1188 = vmatprep.subr.msk.bf16.mxu1 %vm237_vm0, %v409_v36  ;;  %v419_v46 = vsel %vm237_vm0, %v409_v36, 0  ;;  %v422_v48 = vsel %vm237_vm0, %v411_v38, 0 }
 0x22e   : > { %v1235_v37 = vpop.eup %1234 }
 0x22f   : > { %v330_v42 = vmul.f32 %v1235_v37, %v1229_v22  ;;  %v405_v47 = vpop.permute.xlu1 %404 }
 0x232   : > { %v1237_v39 = vpop.eup %1236 }
 0x233   : > { %v1239_v40 = vpop.eup %1238  ;;  %v332_v41 = vmul.f32 %v1237_v39, %v1231_v24  ;;  %v407_v49 = vpop.permute.xlu1 %406 }
 0x234   : > { %v331_v43 = vmul.f32 %v1239_v40, %v1233_v25 }
 0x235   : > { %v334_v44 = vpack.c.bf16 %v332_v41, %v332_v41 }
 0x236   : > { %v333_v45 = vpack.c.bf16 %v331_v43, %v330_v42 }
 0x238   : > { %1134 = vmatprep.mubr.msk.bf16.mxu1 %vm298_vm2, %v333_v45 }
 0x239   : > { %1135 = vmatmul.mubr.msk.bf16.vlgmr.msra.gmra.mrb[0].mxu1 %vm298_vm2, %v334_v44 }
 0x23a   : > { %1139 = vmatpush3.bf16.xpose.msra.mxu1 %v419_v46  ;;  %1142 = vmatprep.mubr.msk.bf16.mxu1 %vm237_vm0, %v405_v47 }
 0x23b   : > { %1189 = vmatprep.subr.msk.bf16.mxu1 %vm237_vm0, %v411_v38 }
 0x242   : > { %1141 = vmatpush3.bf16.xpose.msra.mxu1 %v422_v48 }
 0x249   : > { %1143 = vmatmul.mubr.msk.bf16.vlgmr.msra.gmra.mrb[4].mxu1 %vm237_vm0, %v407_v49 }
 0x30c   : > { %v1383_v50 = vpop.f32.mrb[0].mxu1 }
 0x30d   : > { %v1385_v51 = vpop.f32.mrb[1].mxu1 }
 0x30e   : > { %v1137_v52 = vpop.f32.mrb[2].mxu1 }
 0x30f   : > { %v1387_v53 = vpop.f32.mrb[3].mxu1 }
 0x31c   : > { %v1144_v54 = vpop.f32.mrb[4].mxu1 }
 0x31d   : > { %v458_v55 = vpop.f32.mrb[5].mxu1  ;;  %v478_v60 = vsel %vm305_vm1, %v1144_v54, -inf }
 0x31e   : > { %v1145_v56 = vpop.f32.mrb[6].mxu1  ;;  %v472_v57 = vsel %vm298_vm2, %v458_v55, -inf }
 0x31f   : > { %473 = vmax.xlane.f32.xlu0 %v472_v57  ;;  %v461_v58 = vpop.f32.mrb[7].mxu1 }
 0x320   : > { %v475_v59 = vsel %vm298_vm2, %v461_v58, -inf }
 0x321   : > { %476 = vmax.xlane.f32.xlu1 %v475_v59 }
 0x323   : > { %479 = vmax.xlane.f32.xlu0 %v478_v60 }
 0x3ac   : > { %v474_v61 = vpop.xlane.xlu0 %473 }
 0x3ad   : > { %v481_v62 = vsub.f32 %v458_v55, %v474_v61 }
 0x3ae   : > { %v477_v63 = vpop.xlane.xlu1 %476 }
 0x3af   : > { %v484_v3 = vmul.f32 1.442695, %v481_v62  ;;  %v482_v4 = vsub.f32 %v461_v58, %v477_v63 }
 0x3b0   : > { %v480_v6 = vpop.xlane.xlu0 %479 }
 0x3b1   : > { %1240 = vpow2.f32 %v484_v3  ;;  %v486_v7 = vmul.f32 1.442695, %v482_v4  ;;  %v483_v8 = vsub.f32 %v1144_v54, %v480_v6 }
 0x3b3   : > { %1242 = vpow2.f32 %v486_v7  ;;  %v488_v9 = vmul.f32 1.442695, %v483_v8 }
 0x3b5   : > { %1244 = vpow2.f32 %v488_v9 }
 0x3bb   : > { %v1241_v10 = vpop.eup %1240 }
 0x3bc   : > { %v490_v11 = vsel %vm298_vm2, %v1241_v10, 0.0 }
 0x3bd   : > { %v1243_v12 = vpop.eup %1242  ;;  %491 = vadd.xlane.f32.xlu0 %v490_v11 }
 0x3be   : > { %v493_v15 = vsel %vm298_vm2, %v1243_v12, 0.0 }
 0x3bf   : > { %v1245_v13 = vpop.eup %1244 }
 0x3c0   : > { %v496_v14 = vsel %vm305_vm1, %v1245_v13, 0.0 }
 0x3c1   : > { %497 = vadd.xlane.f32.xlu1 %v496_v14  ;;  %494 = vadd.xlane.f32.xlu0 %v493_v15 }
 0x3d2   : > { %509 = vrot.lane.b32.xlu1 %v1358_v29, %s1284_s24 }
 0x3d6   : > { %573 = vrot.lane.b32.xlu1 %v1326_v0, %s1286_s25 }
 0x3d7   : > { %507 = vrot.lane.b32.xlu0 %v1356_v28, %s1284_s24 }
 0x3da   : > { %575 = vrot.lane.b32.xlu1 %v1328_v1, %s1286_s25 }
 0x3db   : > { %569 = vrot.lane.b32.xlu0 %v1330_v2, %s1286_s25 }
 0x3de   : > { %571 = vrot.lane.b32.xlu1 %v1342_v5, %s1286_s25 }
 0x44a   : > { %v492_v16 = vpop.xlane.xlu0 %491 }
 0x44b   : > { %1246 = vrcp.f32 %v492_v16 }
 0x44e   : > { %v495_v17 = vpop.xlane.xlu0 %494  ;;  %v498_v18 = vpop.xlane.xlu1 %497 }
 0x44f   : > { %1248 = vrcp.f32 %v495_v17 }
 0x450   : > { %1250 = vrcp.f32 %v498_v18 }
 0x452   : > { %v508_v19 = vpop.permute.xlu0 %507  ;;  %v510_v20 = vpop.permute.xlu1 %509 }
 0x453   : > { %1146 = vmatprep.subr.bf16.mxu0 %v508_v19  ;;  %v519_v21 = vand.u32 %v510_v20, %v1364_v31 }
 0x454   : > { %1147 = vmatpush3.bf16.msra.mxu0 %v508_v19 }
 0x455   : > { %1148 = vmatprep.subr.bf16.mxu0 %v519_v21  ;;  %v1247_v23 = vpop.eup %1246 }
 0x456   : > { %v574_v22 = vpop.permute.xlu1 %573  ;;  %v502_v26 = vmul.f32 %v1247_v23, %v1241_v10  ;;  %v570_v34 = vpop.permute.xlu0 %569 }
 0x457   : > { %v584_v35 = vsel %vm237_vm0, %v574_v22, 0 }
 0x458   : > { %1149 = vmatpush3.bf16.msra.mxu0 %v519_v21 }
 0x459   : > { %v1249_v24 = vpop.eup %1248  ;;  %1190 = vmatprep.subr.msk.bf16.mxu0 %vm237_vm0, %v574_v22 }
 0x45a   : > { %v1251_v25 = vpop.eup %1250  ;;  %v503_v27 = vmul.f32 %v1249_v24, %v1243_v12  ;;  %v576_v36 = vpop.permute.xlu1 %575 }
 0x45b   : > { %v504_v30 = vmul.f32 %v1251_v25, %v1245_v13  ;;  %v587_v37 = vsel %vm237_vm0, %v576_v36, 0 }
 0x45c   : > { %v505_v32 = vpack.c.bf16 %v503_v27, %v502_v26 }
 0x45d   : > { %v506_v33 = vpack.c.bf16 %v504_v30, %v504_v30 }
 0x45e   : > { %1150 = vmatprep.mubr.msk.bf16.mxu0 %vm298_vm2, %v505_v32  ;;  %v572_v38 = vpop.permute.xlu1 %571 }
 0x45f   : > { %1151 = vmatmul.mubr.msk.bf16.vlgmr.msra.gmra.mrb[4].mxu0 %vm298_vm2, %v506_v33 }
 0x460   : > { %1158 = vmatprep.mubr.msk.bf16.mxu0 %vm237_vm0, %v570_v34 }
 0x461   : > { %1155 = vmatpush3.bf16.xpose.msra.mxu0 %v584_v35 }
 0x462   : > { %1191 = vmatprep.subr.msk.bf16.mxu0 %vm237_vm0, %v576_v36 }
 0x469   : > { %1157 = vmatpush3.bf16.xpose.msra.mxu0 %v587_v37 }
 0x470   : > { %1159 = vmatmul.mubr.msk.bf16.vlgmr.msra.gmra.mrb[8].mxu0 %vm237_vm0, %v572_v38 }
 0x532   : > { %v1416_v39 = vpop.f32.mrb[4].mxu0 }
 0x533   : > { %v1418_v40 = vpop.f32.mrb[5].mxu0 }
 0x534   : > { %v1207_v41 = vpack.i.bf16 %v1418_v40, %v1416_v39  ;;  %v1153_v42 = vpop.f32.mrb[6].mxu0 }
 0x535   : > { %v1422_v43 = vpop.f32.mrb[7].mxu0 }
 0x543   : > { %v1160_v44 = vpop.f32.mrb[8].mxu0 }
 0x544   : > { %v623_v45 = vpop.f32.mrb[9].mxu0  ;;  %v643_v52 = vsel %vm305_vm1, %v1160_v44, -inf }
 0x545   : > { %v1161_v46 = vpop.f32.mrb[10].mxu0  ;;  %v637_v47 = vsel %vm298_vm2, %v623_v45, -inf }
 0x546   : > { %638 = vmax.xlane.f32.xlu0 %v637_v47  ;;  %v626_v48 = vpop.f32.mrb[11].mxu0 }
 0x547   : > { %v640_v49 = vsel %vm298_vm2, %v626_v48, -inf }
 0x548   : > { %641 = vmax.xlane.f32.xlu1 %v640_v49 }
 0x54a   : > { %644 = vmax.xlane.f32.xlu0 %v643_v52 }
 0x5d3   : > { %v639_v54 = vpop.xlane.xlu0 %638 }
 0x5d4   : > { %v646_v55 = vsub.f32 %v623_v45, %v639_v54 }
 0x5d5   : > { %v642_v56 = vpop.xlane.xlu1 %641 }
 0x5d6   : > { %v649_v57 = vmul.f32 1.442695, %v646_v55  ;;  %v647_v58 = vsub.f32 %v626_v48, %v642_v56 }
 0x5d7   : > { %v645_v59 = vpop.xlane.xlu0 %644 }
 0x5d8   : > { %1252 = vpow2.f32 %v649_v57  ;;  %v651_v60 = vmul.f32 1.442695, %v647_v58  ;;  %v648_v61 = vsub.f32 %v1160_v44, %v645_v59 }
 0x5da   : > { %1254 = vpow2.f32 %v651_v60  ;;  %v653_v62 = vmul.f32 1.442695, %v648_v61 }
 0x5dc   : > { %1256 = vpow2.f32 %v653_v62 }
 0x5e2   : > { %v1253_v63 = vpop.eup %1252 }
 0x5e3   : > { %v655_v3 = vsel %vm298_vm2, %v1253_v63, 0.0 }
 0x5e4   : > { %v1255_v4 = vpop.eup %1254  ;;  %656 = vadd.xlane.f32.xlu0 %v655_v3 }
 0x5e5   : > { %v658_v8 = vsel %vm298_vm2, %v1255_v4, 0.0 }
 0x5e6   : > { %v1257_v6 = vpop.eup %1256 }
 0x5e7   : > { %v661_v7 = vsel %vm305_vm1, %v1257_v6, 0.0 }
 0x5e8   : > { %662 = vadd.xlane.f32.xlu1 %v661_v7  ;;  %659 = vadd.xlane.f32.xlu0 %v658_v8 }
 0x5f9   : > { %674 = vrot.lane.b32.xlu1 %v1358_v29, %s1286_s25 }
 0x5fd   : > { %738 = vrot.lane.b32.xlu1 %v1326_v0, %s1287_s26 }
 0x5fe   : > { %672 = vrot.lane.b32.xlu0 %v1356_v28, %s1286_s25 }
 0x601   : > { %740 = vrot.lane.b32.xlu1 %v1328_v1, %s1287_s26 }
 0x602   : > { %734 = vrot.lane.b32.xlu0 %v1330_v2, %s1287_s26 }
 0x605   : > { %736 = vrot.lane.b32.xlu1 %v1342_v5, %s1287_s26 }
 0x671   : > { %v657_v9 = vpop.xlane.xlu0 %656 }
 0x672   : > { %1258 = vrcp.f32 %v657_v9 }
 0x675   : > { %v660_v10 = vpop.xlane.xlu0 %659  ;;  %v663_v11 = vpop.xlane.xlu1 %662 }
 0x676   : > { %1260 = vrcp.f32 %v660_v10 }
 0x677   : > { %1262 = vrcp.f32 %v663_v11 }
 0x679   : > { %v673_v12 = vpop.permute.xlu0 %672  ;;  %v675_v0 = vpop.permute.xlu1 %674 }
 0x67a   : > { %1162 = vmatprep.subr.bf16.mxu1 %v673_v12  ;;  %v684_v13 = vand.u32 %v675_v0, %v1364_v31 }
 0x67b   : > { %1163 = vmatpush3.bf16.msra.mxu1 %v673_v12 }
 0x67c   : > { %1164 = vmatprep.subr.bf16.mxu1 %v684_v13  ;;  %v1259_v14 = vpop.eup %1258 }
 0x67d   : > { %v739_v1 = vpop.permute.xlu1 %738  ;;  %v667_v15 = vmul.f32 %v1259_v14, %v1253_v63  ;;  %v735_v20 = vpop.permute.xlu0 %734 }
 0x67e   : > { %v749_v21 = vsel %vm237_vm0, %v739_v1, 0 }
 0x67f   : > { %1165 = vmatpush3.bf16.msra.mxu1 %v684_v13 }
 0x680   : > { %v1261_v2 = vpop.eup %1260  ;;  %1192 = vmatprep.subr.msk.bf16.mxu1 %vm237_vm0, %v739_v1 }
 0x681   : > { %v1263_v5 = vpop.eup %1262  ;;  %v668_v16 = vmul.f32 %v1261_v2, %v1255_v4  ;;  %v741_v22 = vpop.permute.xlu1 %740 }
 0x682   : > { %v669_v17 = vmul.f32 %v1263_v5, %v1257_v6  ;;  %v752_v23 = vsel %vm237_vm0, %v741_v22, 0 }
 0x683   : > { %v670_v18 = vpack.c.bf16 %v668_v16, %v667_v15 }
 0x684   : > { %v671_v19 = vpack.c.bf16 %v669_v17, %v669_v17 }
 0x685   : > { %1166 = vmatprep.mubr.msk.bf16.mxu1 %vm298_vm2, %v670_v18  ;;  %v737_v24 = vpop.permute.xlu1 %736 }
 0x686   : > { %1167 = vmatmul.mubr.msk.bf16.vlgmr.msra.gmra.mrb[8].mxu1 %vm298_vm2, %v671_v19 }
 0x687   : > { %1174 = vmatprep.mubr.msk.bf16.mxu1 %vm237_vm0, %v735_v20 }
 0x688   : > { %1171 = vmatpush3.bf16.xpose.msra.mxu1 %v749_v21 }
 0x689   : > { %1193 = vmatprep.subr.msk.bf16.mxu1 %vm237_vm0, %v741_v22 }
 0x690   : > { %1173 = vmatpush3.bf16.xpose.msra.mxu1 %v752_v23 }
 0x697   : > { %1175 = vmatmul.mubr.msk.bf16.vlgmr.msra.gmra.mrb[12].mxu1 %vm237_vm0, %v737_v24 }
 0x759   : > { %v1168_v25 = vpop.f32.mrb[8].mxu1 }
 0x75a   : > { %v720_v26 = vpop.f32.mrb[9].mxu1 }
 0x75b   : > { %v1212_v27 = vpack.i.bf16 %v720_v26, %v1168_v25  ;;  %v1169_v30 = vpop.f32.mrb[10].mxu1 }
 0x75c   : > { %v723_v32 = vpop.f32.mrb[11].mxu1 }
 0x76a   : > { %v1176_v33 = vpop.f32.mrb[12].mxu1 }
 0x76b   : > { %v788_v34 = vpop.f32.mrb[13].mxu1  ;;  %v808_v42 = vsel %vm305_vm1, %v1176_v33, -inf }
 0x76c   : > { %v1177_v35 = vpop.f32.mrb[14].mxu1  ;;  %v802_v36 = vsel %vm298_vm2, %v788_v34, -inf }
 0x76d   : > { %803 = vmax.xlane.f32.xlu0 %v802_v36  ;;  %v791_v37 = vpop.f32.mrb[15].mxu1 }
 0x76e   : > { %v805_v38 = vsel %vm298_vm2, %v791_v37, -inf }
 0x76f   : > { %806 = vmax.xlane.f32.xlu1 %v805_v38 }
 0x771   : > { %809 = vmax.xlane.f32.xlu0 %v808_v42 }
 0x7fa   : > { %v804_v44 = vpop.xlane.xlu0 %803 }
 0x7fb   : > { %v811_v45 = vsub.f32 %v788_v34, %v804_v44 }
 0x7fc   : > { %v807_v46 = vpop.xlane.xlu1 %806 }
 0x7fd   : > { %v814_v47 = vmul.f32 1.442695, %v811_v45  ;;  %v812_v48 = vsub.f32 %v791_v37, %v807_v46 }
 0x7fe   : > { %v810_v49 = vpop.xlane.xlu0 %809 }
 0x7ff   : > { %1264 = vpow2.f32 %v814_v47  ;;  %v816_v52 = vmul.f32 1.442695, %v812_v48  ;;  %v813_v54 = vsub.f32 %v1176_v33, %v810_v49 }
 0x801   : > { %1266 = vpow2.f32 %v816_v52  ;;  %v818_v55 = vmul.f32 1.442695, %v813_v54 }
 0x803   : > { %1268 = vpow2.f32 %v818_v55 }
 0x809   : > { %v1265_v56 = vpop.eup %1264 }
 0x80a   : > { %v820_v57 = vsel %vm298_vm2, %v1265_v56, 0.0 }
 0x80b   : > { %v1267_v58 = vpop.eup %1266  ;;  %821 = vadd.xlane.f32.xlu0 %v820_v57 }
 0x80c   : > { %v823_v61 = vsel %vm298_vm2, %v1267_v58, 0.0 }
 0x80d   : > { %v1269_v59 = vpop.eup %1268 }
 0x80e   : > { %v826_v60 = vsel %vm305_vm1, %v1269_v59, 0.0 }
 0x80f   : > { %827 = vadd.xlane.f32.xlu1 %v826_v60  ;;  %824 = vadd.xlane.f32.xlu0 %v823_v61 }
 0x820   : > { %839 = vrot.lane.b32.xlu1 %v1358_v29, %s1287_s26 }
 0x824   : > { %1208 = vrot.lane.b32.xlu1 %v1207_v41, %s1287_s26 }
 0x825   : > { %837 = vrot.lane.b32.xlu0 %v1356_v28, %s1287_s26 }
 0x828   : > { %904 = vrot.lane.b32.xlu1 %v1422_v43, %s1287_s26 }
 0x829   : > { %1213 = vrot.lane.b32.xlu0 %v1212_v27, %s1286_s25 }
 0x82c   : > { %916 = vrot.lane.b32.xlu1 %v723_v32, %s1286_s25 }
 0x898   : > { %v822_v62 = vpop.xlane.xlu0 %821 }
 0x899   : > { %1270 = vrcp.f32 %v822_v62 }
 0x89c   : > { %v825_v63 = vpop.xlane.xlu0 %824  ;;  %v828_v3 = vpop.xlane.xlu1 %827 }
 0x89d   : > { %1272 = vrcp.f32 %v825_v63 }
 0x89e   : > { %1274 = vrcp.f32 %v828_v3 }
 0x8a0   : > { %v838_v29 = vpop.permute.xlu0 %837  ;;  %v840_v4 = vpop.permute.xlu1 %839 }
 0x8a1   : > { %v849_v39 = vand.u32 %v840_v4, %v1364_v31  ;;  %1178 = vmatprep.subr.bf16.mxu0 %v838_v29 }
 0x8a2   : > { %1179 = vmatpush3.bf16.msra.mxu0 %v838_v29 }
 0x8a3   : > { %1180 = vmatprep.subr.bf16.mxu0 %v849_v39  ;;  %v1271_v28 = vpop.eup %1270 }
 0x8a4   : > { %v832_v43 = vmul.f32 %v1271_v28, %v1265_v56  ;;  %v1209_v13 = vpop.permute.xlu1 %1208  ;;  %v1214_v14 = vpop.permute.xlu0 %1213 }
 0x8a5   : > { %v1211_v2 = vunpack.i.h.bf16 %v1209_v13  ;;  %v1210_v5 = vunpack.i.l.bf16 %v1209_v13  ;;  %v1216_v16 = vunpack.i.h.bf16 %v1214_v14  ;;  %v1215_v17 = vunpack.i.l.bf16 %v1214_v14 }
 0x8a6   : > { %1181 = vmatpush3.bf16.msra.mxu0 %v849_v39 }
 0x8a7   : > { %v1273_v40 = vpop.eup %1272  ;;  %v935_v18 = vsel %vm237_vm0, %v1385_v51, %v1211_v2  ;;  %v937_v19 = vsel %vm237_vm0, %v1383_v50, %v1210_v5  ;;  %v964_v50 = vld [vmem:[%s210_s29 + $0x8] sm:$0x1] }
 0x8a8   : > { %v1275_v41 = vpop.eup %1274  ;;  %v833_v6 = vmul.f32 %v1273_v40, %v1267_v58  ;;  %v905_v1 = vpop.permute.xlu1 %904  ;;  %v941_v26 = vsel %vm938_vm4, %v937_v19, %v1215_v17  ;;  %v939_v51 = vsel %vm938_vm4, %v935_v18, %v1216_v16 }
 0x8a9   : > { %v834_v7 = vmul.f32 %v1275_v41, %v1269_v59  ;;  %v936_v22 = vsel %vm237_vm0, %v1387_v53, %v905_v1 }
 0x8aa   : > { %v835_v8 = vpack.c.bf16 %v833_v6, %v832_v43 }
 0x8ab   : > { %v836_v9 = vpack.c.bf16 %v834_v7, %v834_v7 }
 0x8ac   : > { %1182 = vmatprep.mubr.msk.bf16.mxu0 %vm298_vm2, %v835_v8  ;;  %v917_v15 = vpop.permute.xlu1 %916 }
 0x8ad   : > { %1183 = vmatmul.mubr.msk.bf16.vlgmr.msra.gmra.mrb[12].mxu0 %vm298_vm2, %v836_v9  ;;  %v940_v25 = vsel %vm938_vm4, %v936_v22, %v917_v15 }
 0x980   : > { %v1184_v10 = vpop.f32.mrb[12].mxu0 }
 0x981   : > { %v885_v11 = vpop.f32.mrb[13].mxu0 }
 0x982   : > { %v1217_v12 = vpack.i.bf16 %v885_v11, %v1184_v10  ;;  %v1185_v31 = vpop.f32.mrb[14].mxu0 }
 0x983   : > { %v888_v0 = vpop.f32.mrb[15].mxu0 }
 0x984   : > { %1218 = vrot.lane.b32.xlu0 %v1217_v12, %s1284_s24  ;;  %928 = vrot.lane.b32.xlu1 %v888_v0, %s1284_s24 }
 0x9f6   : > { %v1219_v20 = vpop.permute.xlu0 %1218  ;;  %v929_v21 = vpop.permute.xlu1 %928 }
 0x9f7   : > { %v1221_v23 = vunpack.i.h.bf16 %v1219_v20  ;;  %v1220_v24 = vunpack.i.l.bf16 %v1219_v20  ;;  %v944_v30 = vsel %vm942_vm6, %v940_v25, %v929_v21 }
 0x9f9   : > { %v943_v27 = vsel %vm942_vm6, %v939_v51, %v1221_v23  ;;  %v945_v32 = vsel %vm942_vm6, %v941_v26, %v1220_v24 }
 0x9fa   : > { %v1084_v33 = vpack.c.bf16 %v945_v32, %v945_v32  ;;  %v1088_v34 = vpack.c.bf16 %v944_v30, %v943_v27 }
 0x9fc   : > { %1089 = vst [vmem:[%s210_s29] sm:$0xff] %v1088_v34   ;;  %v965_v35 = vsel %vm963_vm7, %v1084_v33, %v964_v50 }
 0x9fd   : > { %966 = vst [vmem:[%s210_s29 + $0x8] sm:$0x1] %v965_v35 }
 0x9fe PF: > { %s13_s12 = sadd.s32 1, %s1282_s12  }
 0x9ff   : > { %p10_p4 = scmp.ge.s32.totalorder %s13_s12, 4  }
 0xa01   :  { %12 = sbr.rel (!%p10_p4) target bundleno = 1 (0x1), region = 68 }

// kernel: pre_vit_cross_attn_forward.30
= control target key start
LH: loop header
LB: loop body
LE: loop exit
PB: predicated region body
PF: predicated region fallthrough
CT: control target
= control target key end

     0   :  { %s402_s0 = inlined_call_operand.vmem [shape: bf16[32,128], index: 0, kind: input, shape index: {}]   ;;  %s403_s1 = inlined_call_operand.vmem [shape: bf16[128,128], index: 1, kind: input, shape index: {}]   ;;  %s404_s3 = inlined_call_operand.vmem [shape: f32[1,128], index: 3, kind: input, shape index: {}]   ;;  %s405_s4 = inlined_call_operand.vmem [shape: f32[1,128], index: 4, kind: input, shape index: {}]   ;;  %s406_s2 = inlined_call_operand.vmem [shape: f32[1,128], index: 2, kind: input, shape index: {}]   ;;  %s407_s5 = inlined_call_operand.vmem [shape: bf16[32,128], index: 5, kind: output, shape index: {}]  }
   0x1   :  { %v262_v0 = vld [vmem:[%s402_s0] sm:$0xff]   ;;  %v279_v1 = vld [vmem:[%s402_s0 + $0x8] sm:$0xff]   ;;  %v313_v24 = vld [vmem:[%s403_s1 + $0x10] sm:$0xff]  }
   0x2   :  { %v263_v2 = vunpack.c.l.bf16 %v262_v0  ;;  %v267_v3 = vunpack.c.l.bf16 %v279_v1  ;;  %v264_v4 = vunpack.c.h.bf16 %v262_v0  ;;  %v268_v5 = vunpack.c.h.bf16 %v279_v1  ;;  %v311_v6 = vld [vmem:[%s403_s1] sm:$0xff]   ;;  %v312_v23 = vld [vmem:[%s403_s1 + $0x8] sm:$0xff]   ;;  %v314_v25 = vld [vmem:[%s403_s1 + $0x18] sm:$0xff]  }
   0x3   :  { %291 = vmatprep.subr.bf16.mxu0 %v311_v6  ;;  %v315_v26 = vld [vmem:[%s403_s1 + $0x20] sm:$0xff]   ;;  %v316_v27 = vld [vmem:[%s403_s1 + $0x28] sm:$0xff]   ;;  %v317_v28 = vld [vmem:[%s403_s1 + $0x30] sm:$0xff]  }
   0x4   :  { %29 = vadd.xlane.f32.xlu0 %v263_v2  ;;  %33 = vadd.xlane.f32.xlu1 %v267_v3  ;;  %v318_v29 = vld [vmem:[%s403_s1 + $0x38] sm:$0xff]   ;;  %v242_v44 = vld [vmem:[%s404_s3] ss:$0 sm:$0xff] }
   0x5   :  { %292 = vmatpush3.bf16.msra.mxu0 %v311_v6  ;;  %v243_v49 = vld [vmem:[%s405_s4] ss:$0 sm:$0xff] }
   0x6   :  { %293 = vmatprep.subr.bf16.mxu0 %v312_v23  ;;  %v244_v63 = vld [vmem:[%s406_s2] ss:$0 sm:$0xff] }
   0x8   :  { %31 = vadd.xlane.f32.xlu0 %v264_v4  ;;  %35 = vadd.xlane.f32.xlu1 %v268_v5 }
   0x9   :  { %294 = vmatpush3.bf16.msra.mxu0 %v312_v23 }
   0xa   :  { %295 = vmatprep.subr.bf16.mxu0 %v313_v24 }
   0xd   :  { %296 = vmatpush3.bf16.msra.mxu0 %v313_v24 }
   0xe   :  { %297 = vmatprep.subr.bf16.mxu0 %v314_v25 }
  0x11   :  { %298 = vmatpush3.bf16.msra.mxu0 %v314_v25 }
  0x12   :  { %299 = vmatprep.subr.bf16.mxu0 %v315_v26 }
  0x15   :  { %300 = vmatpush3.bf16.msra.mxu0 %v315_v26 }
  0x16   :  { %301 = vmatprep.subr.bf16.mxu0 %v316_v27 }
  0x19   :  { %302 = vmatpush3.bf16.msra.mxu0 %v316_v27 }
  0x1a   :  { %303 = vmatprep.subr.bf16.mxu0 %v317_v28 }
  0x1d   :  { %304 = vmatpush3.bf16.msra.mxu0 %v317_v28 }
  0x1e   :  { %305 = vmatprep.subr.bf16.mxu0 %v318_v29 }
  0x21   :  { %306 = vmatpush3.bf16.msra.mxu0 %v318_v29 }
  0x91   :  { %v30_v7 = vpop.xlane.xlu0 %29  ;;  %v34_v8 = vpop.xlane.xlu1 %33 }
  0x92   :  { %v38_v9 = vmul.f32 0.0078125, %v30_v7  ;;  %v40_v10 = vmul.f32 0.0078125, %v34_v8 }
  0x94   :  { %v42_v11 = vsub.f32 %v263_v2, %v38_v9  ;;  %v44_v12 = vsub.f32 %v267_v3, %v40_v10 }
  0x95   :  { %v32_v13 = vpop.xlane.xlu0 %31  ;;  %v36_v14 = vpop.xlane.xlu1 %35 }
  0x96   :  { %v39_v15 = vmul.f32 0.0078125, %v32_v13  ;;  %v46_v16 = vmul.f32 %v42_v11, %v42_v11  ;;  %v41_v17 = vmul.f32 0.0078125, %v36_v14  ;;  %v48_v20 = vmul.f32 %v44_v12, %v44_v12 }
  0x98   :  { %v43_v18 = vsub.f32 %v264_v4, %v39_v15  ;;  %50 = vadd.xlane.f32.xlu0 %v46_v16  ;;  %v45_v19 = vsub.f32 %v268_v5, %v41_v17 }
  0x9a   :  { %v47_v21 = vmul.f32 %v43_v18, %v43_v18  ;;  %v49_v22 = vmul.f32 %v45_v19, %v45_v19 }
  0x9c   :  { %54 = vadd.xlane.f32.xlu0 %v48_v20  ;;  %52 = vadd.xlane.f32.xlu1 %v47_v21 }
  0xa0   :  { %56 = vadd.xlane.f32.xlu1 %v49_v22 }
 0x125   :  { %v51_v30 = vpop.xlane.xlu0 %50 }
 0x126   :  { %v58_v31 = vmul.f32 0.0078125, %v51_v30 }
 0x128   :  { %v62_v32 = vadd.f32 1e-06, %v58_v31 }
 0x129   :  { %v53_v33 = vpop.xlane.xlu1 %52  ;;  %v55_v34 = vpop.xlane.xlu0 %54 }
 0x12a   :  { %319 = vrsqrt.f32 %v62_v32  ;;  %v59_v35 = vmul.f32 0.0078125, %v53_v33  ;;  %v60_v36 = vmul.f32 0.0078125, %v55_v34 }
 0x12c   :  { %v63_v37 = vadd.f32 1e-06, %v59_v35  ;;  %v64_v38 = vadd.f32 1e-06, %v60_v36 }
 0x12d   :  { %v57_v39 = vpop.xlane.xlu1 %56 }
 0x12e   :  { %321 = vrsqrt.f32 %v63_v37  ;;  %v61_v40 = vmul.f32 0.0078125, %v57_v39 }
 0x12f   :  { %323 = vrsqrt.f32 %v64_v38 }
 0x130   :  { %v65_v41 = vadd.f32 1e-06, %v61_v40 }
 0x132   :  { %325 = vrsqrt.f32 %v65_v41 }
 0x134   :  { %v320_v42 = vpop.eup %319 }
 0x135   :  { %v70_v43 = vmul.f32 %v320_v42, %v42_v11 }
 0x137   :  { %v81_v48 = vmul.f32 %v242_v44, %v70_v43 }
 0x138   :  { %v322_v45 = vpop.eup %321 }
 0x139   :  { %v324_v46 = vpop.eup %323  ;;  %v71_v47 = vmul.f32 %v322_v45, %v43_v18  ;;  %v92_v53 = vadd.f32 %v243_v49, %v81_v48 }
 0x13a   :  { %v72_v50 = vmul.f32 %v324_v46, %v44_v12 }
 0x13b   :  { %v82_v51 = vmul.f32 %v242_v44, %v71_v47 }
 0x13c   :  { %v326_v52 = vpop.eup %325  ;;  %v83_v56 = vmul.f32 %v242_v44, %v72_v50 }
 0x13d   :  { %v93_v54 = vadd.f32 %v243_v49, %v82_v51  ;;  %v73_v55 = vmul.f32 %v326_v52, %v45_v19 }
 0x13e   :  { %v94_v59 = vadd.f32 %v243_v49, %v83_v56 }
 0x13f   :  { %v96_v57 = vpack.c.bf16 %v93_v54, %v92_v53  ;;  %v84_v58 = vmul.f32 %v242_v44, %v73_v55 }
 0x141   :  { %307 = vmatprep.mubr.bf16.mxu0 %v96_v57  ;;  %v95_v60 = vadd.f32 %v243_v49, %v84_v58 }
 0x143   :  { %v97_v61 = vpack.c.bf16 %v95_v60, %v94_v59 }
 0x145   :  { %308 = vmatmul.mubr.bf16.vlgmr.msra.gmra.mrb[0].mxu0 %v97_v61 }
 0x218   :  { %v309_v62 = vpop.f32.mrb[0].mxu0 }
 0x219   :  { %v203_v0 = vpop.f32.mrb[1].mxu0  ;;  %v212_v2 = vadd.f32 %v309_v62, %v244_v63 }
 0x21a   :  { %v310_v1 = vpop.f32.mrb[2].mxu0  ;;  %v204_v5 = vadd.f32 %v244_v63, %v203_v0 }
 0x21b   :  { %v215_v3 = vadd.f32 %v310_v1, %v244_v63  ;;  %v206_v4 = vpop.f32.mrb[3].mxu0 }
 0x21c   :  { %v207_v6 = vadd.f32 %v244_v63, %v206_v4 }
 0x21d   :  { %v277_v7 = vpack.c.bf16 %v215_v3, %v212_v2 }
 0x21e   :  { %v272_v8 = vpack.c.bf16 %v207_v6, %v204_v5 }
 0x21f   :  { %280 = vst [vmem:[%s407_s5 + $0x8] sm:$0xff] %v277_v7  }
 0x220   :  { %273 = vst [vmem:[%s407_s5] sm:$0xff] %v272_v8  }

// kernel: pre_vit_cross_attn_forward.31
= control target key start
LH: loop header
LB: loop body
LE: loop exit
PB: predicated region body
PF: predicated region fallthrough
CT: control target
= control target key end

     0   :  { %s1033_s12 = smov 0   ;;  %s1140_s0 = inlined_call_operand.vmem [shape: bf16[2,16,128], index: 0, kind: input, shape index: {}]   ;;  %s1141_s1 = inlined_call_operand.vmem [shape: bf16[2,16,128], index: 1, kind: input, shape index: {}]   ;;  %s1142_s2 = inlined_call_operand.vmem [shape: bf16[2,16,128], index: 2, kind: input, shape index: {}]   ;;  %s1143_s3 = inlined_call_operand.vmem [shape: bf16[2,16,128], index: 3, kind: output, shape index: {}]  }
   0x1 LB: > { %s834_s13 = sadd.s32 4294967295, %s1006_s12   ;;  %p838_p0 = scmp.ge.s32.totalorder %s1006_s12, 1  ;;  %s1006_s12 = sphi %s1033_s12, %s13_s12  }
   0x2   : > { %p157_p1 = scmp.lt.s32.totalorder %s1006_s12, 3 }
   0x4   : > { %p158_p2 = pnand %p838_p0, %p157_p1 }
   0x5   : > { %p191_p3 = scmp.lt.s32.totalorder (!%p158_p2), %s834_s13, 1  ;;  %v1008_v0 = vmov (!%p158_p2), 0.0   ;;  %vm1009_vm0 = vmmov (!%p158_p2), 0   ;;  %vm228_vm1 = vcmask (!%p158_p2), 261120   ;;  %vm276_vm2 = vcmask (!%p158_p2), 130048   ;;  %s1010_s21 = smov (!%p158_p2), 96  }
   0x6   : > { %161 = sbr.rel (%p158_p2) target bundleno = 1495 (0x5d7), region = 32  ;;  %889 = vmatprep.subr.bf16.mxu0 (!%p158_p2), %v1008_v0  ;;  %891 = vmatprep.mubr.msk.bf16.mxu0 (!%p158_p2), %vm1009_vm0, %v1008_v0  ;;  %s1011_s22 = smov (!%p158_p2), 32   ;;  %vm739_vm3 = vcmask (!%p158_p2), 523264   ;;  %vm742_vm4 = vcmask (!%p158_p2), 785408  }
   0x7   : > { %895 = vmatprep.subr.bf16.mxu1 (!%p158_p2), %v1008_v0  ;;  %897 = vmatprep.mubr.msk.bf16.mxu1 (!%p158_p2), %vm1009_vm0, %v1008_v0  ;;  %s1012_s26 = smov (!%p158_p2), 64  }
   0xd   : > { %s1145_s13 = smov (!%p191_p3, %s834_s13), 1 }
   0xe   : > { %s1047_s14 = sshll.u32 %s1145_s13, 3 }
   0xf   : > { %s200_s17 = scalar_lea.vmem %s1141_s1, %s1047_s14  ;;  %s195_s20 = scalar_lea.vmem %s1140_s0, %s1047_s14 }
  0x10   : > { %v965_v1 = vld [vmem:[%s200_s17] sm:$0xff]   ;;  %s205_s25 = scalar_lea.vmem %s1142_s2, %s1047_s14  ;;  %s210_s29 = scalar_lea.vmem %s1143_s3, %s1047_s14 }
  0x11   : > { %v233_v2 = vsel %vm228_vm1, %v965_v1, 0  ;;  %v966_v3 = vld [vmem:[%s195_s20] sm:$0xff]  }
  0x12   : > { %890 = vmatpush3.bf16.xpose.msra.mxu0 %v233_v2  ;;  %v1072_v20 = vld [vmem:[%s205_s25] sm:$0xff]  }
  0x13   : > { %907 = vmatprep.subr.bf16.mxu0 %v1008_v0  ;;  %896 = vmatpush3.bf16.msra.mxu1 %v1072_v20 }
  0x14   : > { %901 = vmatprep.subr.bf16.mxu1 %v1008_v0 }
  0x19   : > { %892 = vmatmul.mubr.msk.bf16.vlgmr.msra.gmra.mrb[0].mxu0 %vm228_vm1, %v966_v3 }
  0x1a   : > { %909 = vmatprep.mubr.msk.bf16.mxu0 %vm1009_vm0, %v1008_v0 }
  0xec   : > { %v269_v4 = vpop.f32.mrb[0].mxu0 }
  0xed   : > { %v893_v5 = vpop.f32.mrb[1].mxu0  ;;  %v277_v6 = vsel %vm276_vm2, %v269_v4, -inf }
  0xee   : > { %278 = vmax.xlane.f32.xlu0 %v277_v6  ;;  %v272_v7 = vpop.f32.mrb[2].mxu0 }
  0xef   : > { %v894_v8 = vpop.f32.mrb[3].mxu0  ;;  %v280_v9 = vsel %vm276_vm2, %v272_v7, -inf }
  0xf2   : > { %281 = vmax.xlane.f32.xlu0 %v280_v9 }
 0x108   : > { %352 = vrot.lane.b32.xlu0 %v965_v1, %s1010_s21 }
 0x10c   : > { %594 = vrot.lane.b32.xlu0 %v965_v1, %s1011_s22 }
 0x17b   : > { %v279_v10 = vpop.xlane.xlu0 %278 }
 0x17c   : > { %v283_v11 = vsub.f32 %v269_v4, %v279_v10 }
 0x17e   : > { %v285_v12 = vmul.f32 1.442695, %v283_v11 }
 0x17f   : > { %v282_v13 = vpop.xlane.xlu0 %281 }
 0x180   : > { %968 = vpow2.f32 %v285_v12  ;;  %v284_v14 = vsub.f32 %v272_v7, %v282_v13 }
 0x182   : > { %v287_v15 = vmul.f32 1.442695, %v284_v14 }
 0x183   : > { %v353_v25 = vpop.permute.xlu0 %352 }
 0x184   : > { %970 = vpow2.f32 %v287_v15  ;;  %v358_v29 = vsel %vm228_vm1, %v353_v25, 0 }
 0x187   : > { %v595_v33 = vpop.permute.xlu0 %594 }
 0x188   : > { %v600_v35 = vsel %vm228_vm1, %v595_v33, 0 }
 0x18a   : > { %v969_v16 = vpop.eup %968 }
 0x18b   : > { %v289_v17 = vsel %vm276_vm2, %v969_v16, 0.0 }
 0x18c   : > { %290 = vadd.xlane.f32.xlu1 %v289_v17 }
 0x18e   : > { %v971_v18 = vpop.eup %970 }
 0x18f   : > { %v292_v19 = vsel %vm276_vm2, %v971_v18, 0.0 }
 0x190   : > { %293 = vadd.xlane.f32.xlu1 %v292_v19 }
 0x1a1   : > { %350 = vrot.lane.b32.xlu1 %v966_v3, %s1010_s21 }
 0x1a5   : > { %473 = vrot.lane.b32.xlu1 %v965_v1, %s1012_s26 }
 0x1a9   : > { %471 = vrot.lane.b32.xlu1 %v966_v3, %s1012_s26 }
 0x1ad   : > { %592 = vrot.lane.b32.xlu1 %v966_v3, %s1011_s22 }
 0x219   : > { %v291_v21 = vpop.xlane.xlu1 %290 }
 0x21a   : > { %972 = vrcp.f32 %v291_v21 }
 0x21d   : > { %v294_v22 = vpop.xlane.xlu1 %293 }
 0x21e   : > { %974 = vrcp.f32 %v294_v22 }
 0x221   : > { %v351_v28 = vpop.permute.xlu1 %350 }
 0x224   : > { %v973_v23 = vpop.eup %972 }
 0x225   : > { %v297_v26 = vmul.f32 %v973_v23, %v969_v16  ;;  %v474_v31 = vpop.permute.xlu1 %473 }
 0x226   : > { %v479_v32 = vsel %vm228_vm1, %v474_v31, 0 }
 0x228   : > { %v975_v24 = vpop.eup %974 }
 0x229   : > { %v298_v27 = vmul.f32 %v975_v24, %v971_v18  ;;  %v472_v34 = vpop.permute.xlu1 %471 }
 0x22b   : > { %v299_v30 = vpack.c.bf16 %v298_v27, %v297_v26 }
 0x22d   : > { %898 = vmatmul.mubr.msk.bf16.vlgmr.msra.gmra.mrb[0].mxu1 %vm276_vm2, %v299_v30  ;;  %v593_v36 = vpop.permute.xlu1 %592 }
 0x22e   : > { %902 = vmatpush3.bf16.xpose.msra.mxu1 %v358_v29  ;;  %903 = vmatprep.mubr.msk.bf16.mxu1 %vm1009_vm0, %v1008_v0 }
 0x22f   : > { %913 = vmatprep.subr.bf16.mxu1 %v1008_v0 }
 0x235   : > { %904 = vmatmul.mubr.msk.bf16.vlgmr.msra.gmra.mrb[4].mxu1 %vm228_vm1, %v351_v28 }
 0x236   : > { %914 = vmatpush3.bf16.xpose.msra.mxu1 %v479_v32  ;;  %915 = vmatprep.mubr.msk.bf16.mxu1 %vm1009_vm0, %v1008_v0 }
 0x237   : > { %925 = vmatprep.subr.bf16.mxu1 %v1008_v0 }
 0x23d   : > { %916 = vmatmul.mubr.msk.bf16.vlgmr.msra.gmra.mrb[8].mxu1 %vm228_vm1, %v472_v34 }
 0x23e   : > { %926 = vmatpush3.bf16.xpose.msra.mxu1 %v600_v35  ;;  %927 = vmatprep.mubr.msk.bf16.mxu1 %vm1009_vm0, %v1008_v0 }
 0x245   : > { %928 = vmatmul.mubr.msk.bf16.vlgmr.msra.gmra.mrb[12].mxu1 %vm228_vm1, %v593_v36 }
 0x300   : > { %v1095_v37 = vpop.f32.mrb[0].mxu1 }
 0x301   : > { %v899_v38 = vpop.f32.mrb[1].mxu1 }
 0x302   : > { %v1097_v39 = vpop.f32.mrb[2].mxu1 }
 0x303   : > { %v900_v40 = vpop.f32.mrb[3].mxu1 }
 0x308   : > { %v394_v41 = vpop.f32.mrb[4].mxu1 }
 0x309   : > { %v905_v42 = vpop.f32.mrb[5].mxu1  ;;  %v401_v43 = vsel %vm276_vm2, %v394_v41, -inf }
 0x30a   : > { %402 = vmax.xlane.f32.xlu0 %v401_v43  ;;  %v397_v44 = vpop.f32.mrb[6].mxu1 }
 0x30b   : > { %v906_v45 = vpop.f32.mrb[7].mxu1  ;;  %v404_v46 = vsel %vm276_vm2, %v397_v44, -inf }
 0x30c   : > { %405 = vmax.xlane.f32.xlu1 %v404_v46 }
 0x310   : > { %v515_v47 = vpop.f32.mrb[8].mxu1 }
 0x311   : > { %v917_v48 = vpop.f32.mrb[9].mxu1  ;;  %v522_v49 = vsel %vm276_vm2, %v515_v47, -inf }
 0x312   : > { %523 = vmax.xlane.f32.xlu0 %v522_v49  ;;  %v518_v50 = vpop.f32.mrb[10].mxu1 }
 0x313   : > { %v918_v51 = vpop.f32.mrb[11].mxu1  ;;  %v525_v52 = vsel %vm276_vm2, %v518_v50, -inf }
 0x316   : > { %526 = vmax.xlane.f32.xlu0 %v525_v52 }
 0x318   : > { %v636_v53 = vpop.f32.mrb[12].mxu1 }
 0x319   : > { %v929_v54 = vpop.f32.mrb[13].mxu1  ;;  %v643_v55 = vsel %vm276_vm2, %v636_v53, -inf }
 0x31a   : > { %644 = vmax.xlane.f32.xlu0 %v643_v55  ;;  %v639_v56 = vpop.f32.mrb[14].mxu1 }
 0x31b   : > { %v646_v57 = vsel %vm276_vm2, %v639_v56, -inf  ;;  %v930_v58 = vpop.f32.mrb[15].mxu1 }
 0x31c   : > { %647 = vmax.xlane.f32.xlu1 %v646_v57 }
 0x397   : > { %v403_v59 = vpop.xlane.xlu0 %402 }
 0x398   : > { %v407_v60 = vsub.f32 %v394_v41, %v403_v59 }
 0x399   : > { %v406_v61 = vpop.xlane.xlu1 %405 }
 0x39a   : > { %v409_v62 = vmul.f32 1.442695, %v407_v60  ;;  %v408_v63 = vsub.f32 %v397_v44, %v406_v61 }
 0x39c   : > { %976 = vpow2.f32 %v409_v62  ;;  %v411_v1 = vmul.f32 1.442695, %v408_v63 }
 0x39e   : > { %978 = vpow2.f32 %v411_v1 }
 0x39f   : > { %v524_v2 = vpop.xlane.xlu0 %523 }
 0x3a0   : > { %v528_v3 = vsub.f32 %v515_v47, %v524_v2 }
 0x3a2   : > { %v530_v4 = vmul.f32 1.442695, %v528_v3 }
 0x3a3   : > { %v527_v5 = vpop.xlane.xlu0 %526 }
 0x3a4   : > { %980 = vpow2.f32 %v530_v4  ;;  %v529_v6 = vsub.f32 %v518_v50, %v527_v5 }
 0x3a6   : > { %v977_v7 = vpop.eup %976  ;;  %v532_v8 = vmul.f32 1.442695, %v529_v6 }
 0x3a7   : > { %v645_v9 = vpop.xlane.xlu0 %644  ;;  %v413_v10 = vsel %vm276_vm2, %v977_v7, 0.0 }
 0x3a8   : > { %v979_v11 = vpop.eup %978  ;;  %982 = vpow2.f32 %v532_v8  ;;  %v649_v12 = vsub.f32 %v636_v53, %v645_v9  ;;  %414 = vadd.xlane.f32.xlu0 %v413_v10 }
 0x3a9   : > { %v416_v13 = vsel %vm276_vm2, %v979_v11, 0.0  ;;  %v648_v22 = vpop.xlane.xlu1 %647 }
 0x3aa   : > { %v651_v14 = vmul.f32 1.442695, %v649_v12  ;;  %417 = vadd.xlane.f32.xlu1 %v416_v13  ;;  %v650_v23 = vsub.f32 %v639_v56, %v648_v22 }
 0x3ac   : > { %984 = vpow2.f32 %v651_v14  ;;  %v653_v24 = vmul.f32 1.442695, %v650_v23 }
 0x3ae   : > { %v981_v15 = vpop.eup %980  ;;  %986 = vpow2.f32 %v653_v24 }
 0x3af   : > { %v534_v16 = vsel %vm276_vm2, %v981_v15, 0.0 }
 0x3b0   : > { %535 = vadd.xlane.f32.xlu0 %v534_v16 }
 0x3b2   : > { %v983_v17 = vpop.eup %982 }
 0x3b3   : > { %v537_v18 = vsel %vm276_vm2, %v983_v17, 0.0 }
 0x3b4   : > { %538 = vadd.xlane.f32.xlu1 %v537_v18 }
 0x3b6   : > { %v985_v19 = vpop.eup %984 }
 0x3b7   : > { %v655_v21 = vsel %vm276_vm2, %v985_v19, 0.0 }
 0x3b8   : > { %656 = vadd.xlane.f32.xlu0 %v655_v21  ;;  %v987_v25 = vpop.eup %986 }
 0x3b9   : > { %v658_v26 = vsel %vm276_vm2, %v987_v25, 0.0 }
 0x3c5   : > { %545 = vrot.lane.b32.xlu1 %v1072_v20, %s1012_s26 }
 0x3ce   : > { %424 = vrot.lane.b32.xlu0 %v1072_v20, %s1010_s21 }
 0x3e9   : > { %659 = vadd.xlane.f32.xlu1 %v658_v26 }
 0x3fa   : > { %666 = vrot.lane.b32.xlu1 %v1072_v20, %s1011_s22 }
 0x435   : > { %v415_v28 = vpop.xlane.xlu0 %414 }
 0x437   : > { %v418_v27 = vpop.xlane.xlu1 %417 }
 0x438   : > { %988 = vrcp.f32 %v418_v27 }
 0x439   : > { %990 = vrcp.f32 %v415_v28 }
 0x43d   : > { %v536_v29 = vpop.xlane.xlu0 %535 }
 0x441   : > { %v539_v30 = vpop.xlane.xlu1 %538 }
 0x442   : > { %992 = vrcp.f32 %v539_v30  ;;  %v989_v31 = vpop.eup %988 }
 0x443   : > { %994 = vrcp.f32 %v536_v29  ;;  %v991_v33 = vpop.eup %990  ;;  %v422_v34 = vmul.f32 %v989_v31, %v979_v11 }
 0x444   : > { %v421_v35 = vmul.f32 %v991_v33, %v977_v7 }
 0x445   : > { %v657_v32 = vpop.xlane.xlu0 %656  ;;  %v546_v20 = vpop.permute.xlu1 %545 }
 0x446   : > { %v423_v38 = vpack.c.bf16 %v422_v34, %v421_v35  ;;  %996 = vrcp.f32 %v657_v32 }
 0x449   : > { %v425_v36 = vpop.permute.xlu0 %424 }
 0x44a   : > { %908 = vmatpush3.bf16.msra.mxu0 %v425_v36 }
 0x44b   : > { %919 = vmatprep.subr.bf16.mxu0 %v1008_v0 }
 0x44c   : > { %v993_v40 = vpop.eup %992 }
 0x44d   : > { %910 = vmatmul.mubr.msk.bf16.vlgmr.msra.gmra.mrb[4].mxu0 %vm276_vm2, %v423_v38  ;;  %v995_v41 = vpop.eup %994  ;;  %v543_v42 = vmul.f32 %v993_v40, %v983_v17 }
 0x44e   : > { %920 = vmatpush3.bf16.msra.mxu0 %v546_v20  ;;  %921 = vmatprep.mubr.msk.bf16.mxu0 %vm1009_vm0, %v1008_v0  ;;  %v542_v43 = vmul.f32 %v995_v41, %v981_v15 }
 0x44f   : > { %931 = vmatprep.subr.bf16.mxu0 %v1008_v0 }
 0x450   : > { %v544_v44 = vpack.c.bf16 %v543_v42, %v542_v43  ;;  %v997_v47 = vpop.eup %996 }
 0x451   : > { %v663_v49 = vmul.f32 %v997_v47, %v985_v19 }
 0x455   : > { %922 = vmatmul.mubr.msk.bf16.vlgmr.msra.gmra.mrb[8].mxu0 %vm276_vm2, %v544_v44 }
 0x456   : > { %933 = vmatprep.mubr.msk.bf16.mxu0 %vm1009_vm0, %v1008_v0 }
 0x476   : > { %v660_v45 = vpop.xlane.xlu1 %659 }
 0x477   : > { %998 = vrcp.f32 %v660_v45 }
 0x47a   : > { %v667_v46 = vpop.permute.xlu1 %666 }
 0x47b   : > { %932 = vmatpush3.bf16.msra.mxu0 %v667_v46 }
 0x481   : > { %v999_v48 = vpop.eup %998 }
 0x482   : > { %v664_v50 = vmul.f32 %v999_v48, %v987_v25 }
 0x484   : > { %v665_v51 = vpack.c.bf16 %v664_v50, %v663_v49 }
 0x486   : > { %934 = vmatmul.mubr.msk.bf16.vlgmr.msra.gmra.mrb[12].mxu0 %vm276_vm2, %v665_v51 }
 0x520   : > { %v464_v52 = vpop.f32.mrb[4].mxu0 }
 0x521   : > { %v911_v53 = vpop.f32.mrb[5].mxu0 }
 0x522   : > { %v467_v54 = vpop.f32.mrb[6].mxu0 }
 0x523   : > { %v950_v55 = vpack.i.bf16 %v467_v54, %v464_v52  ;;  %v912_v56 = vpop.f32.mrb[7].mxu0 }
 0x525   : > { %951 = vrot.lane.b32.xlu1 %v950_v55, %s1011_s22 }
 0x528   : > { %v585_v0 = vpop.f32.mrb[8].mxu0 }
 0x529   : > { %v923_v57 = vpop.f32.mrb[9].mxu0 }
 0x52a   : > { %v588_v58 = vpop.f32.mrb[10].mxu0 }
 0x52b   : > { %v955_v59 = vpack.i.bf16 %v588_v58, %v585_v0  ;;  %v924_v60 = vpop.f32.mrb[11].mxu0 }
 0x52d   : > { %956 = vrot.lane.b32.xlu0 %v955_v59, %s1012_s26 }
 0x559   : > { %v706_v61 = vpop.f32.mrb[12].mxu0 }
 0x55a   : > { %v935_v62 = vpop.f32.mrb[13].mxu0 }
 0x55b   : > { %v709_v63 = vpop.f32.mrb[14].mxu0 }
 0x55c   : > { %v960_v1 = vpack.i.bf16 %v709_v63, %v706_v61  ;;  %v936_v2 = vpop.f32.mrb[15].mxu0 }
 0x55e   : > { %961 = vrot.lane.b32.xlu1 %v960_v1, %s1010_s21 }
 0x597   : > { %v952_v3 = vpop.permute.xlu1 %951 }
 0x598   : > { %v954_v5 = vunpack.i.h.bf16 %v952_v3  ;;  %v953_v6 = vunpack.i.l.bf16 %v952_v3 }
 0x59a   : > { %v738_v10 = vsel %vm228_vm1, %v1097_v39, %v954_v5  ;;  %v737_v11 = vsel %vm228_vm1, %v1095_v37, %v953_v6 }
 0x59f   : > { %v957_v4 = vpop.permute.xlu0 %956 }
 0x5a0   : > { %v959_v7 = vunpack.i.h.bf16 %v957_v4  ;;  %v958_v8 = vunpack.i.l.bf16 %v957_v4 }
 0x5a2   : > { %v741_v14 = vsel %vm739_vm3, %v738_v10, %v959_v7  ;;  %v740_v15 = vsel %vm739_vm3, %v737_v11, %v958_v8 }
 0x5d0   : > { %v962_v9 = vpop.permute.xlu1 %961 }
 0x5d1   : > { %v964_v12 = vunpack.i.h.bf16 %v962_v9  ;;  %v963_v13 = vunpack.i.l.bf16 %v962_v9 }
 0x5d3   : > { %v744_v16 = vsel %vm742_vm4, %v741_v14, %v964_v12  ;;  %v743_v17 = vsel %vm742_vm4, %v740_v15, %v963_v13 }
 0x5d4   : > { %v871_v18 = vpack.c.bf16 %v744_v16, %v743_v17 }
 0x5d6   : > { %872 = vst [vmem:[%s210_s29] sm:$0xff] %v871_v18  }
 0x5d7 PF: > { %s13_s12 = sadd.s32 1, %s1006_s12  }
 0x5d8   : > { %p10_p4 = scmp.ge.s32.totalorder %s13_s12, 4  }
 0x5da   :  { %12 = sbr.rel (!%p10_p4) target bundleno = 1 (0x1), region = 68 }

// kernel: pre_vit_cross_attn_forward.24
= control target key start
LH: loop header
LB: loop body
LE: loop exit
PB: predicated region body
PF: predicated region fallthrough
CT: control target
= control target key end

     0   :  { %s865_s1 = inlined_call_operand.vmem [shape: bf16[512,128], index: 1, kind: input, shape index: {}]   ;;  %s866_s0 = inlined_call_operand.vmem [shape: bf16[34,512], index: 0, kind: input, shape index: {}]   ;;  %s867_s2 = inlined_call_operand.vmem [shape: f32[1,128], index: 2, kind: input, shape index: {}]   ;;  %s868_s3 = inlined_call_operand.vmem [shape: bf16[34,128], index: 3, kind: input, shape index: {}]   ;;  %s869_s4 = inlined_call_operand.vmem [shape: bf16[34,128], index: 4, kind: output, shape index: {}]  }
   0x1   :  { %v645_v0 = vld [vmem:[%s865_s1 + $0x40] sm:$0xff]   ;;  %v649_v4 = vld [vmem:[%s865_s1 + $0x48] sm:$0xff]   ;;  %v653_v8 = vld [vmem:[%s865_s1 + $0x50] sm:$0xff]  }
   0x2   :  { %v646_v1 = vld [vmem:[%s865_s1 + $0xc0] sm:$0xff]   ;;  %577 = vmatprep.subr.bf16.mxu0 %v645_v0  ;;  %v650_v5 = vld [vmem:[%s865_s1 + $0xc8] sm:$0xff]   ;;  %v654_v9 = vld [vmem:[%s865_s1 + $0xd0] sm:$0xff]  }
   0x3   :  { %v647_v2 = vld [vmem:[%s865_s1] sm:$0xff]   ;;  %611 = vmatprep.subr.bf16.mxu1 %v646_v1  ;;  %v651_v6 = vld [vmem:[%s865_s1 + $0x8] sm:$0xff]   ;;  %v655_v10 = vld [vmem:[%s865_s1 + $0x10] sm:$0xff]  }
   0x4   :  { %v648_v3 = vld [vmem:[%s865_s1 + $0x80] sm:$0xff]   ;;  %578 = vmatpush3.bf16.msra.mxu0 %v647_v2  ;;  %v652_v7 = vld [vmem:[%s865_s1 + $0x88] sm:$0xff]   ;;  %v656_v11 = vld [vmem:[%s865_s1 + $0x90] sm:$0xff]  }
   0x5   :  { %612 = vmatpush3.bf16.msra.mxu1 %v648_v3  ;;  %579 = vmatprep.subr.bf16.mxu0 %v649_v4  ;;  %v657_v12 = vld [vmem:[%s865_s1 + $0x58] sm:$0xff]   ;;  %v661_v16 = vld [vmem:[%s865_s1 + $0x60] sm:$0xff]   ;;  %v665_v20 = vld [vmem:[%s865_s1 + $0x68] sm:$0xff]  }
   0x6   :  { %613 = vmatprep.subr.bf16.mxu1 %v650_v5  ;;  %v658_v13 = vld [vmem:[%s865_s1 + $0xd8] sm:$0xff]   ;;  %v662_v17 = vld [vmem:[%s865_s1 + $0xe0] sm:$0xff]   ;;  %v666_v21 = vld [vmem:[%s865_s1 + $0xe8] sm:$0xff]  }
   0x7   :  { %v659_v14 = vld [vmem:[%s865_s1 + $0x18] sm:$0xff]   ;;  %v663_v18 = vld [vmem:[%s865_s1 + $0x20] sm:$0xff]   ;;  %v667_v22 = vld [vmem:[%s865_s1 + $0x28] sm:$0xff]  }
   0x8   :  { %580 = vmatpush3.bf16.msra.mxu0 %v651_v6  ;;  %v660_v15 = vld [vmem:[%s865_s1 + $0x98] sm:$0xff]   ;;  %v664_v19 = vld [vmem:[%s865_s1 + $0xa0] sm:$0xff]   ;;  %v668_v23 = vld [vmem:[%s865_s1 + $0xa8] sm:$0xff]  }
   0x9   :  { %614 = vmatpush3.bf16.msra.mxu1 %v652_v7  ;;  %581 = vmatprep.subr.bf16.mxu0 %v653_v8  ;;  %v669_v24 = vld [vmem:[%s865_s1 + $0x70] sm:$0xff]   ;;  %v673_v28 = vld [vmem:[%s865_s1 + $0x78] sm:$0xff]   ;;  %v26_v38 = vld [vmem:[%s866_s0 + $0x40] sm:$0x11] }
   0xa   :  { %615 = vmatprep.subr.bf16.mxu1 %v654_v9  ;;  %v670_v25 = vld [vmem:[%s865_s1 + $0xf0] sm:$0xff]   ;;  %v674_v29 = vld [vmem:[%s865_s1 + $0xf8] sm:$0xff]   ;;  %v27_v39 = vld [vmem:[%s866_s0 + $0x48] sm:$0x11]  ;;  %v512_v42 = vcombine.high %v26_v38, %v26_v38  ;;  %v511_v44 = vcombine.low %v26_v38, %v26_v38 }
   0xb   :  { %v671_v26 = vld [vmem:[%s865_s1 + $0x30] sm:$0xff]   ;;  %v675_v30 = vld [vmem:[%s865_s1 + $0x38] sm:$0xff]   ;;  %v514_v43 = vcombine.high %v27_v39, %v27_v39  ;;  %v513_v45 = vcombine.low %v27_v39, %v27_v39  ;;  %v502_v48 = vld [vmem:[%s867_s2] ss:$0 sm:$0xff] }
   0xc   :  { %582 = vmatpush3.bf16.msra.mxu0 %v655_v10  ;;  %v672_v27 = vld [vmem:[%s865_s1 + $0xb0] sm:$0xff]   ;;  %v676_v31 = vld [vmem:[%s865_s1 + $0xb8] sm:$0xff]   ;;  %v558_v54 = vld [vmem:[%s868_s3] sm:$0xff]  }
   0xd   :  { %616 = vmatpush3.bf16.msra.mxu1 %v656_v11  ;;  %583 = vmatprep.subr.bf16.mxu0 %v657_v12  ;;  %v677_v32 = vld [vmem:[%s866_s0] ss:$16 sps:$4 sm:$0xff]   ;;  %v679_v33 = vld [vmem:[%s866_s0 + $0x4] ss:$16 sps:$4 sm:$0xff]   ;;  %v680_v34 = vld [vmem:[%s866_s0 + $0x8] ss:$16 sps:$4 sm:$0xff]   ;;  %v559_v62 = vunpack.c.l.bf16 %v558_v54  ;;  %v560_v0 = vunpack.c.h.bf16 %v558_v54 }
   0xe   :  { %617 = vmatprep.subr.bf16.mxu1 %v658_v13  ;;  %v682_v35 = vld [vmem:[%s866_s0 + $0xc] ss:$16 sps:$4 sm:$0xff]   ;;  %377 = vmatprep.mubr.bf16.mxu0 %v679_v33  ;;  %v683_v36 = vld [vmem:[%s866_s0 + $0x24] ss:$16 sps:$4 sm:$0xff]   ;;  %v687_v40 = vld [vmem:[%s866_s0 + $0x20] ss:$16 sps:$4 sm:$0xff]  }
   0xf   :  { %433 = vmatprep.mubr.bf16.mxu1 %v682_v35  ;;  %v685_v37 = vld [vmem:[%s866_s0 + $0x2c] ss:$16 sps:$4 sm:$0xff]   ;;  %v688_v41 = vld [vmem:[%s866_s0 + $0x28] ss:$16 sps:$4 sm:$0xff]  }
  0x10   :  { %584 = vmatpush3.bf16.msra.mxu0 %v659_v14  ;;  %v575_v11 = vld [vmem:[%s868_s3 + $0x8] sm:$0xff]  }
  0x11   :  { %618 = vmatpush3.bf16.msra.mxu1 %v660_v15  ;;  %585 = vmatprep.subr.bf16.mxu0 %v661_v16 }
  0x12   :  { %619 = vmatprep.subr.bf16.mxu1 %v662_v17 }
  0x14   :  { %586 = vmatpush3.bf16.msra.mxu0 %v663_v18 }
  0x15   :  { %620 = vmatpush3.bf16.msra.mxu1 %v664_v19  ;;  %587 = vmatprep.subr.bf16.mxu0 %v665_v20  ;;  %v563_v20 = vunpack.c.l.bf16 %v575_v11 }
  0x16   :  { %621 = vmatprep.subr.bf16.mxu1 %v666_v21 }
  0x18   :  { %588 = vmatpush3.bf16.msra.mxu0 %v667_v22  ;;  %v564_v22 = vunpack.c.h.bf16 %v575_v11 }
  0x19   :  { %622 = vmatpush3.bf16.msra.mxu1 %v668_v23  ;;  %589 = vmatprep.subr.bf16.mxu0 %v669_v24 }
  0x1a   :  { %623 = vmatprep.subr.bf16.mxu1 %v670_v25 }
  0x1c   :  { %590 = vmatpush3.bf16.msra.mxu0 %v671_v26 }
  0x1d   :  { %624 = vmatpush3.bf16.msra.mxu1 %v672_v27  ;;  %591 = vmatprep.subr.bf16.mxu0 %v673_v28  ;;  %v461_v27 = vld [vmem:[%s868_s3 + $0x10] sm:$0x1] }
  0x1e   :  { %625 = vmatprep.subr.bf16.mxu1 %v674_v29  ;;  %v466_v38 = vunpack.c.l.bf16 %v461_v27 }
  0x20   :  { %592 = vmatpush3.bf16.msra.mxu0 %v675_v30 }
  0x21   :  { %626 = vmatpush3.bf16.msra.mxu1 %v676_v31 }
  0x23   :  { %378 = vmatmul.mubr.bf16.vlgmr.msra.gmra.mrb[0].mxu0 %v677_v32 }
  0x24   :  { %434 = vmatmul.mubr.bf16.vlgmr.msra.gmra.mrb[0].mxu1 %v680_v34  ;;  %385 = vmatprep.mubr.bf16.mxu0 %v683_v36 }
  0x25   :  { %441 = vmatprep.mubr.bf16.mxu1 %v685_v37 }
  0x2b   :  { %386 = vmatmul.mubr.bf16.gmra.mrb[4].mxu0 %v687_v40 }
  0x2c   :  { %442 = vmatmul.mubr.bf16.gmra.mrb[4].mxu1 %v688_v41  ;;  %393 = vmatprep.mubr.bf16.mxu0 %v512_v42 }
  0x2d   :  { %449 = vmatprep.mubr.bf16.mxu1 %v514_v43 }
  0x33   :  { %394 = vmatmul.mubr.bf16.gmra.mrb[8].mxu0 %v511_v44 }
  0x34   :  { %450 = vmatmul.mubr.bf16.gmra.mrb[8].mxu1 %v513_v45 }
  0xf6   :  { %v593_v46 = vpop.f32.mrb[0].mxu0 }
  0xf7   :  { %v627_v47 = vpop.f32.mrb[0].mxu1  ;;  %v594_v49 = vpop.f32.mrb[1].mxu0 }
  0xf8   :  { %v595_v50 = vadd.f32 %v594_v49, %v593_v46  ;;  %v628_v51 = vpop.f32.mrb[1].mxu1  ;;  %v596_v52 = vpop.f32.mrb[2].mxu0 }
  0xf9   :  { %v629_v53 = vadd.f32 %v628_v51, %v627_v47  ;;  %v630_v55 = vpop.f32.mrb[2].mxu1  ;;  %v597_v56 = vpop.f32.mrb[3].mxu0 }
  0xfa   :  { %v380_v57 = vadd.f32 %v595_v50, %v502_v48  ;;  %v598_v58 = vadd.f32 %v597_v56, %v596_v52  ;;  %v631_v59 = vpop.f32.mrb[3].mxu1 }
  0xfb   :  { %v632_v60 = vadd.f32 %v631_v59, %v630_v55 }
  0xfc   :  { %v436_v61 = vadd.f32 %v629_v53, %v380_v57  ;;  %v383_v63 = vadd.f32 %v598_v58, %v502_v48 }
  0xfe   :  { %v439_v1 = vadd.f32 %v632_v60, %v383_v63  ;;  %v599_v2 = vpop.f32.mrb[4].mxu0  ;;  %v467_v5 = vadd.f32 %v559_v62, %v436_v61 }
  0xff   :  { %v633_v3 = vpop.f32.mrb[4].mxu1  ;;  %v600_v4 = vpop.f32.mrb[5].mxu0 }
 0x100   :  { %v468_v6 = vadd.f32 %v560_v0, %v439_v1  ;;  %v601_v7 = vadd.f32 %v600_v4, %v599_v2  ;;  %v634_v8 = vpop.f32.mrb[5].mxu1  ;;  %v602_v9 = vpop.f32.mrb[6].mxu0 }
 0x101   :  { %v635_v10 = vadd.f32 %v634_v8, %v633_v3  ;;  %v636_v12 = vpop.f32.mrb[6].mxu1  ;;  %v603_v13 = vpop.f32.mrb[7].mxu0 }
 0x102   :  { %v568_v14 = vpack.c.bf16 %v468_v6, %v467_v5  ;;  %v388_v15 = vadd.f32 %v601_v7, %v502_v48  ;;  %v604_v16 = vadd.f32 %v603_v13, %v602_v9  ;;  %v637_v17 = vpop.f32.mrb[7].mxu1 }
 0x103   :  { %v638_v18 = vadd.f32 %v637_v17, %v636_v12 }
 0x104   :  { %569 = vst [vmem:[%s869_s4] sm:$0xff] %v568_v14   ;;  %v444_v19 = vadd.f32 %v635_v10, %v388_v15  ;;  %v391_v21 = vadd.f32 %v604_v16, %v502_v48 }
 0x106   :  { %v447_v23 = vadd.f32 %v638_v18, %v391_v21  ;;  %v605_v24 = vpop.f32.mrb[8].mxu0  ;;  %v469_v28 = vadd.f32 %v563_v20, %v444_v19 }
 0x107   :  { %v639_v25 = vpop.f32.mrb[8].mxu1  ;;  %v606_v26 = vpop.f32.mrb[9].mxu0 }
 0x108   :  { %v470_v29 = vadd.f32 %v564_v22, %v447_v23  ;;  %v607_v30 = vadd.f32 %v606_v26, %v605_v24  ;;  %v640_v31 = vpop.f32.mrb[9].mxu1  ;;  %v608_v32 = vpop.f32.mrb[10].mxu0 }
 0x109   :  { %v641_v33 = vadd.f32 %v640_v31, %v639_v25  ;;  %v642_v34 = vpop.f32.mrb[10].mxu1  ;;  %v609_v35 = vpop.f32.mrb[11].mxu0 }
 0x10a   :  { %v573_v36 = vpack.c.bf16 %v470_v29, %v469_v28  ;;  %v396_v37 = vadd.f32 %v607_v30, %v502_v48  ;;  %v643_v39 = vpop.f32.mrb[11].mxu1 }
 0x10c   :  { %576 = vst [vmem:[%s869_s4 + $0x8] sm:$0xff] %v573_v36   ;;  %v452_v40 = vadd.f32 %v641_v33, %v396_v37 }
 0x10e   :  { %v471_v41 = vadd.f32 %v466_v38, %v452_v40 }
 0x110   :  { %v556_v42 = vpack.c.bf16 %v471_v41, %v471_v41 }
 0x112   :  { %497 = vst [vmem:[%s869_s4 + $0x10] sm:$0x1] %v556_v42 }

// kernel: pre_vit_cross_attn_forward.23
= control target key start
LH: loop header
LB: loop body
LE: loop exit
PB: predicated region body
PF: predicated region fallthrough
CT: control target
= control target key end

     0   :  { %s1444_s18 = smov 0   ;;  %s1446_s19 = smov 0   ;;  %s1793_s0 = inlined_call_operand.vmem [shape: bf16[34,128], index: 0, kind: input, shape index: {}]   ;;  %s1794_s1 = inlined_call_operand.vmem [shape: bf16[128,512], index: 1, kind: input, shape index: {}]   ;;  %s1795_s2 = inlined_call_operand.vmem [shape: f32[1,512], index: 2, kind: input, shape index: {}]   ;;  %s1796_s3 = inlined_call_operand.vmem [shape: f32[1,128], index: 3, kind: input, shape index: {}]   ;;  %s1797_s4 = inlined_call_operand.vmem [shape: f32[1,128], index: 4, kind: input, shape index: {}]   ;;  %s1798_s5 = inlined_call_operand.vmem [shape: bf16[34,512], index: 5, kind: output, shape index: {}]  }
   0x1   :  { %s1448_s20 = smov 0   ;;  %s1450_s21 = smov 0  }
   0x2   :  { %s1452_s22 = smov 0  }
   0x3 LB: > { %s30_s23 = sadd.s32 1, %s1406_s21  ;;  %s1183_s24 = sadd.s32 4294967295, %s1410_s22   ;;  %s1410_s22 = sphi %s1452_s22, %s15_s22   ;;  %s1406_s21 = sphi %s1450_s21, %s1803_s21   ;;  %s1402_s20 = sphi %s1448_s20, %s1802_s20   ;;  %s1398_s19 = sphi %s1446_s19, %s1801_s19   ;;  %s1394_s18 = sphi %s1444_s18, %s1800_s18  }
   0x4   : > { %p32_p0 = scmp.ge.s32.totalorder %s30_s23, 2  ;;  %p78_p1 = scmp.ne.s32.totalorder %s1398_s19, %s1394_s18 }
   0x5   : > { %p79_p2 = scmp.eq.s32.totalorder %s1410_s22, 0  ;;  %p188_p4 = scmp.eq.s32.totalorder %s1183_s24, 1 }
   0x6   : > { %s1805_s23 = smov (%p32_p0, %s30_s23), 0  ;;  %s71_s26 = sadd.s32 1, %s1398_s19 }
   0x7   : > { %p80_p3 = por %p79_p2, %p78_p1  ;;  %s67_s25 = ssub.s32 %s1406_s21, %s1805_s23 }
   0x8   : > { %p69_p5 = scmp.eq.s32.totalorder %s67_s25, 0  ;;  %p1479_p6 = por %p188_p4, %p78_p1 }
   0x9   : > { %p1189_p7 = scmp.ge.s32.totalorder %s1410_s22, 2 }
   0xa   : > { %s1484_s28 = scalar_select %p69_p5, %s1398_s19, %s71_s26  }
   0xb   : > { %234 = sbr.rel (%p1189_p7) target bundleno = 30 (0x1e), region = 28 }
  0x12   : > { %237 = sbr.rel (!%p80_p3) target bundleno = 30 (0x1e), region = 32  ;;  %s239_s29 = sand.u32 (%p80_p3), 1, %s1398_s19  }
  0x13   : > { %s1223_s30 = sshll.u32 (%p80_p3), %s1406_s21, 3  ;;  %s1190_s6 = sshll.u32 (%p80_p3), %s239_s29, 7 }
  0x14   : > { %s1492_s9 = scalar_lea.vmem (%p80_p3), %s1794_s1, %s1223_s30  ;;  %s241_s10 = scalar_lea.vmem (%p80_p3), [#allocation2], %s1190_s6 }
  0x15   : > { %v305_v0 = vld [vmem:[%s1492_s9] sm:$0xff] (%p80_p3)  ;;  %v307_v1 = vld [vmem:[%s1492_s9 + $0x10] sm:$0xff] (%p80_p3) }
  0x16   : > { %v309_v2 = vld [vmem:[%s1492_s9 + $0x20] sm:$0xff] (%p80_p3)  ;;  %306 = vst [vmem:[%s241_s10] sm:$0xff] (%p80_p3), %v305_v0  ;;  %308 = vst [vmem:[%s241_s10 + $0x8] sm:$0xff] (%p80_p3), %v307_v1  ;;  %v311_v3 = vld [vmem:[%s1492_s9 + $0x30] sm:$0xff] (%p80_p3) }
  0x17   : > { %310 = vst [vmem:[%s241_s10 + $0x10] sm:$0xff] (%p80_p3), %v309_v2  ;;  %v313_v4 = vld [vmem:[%s1492_s9 + $0x40] sm:$0xff] (%p80_p3)  ;;  %v315_v5 = vld [vmem:[%s1492_s9 + $0x50] sm:$0xff] (%p80_p3)  ;;  %312 = vst [vmem:[%s241_s10 + $0x18] sm:$0xff] (%p80_p3), %v311_v3 }
  0x18   : > { %314 = vst [vmem:[%s241_s10 + $0x20] sm:$0xff] (%p80_p3), %v313_v4  ;;  %316 = vst [vmem:[%s241_s10 + $0x28] sm:$0xff] (%p80_p3), %v315_v5  ;;  %v317_v6 = vld [vmem:[%s1492_s9 + $0x60] sm:$0xff] (%p80_p3)  ;;  %v319_v7 = vld [vmem:[%s1492_s9 + $0x70] sm:$0xff] (%p80_p3) }
  0x19   : > { %v321_v8 = vld [vmem:[%s1492_s9 + $0x80] sm:$0xff]  ;;  %318 = vst [vmem:[%s241_s10 + $0x30] sm:$0xff] %v317_v6  ;;  %320 = vst [vmem:[%s241_s10 + $0x38] sm:$0xff] %v319_v7  ;;  %v323_v9 = vld [vmem:[%s1492_s9 + $0x90] sm:$0xff] }
  0x1a   : > { %322 = vst [vmem:[%s241_s10 + $0x40] sm:$0xff] %v321_v8  ;;  %v325_v10 = vld [vmem:[%s1492_s9 + $0xa0] sm:$0xff]  ;;  %v327_v11 = vld [vmem:[%s1492_s9 + $0xb0] sm:$0xff]  ;;  %324 = vst [vmem:[%s241_s10 + $0x48] sm:$0xff] %v323_v9 }
  0x1b   : > { %326 = vst [vmem:[%s241_s10 + $0x50] sm:$0xff] %v325_v10  ;;  %328 = vst [vmem:[%s241_s10 + $0x58] sm:$0xff] %v327_v11  ;;  %v329_v12 = vld [vmem:[%s1492_s9 + $0xc0] sm:$0xff]  ;;  %v331_v13 = vld [vmem:[%s1492_s9 + $0xd0] sm:$0xff] }
  0x1c   : > { %v333_v14 = vld [vmem:[%s1492_s9 + $0xe0] sm:$0xff]  ;;  %330 = vst [vmem:[%s241_s10 + $0x60] sm:$0xff] %v329_v12  ;;  %332 = vst [vmem:[%s241_s10 + $0x68] sm:$0xff] %v331_v13  ;;  %v335_v15 = vld [vmem:[%s1492_s9 + $0xf0] sm:$0xff] }
  0x1d   : > { %334 = vst [vmem:[%s241_s10 + $0x70] sm:$0xff] %v333_v14  ;;  %336 = vst [vmem:[%s241_s10 + $0x78] sm:$0xff] %v335_v15 }
  0x1e PF: > { %p1193_p8 = scmp.ge.s32.totalorder %s1410_s22, 1  ;;  %p349_p9 = scmp.lt.s32.totalorder %s1410_s22, 3 }
  0x20   : > { %p350_p10 = pnand %p1193_p8, %p349_p9 }
  0x21   : > { %v1238_v16 = vld [vmem:[%s1793_s0 + $0x8] sm:$0xff] (!%p350_p10)   ;;  %v1231_v17 = vld [vmem:[%s1793_s0] sm:$0xff] (!%p350_p10)   ;;  %v429_v20 = vld [vmem:[%s1793_s0 + $0x10] sm:$0x1] (!%p350_p10)  ;;  %vm443_vm0 = vcmask (!%p350_p10), 1041408   ;;  %s356_s17 = sand.u32 (!%p350_p10), 1, %s1394_s18  }
  0x22   : > { %353 = sbr.rel (%p350_p10) target bundleno = 673 (0x2a1), region = 74  ;;  %v1236_v18 = vunpack.c.l.bf16 (!%p350_p10), %v1238_v16  ;;  %v1232_v19 = vunpack.c.l.bf16 (!%p350_p10), %v1231_v17  ;;  %v1237_v21 = vunpack.c.h.bf16 (!%p350_p10), %v1238_v16  ;;  %v1233_v22 = vunpack.c.h.bf16 (!%p350_p10), %v1231_v17  ;;  %s1194_s24 = sshll.u32 (!%p350_p10), %s356_s17, 7  ;;  %v1196_v16 = vld [vmem:[%s1796_s3] ss:$0 sm:$0xff] (!%p350_p10) }
  0x23   : > { %v434_v23 = vunpack.c.l.bf16 (!%p350_p10), %v429_v20  ;;  %s1525_s25 = scalar_lea.vmem (!%p350_p10), [#allocation2], %s1194_s24  ;;  %v1412_v59 = vmov (!%p350_p10), 0   ;;  %s1195_s7 = sshll.u32 (!%p350_p10), %s1402_s20, 1 }
  0x24   : > { %439 = vadd.xlane.f32.xlu0 (!%p350_p10), %v1236_v18  ;;  %435 = vadd.xlane.f32.xlu1 (!%p350_p10), %v1232_v19  ;;  %v1298_v25 = vld [vmem:[%s1525_s25 + $0x4] ss:$8 sps:$4 sm:$0xff] (!%p350_p10)   ;;  %v1300_v26 = vld [vmem:[%s1525_s25] ss:$8 sps:$4 sm:$0xff] (!%p350_p10)   ;;  %v1301_v48 = vld [vmem:[%s1525_s25 + $0x14] ss:$8 sps:$4 sm:$0xff] (!%p350_p10)  }
  0x25   : > { %v444_v24 = vsel (!%p350_p10), %vm443_vm0, %v434_v23, 0.0  ;;  %1239 = vmatprep.subr.bf16.mxu1 (!%p350_p10), %v1298_v25  ;;  %629 = vmatprep.subr.bf16.mxu0 (!%p350_p10), %v1298_v25  ;;  %v1303_v49 = vld [vmem:[%s1525_s25 + $0x10] ss:$8 sps:$4 sm:$0xff] (!%p350_p10)   ;;  %v1304_v50 = vld [vmem:[%s1525_s25 + $0x24] ss:$8 sps:$4 sm:$0xff] (!%p350_p10)   ;;  %p412_p11 = scmp.lt.s32.totalorder (!%p350_p10), %s1195_s7, 3 }
  0x26   : > { %1247 = vmatpush1.bf16.msra.mxu1 (!%p350_p10), %v1300_v26  ;;  %630 = vmatpush1.bf16.msra.mxu0 (!%p350_p10), %v1300_v26  ;;  %v1306_v51 = vld [vmem:[%s1525_s25 + $0x20] ss:$8 sps:$4 sm:$0xff] (!%p350_p10)   ;;  %v1307_v52 = vld [vmem:[%s1525_s25 + $0x34] ss:$8 sps:$4 sm:$0xff] (!%p350_p10)   ;;  %v1309_v53 = vld [vmem:[%s1525_s25 + $0x30] ss:$8 sps:$4 sm:$0xff] (!%p350_p10)  }
  0x27   : > { %1240 = vmatprep.subr.bf16.mxu1 (!%p350_p10), %v1301_v48  ;;  %631 = vmatprep.subr.bf16.mxu0 (!%p350_p10), %v1301_v48  ;;  %v1310_v54 = vld [vmem:[%s1525_s25 + $0x44] ss:$8 sps:$4 sm:$0xff] (!%p350_p10)   ;;  %v1312_v55 = vld [vmem:[%s1525_s25 + $0x40] ss:$8 sps:$4 sm:$0xff] (!%p350_p10)   ;;  %v1313_v56 = vld [vmem:[%s1525_s25 + $0x54] ss:$8 sps:$4 sm:$0xff] (!%p350_p10)  }
  0x28   : > { %441 = vadd.xlane.f32.xlu0 (!%p350_p10), %v1237_v21  ;;  %437 = vadd.xlane.f32.xlu1 (!%p350_p10), %v1233_v22  ;;  %v1315_v57 = vld [vmem:[%s1525_s25 + $0x50] ss:$8 sps:$4 sm:$0xff] (!%p350_p10)   ;;  %v1316_v58 = vld [vmem:[%s1525_s25 + $0x64] ss:$8 sps:$4 sm:$0xff] (!%p350_p10)   ;;  %v1318_v60 = vld [vmem:[%s1525_s25 + $0x60] ss:$8 sps:$4 sm:$0xff] (!%p350_p10)  }
  0x29   : > { %671 = vmatprep.mubr.bf16.mxu1 %v1412_v59  ;;  %661 = vmatprep.mubr.bf16.mxu0 %v1412_v59  ;;  %v1319_v61 = vld [vmem:[%s1525_s25 + $0x74] ss:$8 sps:$4 sm:$0xff]   ;;  %v1321_v62 = vld [vmem:[%s1525_s25 + $0x70] ss:$8 sps:$4 sm:$0xff]   ;;  %s1807_s7 = smov (!%p412_p11, %s1195_s7), 3  ;;  %s1255_s11 = smul.u32 40, %s356_s17 }
  0x2a   : > { %1248 = vmatpush1.bf16.msra.mxu1 %v1303_v49  ;;  %632 = vmatpush1.bf16.msra.mxu0 %v1303_v49  ;;  %s414_s10 = scalar_lea.vmem %s1795_s2, %s1807_s7  ;;  %s1229_s12 = sshll.u32 (%p1479_p6), %s1402_s20, 3 }
  0x2b   : > { %1241 = vmatprep.subr.bf16.mxu1 %v1304_v50  ;;  %633 = vmatprep.subr.bf16.mxu0 %v1304_v50  ;;  %s1728_s18 = scalar_lea.vmem [#allocation3], %s1255_s11  ;;  %s1009_s15 = scalar_lea.vmem (%p1479_p6), %s1798_s5, %s1229_s12 }
  0x2c   : > { %445 = vadd.xlane.f32.xlu0 %v444_v24 }
  0x2e   : > { %1249 = vmatpush1.bf16.msra.mxu1 %v1306_v51  ;;  %634 = vmatpush1.bf16.msra.mxu0 %v1306_v51 }
  0x2f   : > { %1242 = vmatprep.subr.bf16.mxu1 %v1307_v52  ;;  %635 = vmatprep.subr.bf16.mxu0 %v1307_v52 }
  0x32   : > { %1250 = vmatpush1.bf16.msra.mxu1 %v1309_v53  ;;  %636 = vmatpush1.bf16.msra.mxu0 %v1309_v53 }
  0x33   : > { %1243 = vmatprep.subr.bf16.mxu1 %v1310_v54  ;;  %637 = vmatprep.subr.bf16.mxu0 %v1310_v54 }
  0x36   : > { %1251 = vmatpush1.bf16.msra.mxu1 %v1312_v55  ;;  %638 = vmatpush1.bf16.msra.mxu0 %v1312_v55 }
  0x37   : > { %1244 = vmatprep.subr.bf16.mxu1 %v1313_v56  ;;  %639 = vmatprep.subr.bf16.mxu0 %v1313_v56 }
  0x3a   : > { %1252 = vmatpush1.bf16.msra.mxu1 %v1315_v57  ;;  %640 = vmatpush1.bf16.msra.mxu0 %v1315_v57 }
  0x3b   : > { %1245 = vmatprep.subr.bf16.mxu1 %v1316_v58  ;;  %641 = vmatprep.subr.bf16.mxu0 %v1316_v58 }
  0x3e   : > { %1253 = vmatpush1.bf16.msra.mxu1 %v1318_v60  ;;  %642 = vmatpush1.bf16.msra.mxu0 %v1318_v60 }
  0x3f   : > { %1246 = vmatprep.subr.bf16.mxu1 %v1319_v61  ;;  %643 = vmatprep.subr.bf16.mxu0 %v1319_v61 }
  0x42   : > { %1254 = vmatpush1.bf16.msra.mxu1 %v1321_v62  ;;  %644 = vmatpush1.bf16.msra.mxu0 %v1321_v62 }
  0xb1   : > { %v440_v27 = vpop.xlane.xlu0 %439  ;;  %v436_v28 = vpop.xlane.xlu1 %435 }
  0xb2   : > { %v450_v29 = vmul.f32 0.0078125, %v440_v27  ;;  %v448_v30 = vmul.f32 0.0078125, %v436_v28 }
  0xb4   : > { %v1529_v31 = vsub.f32 %v1236_v18, %v450_v29  ;;  %v1531_v32 = vsub.f32 %v1232_v19, %v448_v30 }
  0xb5   : > { %v442_v33 = vpop.xlane.xlu0 %441  ;;  %v438_v34 = vpop.xlane.xlu1 %437 }
  0xb6   : > { %v451_v35 = vmul.f32 0.0078125, %v442_v33  ;;  %v460_v36 = vmul.f32 %v1529_v31, %v1529_v31  ;;  %v449_v37 = vmul.f32 0.0078125, %v438_v34  ;;  %v458_v40 = vmul.f32 %v1531_v32, %v1531_v32 }
  0xb8   : > { %v1535_v38 = vsub.f32 %v1237_v21, %v451_v35  ;;  %467 = vadd.xlane.f32.xlu1 %v460_v36  ;;  %v1537_v39 = vsub.f32 %v1233_v22, %v449_v37  ;;  %v1197_v21 = vld [vmem:[%s1797_s4] ss:$0 sm:$0xff] }
  0xb9   : > { %v446_v41 = vpop.xlane.xlu0 %445 }
  0xba   : > { %v452_v42 = vmul.f32 0.0078125, %v446_v41  ;;  %v461_v43 = vmul.f32 %v1535_v38, %v1535_v38  ;;  %v459_v45 = vmul.f32 %v1537_v39, %v1537_v39 }
  0xbc   : > { %v1543_v44 = vsub.f32 %v434_v23, %v452_v42  ;;  %469 = vadd.xlane.f32.xlu0 %v461_v43  ;;  %463 = vadd.xlane.f32.xlu1 %v458_v40  ;;  %v539_v40 = vlaneseq  ;;  %v537_v42 = vld [vmem:[%s414_s10] sm:$0x3] }
  0xbe   : > { %v462_v46 = vmul.f32 %v1543_v44, %v1543_v44 }
  0xc0   : > { %465 = vadd.xlane.f32.xlu0 %v459_v45  ;;  %v471_v47 = vsel %vm443_vm0, %v462_v46, 0.0 }
  0xc1   : > { %472 = vadd.xlane.f32.xlu1 %v471_v47 }
 0x145   : > { %v468_v63 = vpop.xlane.xlu1 %467 }
 0x146   : > { %v476_v0 = vmul.f32 0.0078125, %v468_v63 }
 0x148   : > { %v481_v1 = vadd.f32 1e-06, %v476_v0 }
 0x149   : > { %v470_v2 = vpop.xlane.xlu0 %469  ;;  %v464_v3 = vpop.xlane.xlu1 %463 }
 0x14a   : > { %1322 = vrsqrt.f32 %v481_v1  ;;  %v477_v4 = vmul.f32 0.0078125, %v470_v2  ;;  %v474_v5 = vmul.f32 0.0078125, %v464_v3 }
 0x14c   : > { %v482_v6 = vadd.f32 1e-06, %v477_v4  ;;  %v479_v7 = vadd.f32 1e-06, %v474_v5 }
 0x14d   : > { %v466_v8 = vpop.xlane.xlu0 %465 }
 0x14e   : > { %1324 = vrsqrt.f32 %v482_v6  ;;  %v475_v9 = vmul.f32 0.0078125, %v466_v8  ;;  %v473_v10 = vpop.xlane.xlu1 %472 }
 0x14f   : > { %1326 = vrsqrt.f32 %v479_v7  ;;  %v478_v11 = vmul.f32 0.0078125, %v473_v10 }
 0x150   : > { %v480_v12 = vadd.f32 1e-06, %v475_v9 }
 0x151   : > { %v483_v13 = vadd.f32 1e-06, %v478_v11 }
 0x152   : > { %1328 = vrsqrt.f32 %v480_v12 }
 0x153   : > { %1330 = vrsqrt.f32 %v483_v13 }
 0x154   : > { %v1323_v14 = vpop.eup %1322 }
 0x155   : > { %v491_v15 = vmul.f32 %v1323_v14, %v1529_v31 }
 0x157   : > { %v503_v20 = vmul.f32 %v1196_v16, %v491_v15 }
 0x158   : > { %v1325_v17 = vpop.eup %1324 }
 0x159   : > { %v1327_v18 = vpop.eup %1326  ;;  %v492_v19 = vmul.f32 %v1325_v17, %v1535_v38  ;;  %v515_v26 = vadd.f32 %v1197_v21, %v503_v20 }
 0x15a   : > { %v489_v22 = vmul.f32 %v1327_v18, %v1531_v32 }
 0x15b   : > { %v504_v23 = vmul.f32 %v1196_v16, %v492_v19 }
 0x15c   : > { %v1329_v24 = vpop.eup %1328  ;;  %v501_v29 = vmul.f32 %v1196_v16, %v489_v22 }
 0x15d   : > { %v1331_v25 = vpop.eup %1330  ;;  %v516_v27 = vadd.f32 %v1197_v21, %v504_v23  ;;  %v490_v28 = vmul.f32 %v1329_v24, %v1537_v39  ;;  %v540_v39 = vshrl.u32 %v539_v40, 7 }
 0x15e   : > { %v493_v30 = vmul.f32 %v1331_v25, %v1543_v44  ;;  %v513_v35 = vadd.f32 %v1197_v21, %v501_v29 }
 0x15f   : > { %v519_v31 = vpack.c.bf16 %v516_v27, %v515_v26  ;;  %v502_v33 = vmul.f32 %v1196_v16, %v490_v28  ;;  %v541_v41 = vsub.s32 0, %v540_v39  ;;  %v545_v43 = vsub.s32 1, %v540_v39 }
 0x160   : > { %v505_v34 = vmul.f32 %v1196_v16, %v493_v30  ;;  %v1413_v30 = vmov -1.0  }
 0x161   : > { %672 = vmatmul.mubr.bf16.vlgmr.msra.gmra.mrb[0].mxu1 %v519_v31  ;;  %v514_v36 = vadd.f32 %v1197_v21, %v502_v33  ;;  %v1579_v44 = vrot.slane %v537_v42, %v541_v41  ;;  %v1581_v45 = vrot.slane %v537_v42, %v545_v43 }
 0x162   : > { %681 = vmatprep.mubr.bf16.mxu1 %v1412_v59  ;;  %v517_v32 = vadd.f32 %v1197_v21, %v505_v34 }
 0x163   : > { %v518_v37 = vpack.c.bf16 %v514_v36, %v513_v35 }
 0x164   : > { %v520_v38 = vpack.c.bf16 %v517_v32, %v517_v32 }
 0x165   : > { %662 = vmatmul.mubr.bf16.vlgmr.msra.gmra.mrb[0].mxu0 %v518_v37 }
 0x169   : > { %682 = vmatmul.mubr.bf16.gmra.mrb[4].mxu1 %v520_v38 }
 0x234   : > { %v673_v46 = vpop.f32.mrb[0].mxu1 }
 0x235   : > { %v674_v47 = vadd.f32 %v673_v46, %v1579_v44  ;;  %v675_v48 = vpop.f32.mrb[1].mxu1 }
 0x236   : > { %v676_v49 = vadd.f32 %v675_v48, %v1581_v45  ;;  %v677_v50 = vpop.f32.mrb[2].mxu1 }
 0x237   : > { %v704_v51 = vmul.f32 0.70710677, %v674_v47  ;;  %v678_v52 = vadd.f32 %v677_v50, %v1579_v44  ;;  %v679_v53 = vpop.f32.mrb[3].mxu1  ;;  %v1600_v18 = vmul.f32 0.5, %v674_v47 }
 0x238   : > { %v705_v54 = vmul.f32 0.70710677, %v676_v49  ;;  %v663_v55 = vpop.f32.mrb[0].mxu0  ;;  %v680_v58 = vadd.f32 %v679_v53, %v1581_v45  ;;  %v1602_v19 = vmul.f32 0.5, %v676_v49 }
 0x239   : > { %v734_v56 = vand.u32 2147483647, %v704_v51  ;;  %v1586_v57 = vmul.f32 0.70710677, %v678_v52  ;;  %v665_v60 = vpop.f32.mrb[1].mxu0  ;;  %v1595_v9 = vadd.f32 %v663_v55, %v1579_v44  ;;  %vm714_vm1 = vcmp.ge.f32.partialorder %v704_v51, 0.0 }
 0x23a   : > { %v735_v59 = vand.u32 2147483647, %v705_v54  ;;  %v667_v62 = vpop.f32.mrb[2].mxu0  ;;  %v1590_v4 = vmul.f32 0.70710677, %v680_v58  ;;  %vm715_vm2 = vcmp.ge.f32.partialorder %v705_v54, 0.0  ;;  %v1608_v22 = vadd.f32 %v665_v60, %v1581_v45 }
 0x23b   : > { %v744_v61 = vmul.f32 0.3275911, %v734_v56  ;;  %v874_v63 = vsub.f32 0.0, %v734_v56  ;;  %v736_v1 = vand.u32 2147483647, %v1586_v57  ;;  %v669_v5 = vpop.f32.mrb[3].mxu0  ;;  %v1612_v26 = vadd.f32 %v667_v62, %v1579_v44 }
 0x23c   : > { %v745_v0 = vmul.f32 0.3275911, %v735_v59  ;;  %v875_v3 = vsub.f32 0.0, %v735_v59  ;;  %v1592_v6 = vpop.f32.mrb[4].mxu1  ;;  %v737_v11 = vand.u32 2147483647, %v1590_v4  ;;  %v1642_v49 = vadd.f32 %v669_v5, %v1581_v45 }
 0x23d   : > { %v754_v2 = vadd.f32 1.0, %v744_v61  ;;  %v746_v8 = vmul.f32 0.3275911, %v736_v1  ;;  %v1597_v10 = vpop.f32.mrb[5].mxu1  ;;  %v884_v13 = vmul.f32 %v874_v63, %v734_v56  ;;  %v1605_v20 = vmul.f32 0.70710677, %v1595_v9 }
 0x23e   : > { %v755_v7 = vadd.f32 1.0, %v745_v0  ;;  %v687_v12 = vpop.f32.mrb[6].mxu1  ;;  %v885_v16 = vmul.f32 %v875_v3, %v735_v59  ;;  %v747_v17 = vmul.f32 0.3275911, %v737_v11  ;;  %v876_v24 = vsub.f32 0.0, %v736_v1 }
 0x23f   : > { %1332 = vrcp.f32 %v754_v2  ;;  %v756_v14 = vadd.f32 1.0, %v746_v8  ;;  %v688_v15 = vpop.f32.mrb[7].mxu1  ;;  %v898_v23 = vmul.f32 1.442695, %v884_v13  ;;  %v730_v25 = vand.u32 2147483647, %v1605_v20 }
 0x240   : > { %1334 = vrcp.f32 %v755_v7  ;;  %v757_v21 = vadd.f32 1.0, %v747_v17  ;;  %v900_v27 = vmul.f32 1.442695, %v885_v16  ;;  %v1614_v28 = vmul.f32 0.5, %v678_v52 }
 0x241   : > { %1336 = vrcp.f32 %v756_v14  ;;  %v877_v29 = vsub.f32 0.0, %v737_v11  ;;  %v1618_v31 = vsel %vm714_vm1, 1.0, %v1413_v30  ;;  %v1620_v33 = vmul.f32 0.5, %v680_v58 }
 0x242   : > { %1338 = vrcp.f32 %v757_v21  ;;  %v740_v34 = vmul.f32 0.3275911, %v730_v25  ;;  %v1623_v35 = vmul.f32 0.70710677, %v1608_v22  ;;  %v1627_v36 = vsel %vm715_vm2, 1.0, %v1413_v30 }
 0x243   : > { %vm716_vm3 = vcmp.ge.f32.partialorder %v1586_v57, 0.0  ;;  %v870_v37 = vsub.f32 0.0, %v730_v25  ;;  %v1631_v32 = vmul.f32 0.70710677, %v1612_v26  ;;  %1340 = vpow2.f32 %v898_v23 }
 0x244   : > { %v886_v38 = vmul.f32 %v876_v24, %v736_v1  ;;  %v750_v40 = vadd.f32 1.0, %v740_v34  ;;  %v731_v39 = vand.u32 2147483647, %v1623_v35  ;;  %1342 = vpow2.f32 %v900_v27 }
 0x245   : > { %vm717_vm4 = vcmp.ge.f32.partialorder %v1590_v4, 0.0  ;;  %v887_v42 = vmul.f32 %v877_v29, %v737_v11  ;;  %v732_v43 = vand.u32 2147483647, %v1631_v32  ;;  %v880_v51 = vmul.f32 %v870_v37, %v730_v25 }
 0x246   : > { %1344 = vrcp.f32 %v750_v40  ;;  %v741_v48 = vmul.f32 0.3275911, %v731_v39  ;;  %v871_v52 = vsub.f32 0.0, %v731_v39  ;;  %v902_v55 = vmul.f32 1.442695, %v886_v38 }
 0x247   : > { %v742_v53 = vmul.f32 0.3275911, %v732_v43  ;;  %v872_v58 = vsub.f32 0.0, %v732_v43  ;;  %v904_v61 = vmul.f32 1.442695, %v887_v42  ;;  %v1659_v15 = vsel %vm716_vm3, 1.0, %v1413_v30 }
 0x248   : > { %v751_v56 = vadd.f32 1.0, %v741_v48  ;;  %v881_v62 = vmul.f32 %v871_v52, %v731_v39  ;;  %v1650_v2 = vmul.f32 0.70710677, %v1642_v49  ;;  %v890_v7 = vmul.f32 1.442695, %v880_v51 }
 0x249   : > { %v1634_v41 = vpop.eup %1332  ;;  %v752_v63 = vadd.f32 1.0, %v742_v53  ;;  %v882_v8 = vmul.f32 %v872_v58, %v732_v43  ;;  %v1668_v34 = vsel %vm717_vm4, 1.0, %v1413_v30  ;;  %v1676_v48 = vadd.f32 %v1592_v6, %v1579_v44 }
 0x24a   : > { %v1638_v46 = vpop.eup %1334  ;;  %v784_v47 = vmul.f32 1.0614054, %v1634_v41  ;;  %1346 = vrcp.f32 %v751_v56  ;;  %v892_v16 = vmul.f32 1.442695, %v881_v62  ;;  %v733_v25 = vand.u32 2147483647, %v1650_v2 }
 0x24b   : > { %v785_v50 = vmul.f32 1.0614054, %v1638_v46  ;;  %v1645_v59 = vpop.eup %1336  ;;  %1348 = vrcp.f32 %v752_v63  ;;  %v894_v57 = vmul.f32 1.442695, %v882_v8  ;;  %vm710_vm5 = vcmp.ge.f32.partialorder %v1605_v20, 0.0 }
 0x24c   : > { %v794_v54 = vadd.f32 -1.4531521, %v784_v47  ;;  %v786_v1 = vmul.f32 1.0614054, %v1645_v59  ;;  %v1652_v3 = vpop.eup %1338  ;;  %1350 = vpow2.f32 %v902_v55  ;;  %v743_v42 = vmul.f32 0.3275911, %v733_v25 }
 0x24d   : > { %v795_v60 = vadd.f32 -1.4531521, %v785_v50  ;;  %v787_v13 = vmul.f32 1.0614054, %v1652_v3  ;;  %1352 = vpow2.f32 %v904_v61  ;;  %v1341_v17 = vpop.eup %1340  ;;  %v1683_v55 = vadd.f32 %v1597_v10, %v1581_v45 }
 0x24e   : > { %v804_v0 = vmul.f32 %v1634_v41, %v794_v54  ;;  %v796_v12 = vadd.f32 -1.4531521, %v786_v1  ;;  %v1343_v27 = vpop.eup %1342  ;;  %1354 = vpow2.f32 %v890_v7  ;;  %v753_v52 = vadd.f32 1.0, %v743_v42 }
 0x24f   : > { %v805_v5 = vmul.f32 %v1638_v46, %v795_v60  ;;  %v797_v24 = vadd.f32 -1.4531521, %v787_v13  ;;  %1356 = vpow2.f32 %v892_v16  ;;  %vm711_vm6 = vcmp.ge.f32.partialorder %v1623_v35, 0.0 }
 0x250   : > { %v814_v11 = vadd.f32 1.4214138, %v804_v0  ;;  %v806_v23 = vmul.f32 %v1645_v59, %v796_v12  ;;  %v1670_v37 = vpop.eup %1344  ;;  %1358 = vpow2.f32 %v894_v57  ;;  %v1693_v0 = vmul.f32 0.70710677, %v1676_v48 }
 0x251   : > { %v815_v14 = vadd.f32 1.4214138, %v805_v5  ;;  %v807_v39 = vmul.f32 %v1652_v3, %v797_v24  ;;  %v780_v47 = vmul.f32 1.0614054, %v1670_v37  ;;  %1360 = vrcp.f32 %v753_v52 }
 0x252   : > { %v824_v21 = vmul.f32 %v1634_v41, %v814_v11  ;;  %v816_v40 = vadd.f32 1.4214138, %v806_v23  ;;  %v721_v20 = vsel %vm711_vm6, 1.0, %v1413_v30  ;;  %vm712_vm7 = vcmp.ge.f32.partialorder %v1631_v32, 0.0 }
 0x253   : > { %v825_v29 = vmul.f32 %v1638_v46, %v815_v14  ;;  %v817_v51 = vadd.f32 1.4214138, %v807_v39  ;;  %v790_v54 = vadd.f32 -1.4531521, %v780_v47  ;;  %v873_v14 = vsub.f32 0.0, %v733_v25 }
 0x254   : > { %v834_v38 = vadd.f32 -0.28449672, %v824_v21  ;;  %v826_v50 = vmul.f32 %v1645_v59, %v816_v40  ;;  %v1685_v56 = vpop.eup %1346  ;;  %v1703_v40 = vand.u32 2147483647, %v1693_v0  ;;  %vm713_vm8 = vcmp.ge.f32.partialorder %v1650_v2, 0.0 }
 0x255   : > { %v835_v43 = vadd.f32 -0.28449672, %v825_v29  ;;  %v827_v44 = vmul.f32 %v1652_v3, %v817_v51  ;;  %v1688_v6 = vpop.eup %1348  ;;  %v800_v62 = vmul.f32 %v1670_v37, %v790_v54  ;;  %v781_v63 = vmul.f32 1.0614054, %v1685_v56 }
 0x256   : > { %v844_v4 = vmul.f32 %v1634_v41, %v834_v38  ;;  %v836_v60 = vadd.f32 -0.28449672, %v826_v50  ;;  %v1351_v1 = vpop.eup %1350  ;;  %v782_v7 = vmul.f32 1.0614054, %v1688_v6  ;;  %v883_v50 = vmul.f32 %v873_v14, %v733_v25 }
 0x257   : > { %v845_v53 = vmul.f32 %v1638_v46, %v835_v43  ;;  %v837_v5 = vadd.f32 -0.28449672, %v827_v44  ;;  %v1353_v8 = vpop.eup %1352  ;;  %v810_v12 = vadd.f32 1.4214138, %v800_v62  ;;  %v791_v13 = vadd.f32 -1.4531521, %v781_v63 }
 0x258   : > { %v854_v58 = vadd.f32 0.2548296, %v844_v4  ;;  %v846_v10 = vmul.f32 %v1645_v59, %v836_v60  ;;  %v792_v24 = vadd.f32 -1.4531521, %v782_v7  ;;  %v1355_v29 = vpop.eup %1354  ;;  %vm718_vm9 = vcmp.ge.f32.partialorder %v1693_v0, 0.0 }
 0x259   : > { %v855_v61 = vadd.f32 0.2548296, %v845_v53  ;;  %v847_v23 = vmul.f32 %v1652_v3, %v837_v5  ;;  %v801_v38 = vmul.f32 %v1685_v56, %v791_v13 }
 0x25a   : > { %v864_v45 = vmul.f32 %v1634_v41, %v854_v58  ;;  %v856_v21 = vadd.f32 0.2548296, %v846_v10  ;;  %v820_v41 = vmul.f32 %v1670_v37, %v810_v12  ;;  %v802_v43 = vmul.f32 %v1688_v6, %v792_v24 }
 0x25b   : > { %v865_v11 = vmul.f32 %v1638_v46, %v855_v61  ;;  %v857_v42 = vadd.f32 0.2548296, %v847_v23  ;;  %v748_v61 = vmul.f32 0.3275911, %v1703_v40 }
 0x25c   : > { %v914_v16 = vmul.f32 %v1341_v17, %v864_v45  ;;  %v866_v46 = vmul.f32 %v1645_v59, %v856_v21  ;;  %v1357_v17 = vpop.eup %1356  ;;  %v830_v4 = vadd.f32 -0.28449672, %v820_v41  ;;  %v812_v54 = vadd.f32 1.4214138, %v802_v43 }
 0x25d   : > { %v915_v57 = vmul.f32 %v1343_v27, %v865_v11  ;;  %v811_v27 = vadd.f32 1.4214138, %v801_v38  ;;  %v867_v53 = vmul.f32 %v1652_v3, %v857_v42  ;;  %v1359_v58 = vpop.eup %1358  ;;  %v758_v5 = vadd.f32 1.0, %v748_v61 }
 0x25e   : > { %v924_v39 = vsub.f32 1.0, %v914_v16  ;;  %v916_v52 = vmul.f32 %v1351_v1, %v866_v46  ;;  %v840_v60 = vmul.f32 %v1670_v37, %v830_v4  ;;  %v1714_v62 = vpop.eup %1360  ;;  %v822_v1 = vmul.f32 %v1688_v6, %v812_v54 }
 0x25f   : > { %v925_v47 = vsub.f32 1.0, %v915_v57  ;;  %v821_v44 = vmul.f32 %v1685_v56, %v811_v27  ;;  %1362 = vrcp.f32 %v758_v5  ;;  %v896_v46 = vmul.f32 1.442695, %v883_v50 }
 0x260   : > { %v934_v51 = vmul.f32 %v924_v39, %v1618_v31  ;;  %v926_v25 = vsub.f32 1.0, %v916_v52  ;;  %v917_v31 = vmul.f32 %v1353_v8, %v867_v53  ;;  %v850_v45 = vadd.f32 0.2548296, %v840_v60 }
 0x261   : > { %v935_v59 = vmul.f32 %v925_v47, %v1627_v36  ;;  %v831_v10 = vadd.f32 -0.28449672, %v821_v44  ;;  %v832_v12 = vadd.f32 -0.28449672, %v822_v1  ;;  %v783_v8 = vmul.f32 1.0614054, %v1714_v62 }
 0x262   : > { %v944_v63 = vadd.f32 1.0, %v934_v51  ;;  %v936_v7 = vmul.f32 %v926_v25, %v1659_v15  ;;  %v927_v11 = vsub.f32 1.0, %v917_v31  ;;  %v860_v14 = vmul.f32 %v1670_v37, %v850_v45 }
 0x263   : > { %v945_v3 = vadd.f32 1.0, %v935_v59  ;;  %v841_v16 = vmul.f32 %v1685_v56, %v831_v10  ;;  %v842_v24 = vmul.f32 %v1688_v6, %v832_v12  ;;  %v793_v15 = vadd.f32 -1.4531521, %v783_v8 }
 0x264   : > { %v954_v36 = vmul.f32 %v944_v63, %v1600_v18  ;;  %v946_v21 = vadd.f32 1.0, %v936_v7  ;;  %v937_v23 = vmul.f32 %v927_v11, %v1668_v34  ;;  %v910_v18 = vmul.f32 %v1355_v29, %v860_v14 }
 0x265   : > { %v955_v13 = vmul.f32 %v945_v3, %v1602_v19  ;;  %v851_v41 = vadd.f32 0.2548296, %v841_v16  ;;  %v852_v19 = vadd.f32 0.2548296, %v842_v24  ;;  %v803_v34 = vmul.f32 %v1714_v62, %v793_v15 }
 0x266   : > { %v956_v38 = vmul.f32 %v946_v21, %v1614_v28  ;;  %v947_v39 = vadd.f32 1.0, %v937_v23  ;;  %v920_v37 = vsub.f32 1.0, %v910_v18  ;;  %v720_v29 = vsel %vm710_vm5, 1.0, %v1413_v30 }
 0x267   : > { %v1226_v57 = vpack.c.bf16 %v955_v13, %v954_v36  ;;  %v861_v42 = vmul.f32 %v1685_v56, %v851_v41  ;;  %v862_v28 = vmul.f32 %v1688_v6, %v852_v19  ;;  %v1739_v47 = vmul.f32 0.70710677, %v1683_v55 }
 0x268   : > { %v957_v43 = vmul.f32 %v947_v39, %v1620_v33  ;;  %v930_v4 = vmul.f32 %v920_v37, %v720_v29  ;;  %v813_v50 = vadd.f32 1.4214138, %v803_v34  ;;  %1364 = vpow2.f32 %v896_v46 }
 0x269   : > { %994 = vst [vmem:[%s1728_s18 + $0x10] sm:$0xff] %v1226_v57  ;;  %v911_v27 = vmul.f32 %v1357_v17, %v861_v42  ;;  %v912_v51 = vmul.f32 %v1359_v58, %v862_v28  ;;  %v739_v6 = vand.u32 2147483647, %v1739_v47  ;;  %v690_v54 = vmul.f32 0.5, %v1595_v9  ;;  %v1363_v17 = vpop.eup %1362 }
 0x26a   : > { %v1227_v56 = vpack.c.bf16 %v957_v43, %v956_v38  ;;  %v940_v52 = vadd.f32 1.0, %v930_v4  ;;  %v823_v33 = vmul.f32 %v1714_v62, %v813_v50  ;;  %v691_v59 = vmul.f32 0.5, %v1608_v22 }
 0x26b   : > { %v921_v53 = vsub.f32 1.0, %v911_v27  ;;  %v922_v58 = vsub.f32 1.0, %v912_v51  ;;  %v878_v44 = vsub.f32 0.0, %v1703_v40  ;;  %v749_v61 = vmul.f32 0.3275911, %v739_v6 }
 0x26c   : > { %995 = vst [vmem:[%s1728_s18 + $0x18] sm:$0xff] %v1227_v56  ;;  %v833_v35 = vadd.f32 -0.28449672, %v823_v33  ;;  %v950_v63 = vmul.f32 %v940_v52, %v690_v54  ;;  %v788_v1 = vmul.f32 1.0614054, %v1363_v17  ;;  %v722_v22 = vsel %vm712_vm7, 1.0, %v1413_v30 }
 0x26d   : > { %v931_v60 = vmul.f32 %v921_v53, %v721_v20  ;;  %v759_v3 = vadd.f32 1.0, %v749_v61  ;;  %v888_v5 = vmul.f32 %v878_v44, %v1703_v40  ;;  %v932_v36 = vmul.f32 %v922_v58, %v722_v22 }
 0x26e   : > { %v843_v31 = vmul.f32 %v1714_v62, %v833_v35  ;;  %v798_v10 = vadd.f32 -1.4531521, %v788_v1  ;;  %v723_v24 = vsel %vm713_vm8, 1.0, %v1413_v30  ;;  %v879_v57 = vsub.f32 0.0, %v739_v6 }
 0x26f   : > { %v941_v25 = vadd.f32 1.0, %v931_v60  ;;  %1366 = vrcp.f32 %v759_v3  ;;  %v906_v16 = vmul.f32 1.442695, %v888_v5  ;;  %v942_v8 = vadd.f32 1.0, %v932_v36 }
 0x270   : > { %v853_v9 = vadd.f32 0.2548296, %v843_v31  ;;  %v808_v11 = vmul.f32 %v1363_v17, %v798_v10  ;;  %v692_v40 = vmul.f32 0.5, %v1612_v26  ;;  %v693_v15 = vmul.f32 0.5, %v1642_v49 }
 0x271   : > { %v951_v45 = vmul.f32 %v941_v25, %v691_v59  ;;  %1368 = vpow2.f32 %v906_v16  ;;  %v889_v19 = vmul.f32 %v879_v57, %v739_v6  ;;  %v728_v33 = vsel %vm718_vm9, 1.0, %v1413_v30 }
 0x272   : > { %v863_v7 = vmul.f32 %v1714_v62, %v853_v9  ;;  %v1365_v12 = vpop.eup %1364  ;;  %v818_v14 = vadd.f32 1.4214138, %v808_v11  ;;  %v952_v62 = vmul.f32 %v942_v8, %v692_v40  ;;  %vm719_vm10 = vcmp.ge.f32.partialorder %v1739_v47, 0.0  ;;  %v1049_v47 = vld [vmem:[%s1728_s18 + $0x10] sm:$0xff] (%p1479_p6) }
 0x273   : > { %v1224_v32 = vpack.c.bf16 %v951_v45, %v950_v63  ;;  %v908_v29 = vmul.f32 1.442695, %v889_v19  ;;  %v698_v58 = vmul.f32 0.5, %v1676_v48  ;;  %v699_v61 = vmul.f32 0.5, %v1683_v55  ;;  %v1051_v55 = vld [vmem:[%s1728_s18 + $0x18] sm:$0xff] (%p1479_p6)  ;;  %1050 = vst [vmem:[%s1009_s15 + $0x20] sm:$0xff] (%p1479_p6), %v1049_v47 }
 0x274   : > { %v913_v13 = vmul.f32 %v1365_v12, %v863_v7  ;;  %v828_v23 = vmul.f32 %v1363_v17, %v818_v14  ;;  %1052 = vst [vmem:[%s1009_s15 + $0x30] sm:$0xff] (%p1479_p6), %v1051_v55 }
 0x275   : > { %992 = vst [vmem:[%s1728_s18] sm:$0xff] %v1224_v32  ;;  %1370 = vpow2.f32 %v908_v29 }
 0x276   : > { %v923_v21 = vsub.f32 1.0, %v913_v13  ;;  %v838_v41 = vadd.f32 -0.28449672, %v828_v23 }
 0x278   : > { %v933_v18 = vmul.f32 %v923_v21, %v723_v24  ;;  %v848_v2 = vmul.f32 %v1363_v17, %v838_v41 }
 0x279   : > { %v1367_v39 = vpop.eup %1366 }
 0x27a   : > { %v943_v38 = vadd.f32 1.0, %v933_v18  ;;  %v858_v37 = vadd.f32 0.2548296, %v848_v2  ;;  %v789_v42 = vmul.f32 1.0614054, %v1367_v39 }
 0x27b   : > { %v1369_v27 = vpop.eup %1368 }
 0x27c   : > { %v953_v46 = vmul.f32 %v943_v38, %v693_v15  ;;  %v799_v43 = vadd.f32 -1.4531521, %v789_v42  ;;  %v868_v28 = vmul.f32 %v1363_v17, %v858_v37  ;;  %v729_v17 = vsel %vm719_vm10, 1.0, %v1413_v30  ;;  %v1045_v30 = vld [vmem:[%s1728_s18] sm:$0xff] (%p1479_p6) }
 0x27d   : > { %1046 = vst [vmem:[%s1009_s15] sm:$0xff] (%p1479_p6), %v1045_v30 }
 0x27e   : > { %v1225_v34 = vpack.c.bf16 %v953_v46, %v952_v62  ;;  %v809_v26 = vmul.f32 %v1367_v39, %v799_v43  ;;  %v918_v50 = vmul.f32 %v1369_v27, %v868_v28 }
 0x27f   : > { %v1371_v54 = vpop.eup %1370 }
 0x280   : > { %993 = vst [vmem:[%s1728_s18 + $0x8] sm:$0xff] %v1225_v34  ;;  %v819_v4 = vadd.f32 1.4214138, %v809_v26  ;;  %v928_v49 = vsub.f32 1.0, %v918_v50 }
 0x282   : > { %v829_v56 = vmul.f32 %v1367_v39, %v819_v4  ;;  %v938_v20 = vmul.f32 %v928_v49, %v728_v33 }
 0x284   : > { %v839_v51 = vadd.f32 -0.28449672, %v829_v56  ;;  %v948_v60 = vadd.f32 1.0, %v938_v20 }
 0x286   : > { %v849_v52 = vmul.f32 %v1367_v39, %v839_v51  ;;  %v958_v0 = vmul.f32 %v948_v60, %v698_v58 }
 0x287   : > { %v1047_v48 = vld [vmem:[%s1728_s18 + $0x8] sm:$0xff] (%p1479_p6) }
 0x288   : > { %v859_v53 = vadd.f32 0.2548296, %v849_v52  ;;  %1048 = vst [vmem:[%s1009_s15 + $0x10] sm:$0xff] (%p1479_p6), %v1047_v48 }
 0x28a   : > { %v869_v6 = vmul.f32 %v1367_v39, %v859_v53 }
 0x28c   : > { %v919_v59 = vmul.f32 %v1371_v54, %v869_v6 }
 0x28e   : > { %v929_v35 = vsub.f32 1.0, %v919_v59 }
 0x290   : > { %v939_v44 = vmul.f32 %v929_v35, %v729_v17 }
 0x292   : > { %v949_v63 = vadd.f32 1.0, %v939_v44  ;;  %1003 = sbr.rel (!%p1479_p6) target bundleno = 673 (0x2a1), region = 82 }
 0x294   : > { %v959_v25 = vmul.f32 %v949_v63, %v699_v61 }
 0x296   : > { %v1228_v31 = vpack.c.bf16 %v959_v25, %v958_v0 }
 0x298   : > { %996 = vst [vmem:[%s1728_s18 + $0x20] sm:$0x11] %v1228_v31 }
 0x29f   : > { %v1053_v1 = vld [vmem:[%s1728_s18 + $0x20] sm:$0xff] }
 0x2a0   : > { %1054 = vst [vmem:[%s1009_s15 + $0x40] sm:$0xff] %v1053_v1 }
 0x2a1 PF: > { %s15_s22 = sadd.s32 1, %s1410_s22   ;;  %s1800_s18 = smov %s1398_s19 }
 0x2a2   : > { %p12_p12 = scmp.ge.s32.totalorder %s15_s22, 4   ;;  %s1801_s19 = smov %s1484_s28 }
 0x2a3   : > { %s1802_s20 = smov %s1406_s21  ;;  %s1803_s21 = smov %s1805_s23 }
 0x2a4   :  { %14 = sbr.rel (!%p12_p12) target bundleno = 3 (0x3), region = 163 }

// kernel: pre_vit_cross_attn_forward.32
= control target key start
LH: loop header
LB: loop body
LE: loop exit
PB: predicated region body
PF: predicated region fallthrough
CT: control target
= control target key end

     0   :  { %s304_s1 = inlined_call_operand.vmem [shape: bf16[128,128], index: 1, kind: input, shape index: {}]   ;;  %s305_s0 = inlined_call_operand.vmem [shape: bf16[32,128], index: 0, kind: input, shape index: {}]   ;;  %s306_s2 = inlined_call_operand.vmem [shape: f32[1,128], index: 2, kind: input, shape index: {}]   ;;  %s307_s3 = inlined_call_operand.vmem [shape: bf16[32,128], index: 3, kind: output, shape index: {}]  }
   0x1   :  { %v235_v0 = vld [vmem:[%s304_s1] sm:$0xff]   ;;  %v236_v1 = vld [vmem:[%s304_s1 + $0x8] sm:$0xff]   ;;  %v237_v2 = vld [vmem:[%s304_s1 + $0x10] sm:$0xff]  }
   0x2   :  { %215 = vmatprep.subr.bf16.mxu0 %v235_v0  ;;  %v238_v3 = vld [vmem:[%s304_s1 + $0x18] sm:$0xff]   ;;  %v243_v4 = vld [vmem:[%s305_s0] sm:$0xff]   ;;  %v240_v6 = vld [vmem:[%s304_s1 + $0x28] sm:$0xff]  }
   0x3   :  { %216 = vmatpush3.bf16.msra.mxu0 %v235_v0  ;;  %231 = vmatprep.mubr.bf16.mxu0 %v243_v4  ;;  %v239_v5 = vld [vmem:[%s304_s1 + $0x20] sm:$0xff]   ;;  %v241_v7 = vld [vmem:[%s304_s1 + $0x30] sm:$0xff]   ;;  %v242_v8 = vld [vmem:[%s304_s1 + $0x38] sm:$0xff]  }
   0x4   :  { %217 = vmatprep.subr.bf16.mxu0 %v236_v1  ;;  %v244_v9 = vld [vmem:[%s305_s0 + $0x8] sm:$0xff]   ;;  %v175_v11 = vld [vmem:[%s306_s2] ss:$0 sm:$0xff] }
   0x7   :  { %218 = vmatpush3.bf16.msra.mxu0 %v236_v1 }
   0x8   :  { %219 = vmatprep.subr.bf16.mxu0 %v237_v2 }
   0xb   :  { %220 = vmatpush3.bf16.msra.mxu0 %v237_v2 }
   0xc   :  { %221 = vmatprep.subr.bf16.mxu0 %v238_v3 }
   0xf   :  { %222 = vmatpush3.bf16.msra.mxu0 %v238_v3 }
  0x10   :  { %223 = vmatprep.subr.bf16.mxu0 %v239_v5 }
  0x13   :  { %224 = vmatpush3.bf16.msra.mxu0 %v239_v5 }
  0x14   :  { %225 = vmatprep.subr.bf16.mxu0 %v240_v6 }
  0x17   :  { %226 = vmatpush3.bf16.msra.mxu0 %v240_v6 }
  0x18   :  { %227 = vmatprep.subr.bf16.mxu0 %v241_v7 }
  0x1b   :  { %228 = vmatpush3.bf16.msra.mxu0 %v241_v7 }
  0x1c   :  { %229 = vmatprep.subr.bf16.mxu0 %v242_v8 }
  0x1f   :  { %230 = vmatpush3.bf16.msra.mxu0 %v242_v8 }
  0x22   :  { %232 = vmatmul.mubr.bf16.vlgmr.msra.gmra.mrb[0].mxu0 %v244_v9 }
  0xf5   :  { %v233_v10 = vpop.f32.mrb[0].mxu0 }
  0xf6   :  { %v136_v12 = vpop.f32.mrb[1].mxu0  ;;  %v145_v14 = vadd.f32 %v233_v10, %v175_v11 }
  0xf7   :  { %v234_v13 = vpop.f32.mrb[2].mxu0  ;;  %v137_v17 = vadd.f32 %v175_v11, %v136_v12 }
  0xf8   :  { %v148_v15 = vadd.f32 %v234_v13, %v175_v11  ;;  %v139_v16 = vpop.f32.mrb[3].mxu0 }
  0xf9   :  { %v140_v18 = vadd.f32 %v175_v11, %v139_v16 }
  0xfa   :  { %v202_v19 = vpack.c.bf16 %v148_v15, %v145_v14 }
  0xfb   :  { %v197_v20 = vpack.c.bf16 %v140_v18, %v137_v17 }
  0xfc   :  { %204 = vst [vmem:[%s307_s3 + $0x8] sm:$0xff] %v202_v19  }
  0xfd   :  { %198 = vst [vmem:[%s307_s3] sm:$0xff] %v197_v20  }

// kernel: pre_vit_cross_attn_forward.34
= control target key start
LH: loop header
LB: loop body
LE: loop exit
PB: predicated region body
PF: predicated region fallthrough
CT: control target
= control target key end

     0   :  { %s844_s12 = smov 0   ;;  %s846_s13 = smov 0   ;;  %s949_s0 = inlined_call_operand.vmem [shape: bf16[32,128], index: 0, kind: input, shape index: {}]   ;;  %s950_s1 = inlined_call_operand.vmem [shape: bf16[128,256], index: 1, kind: input, shape index: {}]   ;;  %s951_s2 = inlined_call_operand.vmem [shape: f32[1,256], index: 2, kind: input, shape index: {}]   ;;  %s952_s3 = inlined_call_operand.vmem [shape: bf16[32,256], index: 3, kind: output, shape index: {}]  }
   0x1   :  { %s848_s14 = smov 0   ;;  %s850_s15 = smov 0  }
   0x2   :  { %s852_s16 = smov 0  }
   0x3 LB: > { %s28_s17 = sadd.s32 1, %s818_s15  ;;  %s660_s18 = sadd.s32 4294967295, %s822_s16   ;;  %s822_s16 = sphi %s852_s16, %s13_s16   ;;  %s818_s15 = sphi %s850_s15, %s957_s15   ;;  %s814_s14 = sphi %s848_s14, %s956_s14   ;;  %s810_s13 = sphi %s846_s13, %s955_s13   ;;  %s806_s12 = sphi %s844_s12, %s954_s12  }
   0x4   : > { %p30_p0 = scmp.ge.s32.totalorder %s28_s17, 2  ;;  %p76_p1 = scmp.ne.s32.totalorder %s810_s13, %s806_s12 }
   0x5   : > { %p77_p2 = scmp.eq.s32.totalorder %s822_s16, 0  ;;  %p134_p4 = scmp.eq.s32.totalorder %s660_s18, 1 }
   0x6   : > { %s959_s17 = smov (%p30_p0, %s28_s17), 0  ;;  %s69_s20 = sadd.s32 1, %s810_s13 }
   0x7   : > { %p78_p3 = por %p77_p2, %p76_p1  ;;  %s65_s19 = ssub.s32 %s818_s15, %s959_s17 }
   0x8   : > { %p67_p5 = scmp.eq.s32.totalorder %s65_s19, 0  ;;  %p879_p6 = por %p134_p4, %p76_p1 }
   0x9   : > { %p664_p7 = scmp.ge.s32.totalorder %s822_s16, 2 }
   0xa   : > { %s884_s22 = scalar_select %p67_p5, %s810_s13, %s69_s20  }
   0xb   : > { %168 = sbr.rel (%p664_p7) target bundleno = 32 (0x20), region = 20 }
  0x12   : > { %171 = sbr.rel (!%p78_p3) target bundleno = 32 (0x20), region = 24  ;;  %s173_s23 = sand.u32 (%p78_p3), 1, %s810_s13  }
  0x13   : > { %s666_s24 = sshll.u32 (%p78_p3), %s818_s15, 2  ;;  %s665_s25 = sshll.u32 (%p78_p3), %s173_s23, 6 }
  0x14   : > { %s892_s28 = scalar_lea.vmem (%p78_p3), %s950_s1, %s666_s24  ;;  %s175_s29 = scalar_lea.vmem (%p78_p3), [#allocation2], %s665_s25 }
  0x15   : > { %v196_v0 = vld [vmem:[%s892_s28] sm:$0xf] (%p78_p3)  ;;  %v198_v1 = vld [vmem:[%s892_s28 + $0x8] sm:$0xf] (%p78_p3)  ;;  %v200_v2 = vld [vmem:[%s892_s28 + $0x10] sm:$0xf] (%p78_p3) }
  0x16   : > { %197 = vst [vmem:[%s175_s29] sm:$0xf] (%p78_p3), %v196_v0  ;;  %199 = vst [vmem:[%s175_s29 + $0x4] sm:$0xf] (%p78_p3), %v198_v1  ;;  %v202_v3 = vld [vmem:[%s892_s28 + $0x18] sm:$0xf] (%p78_p3) }
  0x17   : > { %v204_v4 = vld [vmem:[%s892_s28 + $0x20] sm:$0xf] (%p78_p3)  ;;  %201 = vst [vmem:[%s175_s29 + $0x8] sm:$0xf] (%p78_p3), %v200_v2  ;;  %203 = vst [vmem:[%s175_s29 + $0xc] sm:$0xf] (%p78_p3), %v202_v3 }
  0x18   : > { %205 = vst [vmem:[%s175_s29 + $0x10] sm:$0xf] (%p78_p3), %v204_v4  ;;  %v206_v5 = vld [vmem:[%s892_s28 + $0x28] sm:$0xf] (%p78_p3)  ;;  %v208_v6 = vld [vmem:[%s892_s28 + $0x30] sm:$0xf] (%p78_p3) }
  0x19   : > { %v210_v7 = vld [vmem:[%s892_s28 + $0x38] sm:$0xf]  ;;  %207 = vst [vmem:[%s175_s29 + $0x14] sm:$0xf] %v206_v5  ;;  %209 = vst [vmem:[%s175_s29 + $0x18] sm:$0xf] %v208_v6 }
  0x1a   : > { %211 = vst [vmem:[%s175_s29 + $0x1c] sm:$0xf] %v210_v7  ;;  %v212_v8 = vld [vmem:[%s892_s28 + $0x40] sm:$0xf]  ;;  %v214_v9 = vld [vmem:[%s892_s28 + $0x48] sm:$0xf] }
  0x1b   : > { %v216_v10 = vld [vmem:[%s892_s28 + $0x50] sm:$0xf]  ;;  %213 = vst [vmem:[%s175_s29 + $0x20] sm:$0xf] %v212_v8  ;;  %215 = vst [vmem:[%s175_s29 + $0x24] sm:$0xf] %v214_v9 }
  0x1c   : > { %217 = vst [vmem:[%s175_s29 + $0x28] sm:$0xf] %v216_v10  ;;  %v218_v11 = vld [vmem:[%s892_s28 + $0x58] sm:$0xf]  ;;  %v220_v12 = vld [vmem:[%s892_s28 + $0x60] sm:$0xf] }
  0x1d   : > { %v222_v13 = vld [vmem:[%s892_s28 + $0x68] sm:$0xf]  ;;  %219 = vst [vmem:[%s175_s29 + $0x2c] sm:$0xf] %v218_v11  ;;  %221 = vst [vmem:[%s175_s29 + $0x30] sm:$0xf] %v220_v12 }
  0x1e   : > { %223 = vst [vmem:[%s175_s29 + $0x34] sm:$0xf] %v222_v13  ;;  %v224_v14 = vld [vmem:[%s892_s28 + $0x70] sm:$0xf]  ;;  %v226_v15 = vld [vmem:[%s892_s28 + $0x78] sm:$0xf] }
  0x1f   : > { %225 = vst [vmem:[%s175_s29 + $0x38] sm:$0xf] %v224_v14  ;;  %227 = vst [vmem:[%s175_s29 + $0x3c] sm:$0xf] %v226_v15 }
  0x20 PF: > { %p667_p8 = scmp.ge.s32.totalorder %s822_s16, 1  ;;  %p287_p9 = scmp.lt.s32.totalorder %s822_s16, 3 }
  0x22   : > { %p288_p10 = pnand %p667_p8, %p287_p9 }
  0x23   : > { %s294_s30 = sand.u32 (!%p288_p10), 1, %s806_s12   ;;  %v782_v16 = vld [vmem:[%s949_s0] sm:$0xff] (!%p288_p10)   ;;  %v783_v25 = vld [vmem:[%s949_s0 + $0x8] sm:$0xff] (!%p288_p10)   ;;  %p337_p11 = scmp.lt.s32.totalorder (!%p288_p10), %s814_s14, 1 }
  0x24   : > { %291 = sbr.rel (%p288_p10) target bundleno = 300 (0x12c), region = 69  ;;  %s668_s6 = sshll.u32 (!%p288_p10), %s294_s30, 6  ;;  %730 = vmatprep.mubr.bf16.mxu0 (!%p288_p10), %v782_v16 }
  0x25   : > { %s296_s7 = scalar_lea.vmem (!%p288_p10), [#allocation2], %s668_s6  ;;  %s669_s20 = sshll.u32 (!%p288_p10), %s294_s30, 4 }
  0x26   : > { %v774_v17 = vld [vmem:[%s296_s7] sm:$0xff] (!%p288_p10)   ;;  %v775_v18 = vld [vmem:[%s296_s7 + $0x8] sm:$0xff] (!%p288_p10)   ;;  %v776_v19 = vld [vmem:[%s296_s7 + $0x10] sm:$0xff] (!%p288_p10)   ;;  %s326_s23 = scalar_lea.vmem (!%p288_p10), [#allocation3], %s669_s20 }
  0x27   : > { %714 = vmatprep.subr.bf16.mxu0 (!%p288_p10), %v774_v17  ;;  %v777_v20 = vld [vmem:[%s296_s7 + $0x18] sm:$0xff] (!%p288_p10)   ;;  %v778_v21 = vld [vmem:[%s296_s7 + $0x20] sm:$0xff] (!%p288_p10)   ;;  %v779_v22 = vld [vmem:[%s296_s7 + $0x28] sm:$0xff] (!%p288_p10)  }
  0x28   : > { %715 = vmatpush3.bf16.msra.mxu0 (!%p288_p10), %v774_v17  ;;  %v780_v23 = vld [vmem:[%s296_s7 + $0x30] sm:$0xff] (!%p288_p10)   ;;  %v781_v24 = vld [vmem:[%s296_s7 + $0x38] sm:$0xff] (!%p288_p10)  }
  0x29   : > { %716 = vmatprep.subr.bf16.mxu0 (!%p288_p10), %v775_v18 }
  0x2b   : > { %s338_s10 = scalar_select %p337_p11, %s814_s14, 1 }
  0x2c   : > { %717 = vmatpush3.bf16.msra.mxu0 %v775_v18  ;;  %s686_s24 = sshll.u32 (%p879_p6), %s814_s14, 2 }
  0x2d   : > { %718 = vmatprep.subr.bf16.mxu0 %v776_v19  ;;  %s339_s19 = scalar_lea.vmem %s951_s2, %s338_s10  ;;  %s509_s26 = scalar_lea.vmem (%p879_p6), %s952_s3, %s686_s24 }
  0x2e   : > { %v670_v27 = vld [vmem:[%s339_s19] ss:$0 sm:$0xff] }
  0x30   : > { %719 = vmatpush3.bf16.msra.mxu0 %v776_v19 }
  0x31   : > { %720 = vmatprep.subr.bf16.mxu0 %v777_v20 }
  0x34   : > { %721 = vmatpush3.bf16.msra.mxu0 %v777_v20 }
  0x35   : > { %722 = vmatprep.subr.bf16.mxu0 %v778_v21 }
  0x38   : > { %723 = vmatpush3.bf16.msra.mxu0 %v778_v21 }
  0x39   : > { %724 = vmatprep.subr.bf16.mxu0 %v779_v22 }
  0x3c   : > { %725 = vmatpush3.bf16.msra.mxu0 %v779_v22 }
  0x3d   : > { %726 = vmatprep.subr.bf16.mxu0 %v780_v23 }
  0x40   : > { %727 = vmatpush3.bf16.msra.mxu0 %v780_v23 }
  0x41   : > { %728 = vmatprep.subr.bf16.mxu0 %v781_v24 }
  0x44   : > { %729 = vmatpush3.bf16.msra.mxu0 %v781_v24 }
  0x47   : > { %731 = vmatmul.mubr.bf16.vlgmr.msra.gmra.mrb[0].mxu0 %v783_v25 }
 0x11a   : > { %v732_v26 = vpop.f32.mrb[0].mxu0 }
 0x11b   : > { %v463_v28 = vpop.f32.mrb[1].mxu0  ;;  %v472_v30 = vadd.f32 %v732_v26, %v670_v27 }
 0x11c   : > { %v733_v29 = vpop.f32.mrb[2].mxu0  ;;  %v464_v33 = vadd.f32 %v670_v27, %v463_v28  ;;  %504 = sbr.rel (!%p879_p6) target bundleno = 300 (0x12c), region = 77 }
 0x11d   : > { %v475_v31 = vadd.f32 %v733_v29, %v670_v27  ;;  %v466_v32 = vpop.f32.mrb[3].mxu0 }
 0x11e   : > { %v467_v34 = vadd.f32 %v670_v27, %v466_v32 }
 0x11f   : > { %v701_v35 = vpack.c.bf16 %v475_v31, %v472_v30 }
 0x120   : > { %v696_v36 = vpack.c.bf16 %v467_v34, %v464_v33 }
 0x121   : > { %703 = vst [vmem:[%s326_s23 + $0x8] sm:$0xff] %v701_v35  }
 0x122   : > { %697 = vst [vmem:[%s326_s23] sm:$0xff] %v696_v36  }
 0x128   : > { %v529_v39 = vld [vmem:[%s326_s23 + $0x8] sm:$0xf]  ;;  %v531_v40 = vld [vmem:[%s326_s23 + $0xc] sm:$0xf] }
 0x129   : > { %v525_v37 = vld [vmem:[%s326_s23] sm:$0xf]  ;;  %v527_v38 = vld [vmem:[%s326_s23 + $0x4] sm:$0xf]  ;;  %530 = vst [vmem:[%s509_s26 + $0x10] sm:$0xf] %v529_v39 }
 0x12a   : > { %526 = vst [vmem:[%s509_s26] sm:$0xf] %v525_v37  ;;  %528 = vst [vmem:[%s509_s26 + $0x8] sm:$0xf] %v527_v38 }
 0x12b   : > { %532 = vst [vmem:[%s509_s26 + $0x18] sm:$0xf] %v531_v40 }
 0x12c PF: > { %s13_s16 = sadd.s32 1, %s822_s16   ;;  %s954_s12 = smov %s810_s13 }
 0x12d   : > { %p10_p12 = scmp.ge.s32.totalorder %s13_s16, 4   ;;  %s955_s13 = smov %s884_s22 }
 0x12e   : > { %s956_s14 = smov %s818_s15  ;;  %s957_s15 = smov %s959_s17 }
 0x12f   :  { %12 = sbr.rel (!%p10_p12) target bundleno = 3 (0x3), region = 155 }

// kernel: pre_vit_cross_attn_forward.37
= control target key start
LH: loop header
LB: loop body
LE: loop exit
PB: predicated region body
PF: predicated region fallthrough
CT: control target
= control target key end

     0   :  { %v290_v1 = vmov 0   ;;  %v37_v19 = vlaneseq  ;;  %vm201_vm0 = vcmask 523264   ;;  %s392_s1 = inlined_call_operand.vmem [shape: bf16[128,192], index: 1, kind: input, shape index: {}]   ;;  %s393_s0 = inlined_call_operand.vmem [shape: bf16[32,128], index: 0, kind: input, shape index: {}]   ;;  %s394_s2 = inlined_call_operand.vmem [shape: f32[1,192], index: 2, kind: input, shape index: {}]   ;;  %s395_s3 = inlined_call_operand.vmem [shape: f32[32,192], index: 3, kind: output, shape index: {}]  }
   0x1   :  { %v248_v0 = vld [vmem:[%s392_s1 + $0x4] ss:$8 sps:$4 sm:$0xff]   ;;  %171 = vmatprep.mubr.bf16.mxu0 %v290_v1  ;;  %181 = vmatprep.mubr.bf16.mxu1 %v290_v1  ;;  %v250_v2 = vld [vmem:[%s392_s1] ss:$8 sps:$4 sm:$0xff]   ;;  %v251_v3 = vld [vmem:[%s392_s1 + $0x14] ss:$8 sps:$4 sm:$0xff]  }
   0x2   :  { %139 = vmatprep.subr.bf16.mxu0 %v248_v0  ;;  %231 = vmatprep.subr.bf16.mxu1 %v248_v0  ;;  %v253_v4 = vld [vmem:[%s392_s1 + $0x10] ss:$8 sps:$4 sm:$0xff]   ;;  %v254_v5 = vld [vmem:[%s392_s1 + $0x24] ss:$8 sps:$4 sm:$0xff]   ;;  %v256_v6 = vld [vmem:[%s392_s1 + $0x20] ss:$8 sps:$4 sm:$0xff]  }
   0x3   :  { %140 = vmatpush1.bf16.msra.mxu0 %v250_v2  ;;  %239 = vmatpush1.bf16.msra.mxu1 %v250_v2  ;;  %v257_v7 = vld [vmem:[%s392_s1 + $0x34] ss:$8 sps:$4 sm:$0xff]   ;;  %v259_v8 = vld [vmem:[%s392_s1 + $0x30] ss:$8 sps:$4 sm:$0xff]   ;;  %v260_v9 = vld [vmem:[%s392_s1 + $0x44] ss:$8 sps:$4 sm:$0xff]  }
   0x4   :  { %141 = vmatprep.subr.bf16.mxu0 %v251_v3  ;;  %232 = vmatprep.subr.bf16.mxu1 %v251_v3  ;;  %v262_v10 = vld [vmem:[%s392_s1 + $0x40] ss:$8 sps:$4 sm:$0xff]   ;;  %v263_v11 = vld [vmem:[%s392_s1 + $0x54] ss:$8 sps:$4 sm:$0xff]   ;;  %v265_v12 = vld [vmem:[%s392_s1 + $0x50] ss:$8 sps:$4 sm:$0xff]  }
   0x5   :  { %v266_v13 = vld [vmem:[%s392_s1 + $0x64] ss:$8 sps:$4 sm:$0xff]   ;;  %v268_v14 = vld [vmem:[%s392_s1 + $0x60] ss:$8 sps:$4 sm:$0xff]   ;;  %v269_v15 = vld [vmem:[%s392_s1 + $0x74] ss:$8 sps:$4 sm:$0xff]  }
   0x6   :  { %v271_v16 = vld [vmem:[%s392_s1 + $0x70] ss:$8 sps:$4 sm:$0xff]   ;;  %v272_v17 = vld [vmem:[%s393_s0] sm:$0xff]   ;;  %v273_v18 = vld [vmem:[%s393_s0 + $0x8] sm:$0xff]   ;;  %v38_v20 = vshrl.u32 %v37_v19, 7 }
   0x7   :  { %142 = vmatpush1.bf16.msra.mxu0 %v253_v4  ;;  %240 = vmatpush1.bf16.msra.mxu1 %v253_v4  ;;  %v35_v22 = vld [vmem:[%s394_s2] sm:$0x3] }
   0x8   :  { %143 = vmatprep.subr.bf16.mxu0 %v254_v5  ;;  %233 = vmatprep.subr.bf16.mxu1 %v254_v5  ;;  %v39_v21 = vsub.s32 0, %v38_v20  ;;  %v43_v23 = vsub.s32 1, %v38_v20 }
   0xa   :  { %v40_v24 = vrot.slane %v35_v22, %v39_v21  ;;  %v44_v25 = vrot.slane %v35_v22, %v43_v23 }
   0xb   :  { %144 = vmatpush1.bf16.msra.mxu0 %v256_v6  ;;  %241 = vmatpush1.bf16.msra.mxu1 %v256_v6 }
   0xc   :  { %145 = vmatprep.subr.bf16.mxu0 %v257_v7  ;;  %234 = vmatprep.subr.bf16.mxu1 %v257_v7 }
   0xf   :  { %146 = vmatpush1.bf16.msra.mxu0 %v259_v8  ;;  %242 = vmatpush1.bf16.msra.mxu1 %v259_v8 }
  0x10   :  { %147 = vmatprep.subr.bf16.mxu0 %v260_v9  ;;  %235 = vmatprep.subr.bf16.mxu1 %v260_v9 }
  0x13   :  { %148 = vmatpush1.bf16.msra.mxu0 %v262_v10  ;;  %243 = vmatpush1.bf16.msra.mxu1 %v262_v10 }
  0x14   :  { %149 = vmatprep.subr.bf16.mxu0 %v263_v11  ;;  %236 = vmatprep.subr.bf16.mxu1 %v263_v11 }
  0x17   :  { %150 = vmatpush1.bf16.msra.mxu0 %v265_v12  ;;  %244 = vmatpush1.bf16.msra.mxu1 %v265_v12 }
  0x18   :  { %151 = vmatprep.subr.bf16.mxu0 %v266_v13  ;;  %237 = vmatprep.subr.bf16.mxu1 %v266_v13 }
  0x1b   :  { %152 = vmatpush1.bf16.msra.mxu0 %v268_v14  ;;  %245 = vmatpush1.bf16.msra.mxu1 %v268_v14 }
  0x1c   :  { %153 = vmatprep.subr.bf16.mxu0 %v269_v15  ;;  %238 = vmatprep.subr.bf16.mxu1 %v269_v15 }
  0x1f   :  { %154 = vmatpush1.bf16.msra.mxu0 %v271_v16  ;;  %246 = vmatpush1.bf16.msra.mxu1 %v271_v16 }
  0x22   :  { %172 = vmatmul.mubr.bf16.vlgmr.msra.gmra.mrb[0].mxu0 %v272_v17  ;;  %182 = vmatmul.mubr.bf16.vlgmr.msra.gmra.mrb[0].mxu1 %v273_v18 }
  0xf5   :  { %v173_v26 = vpop.f32.mrb[0].mxu0  ;;  %v183_v27 = vpop.f32.mrb[0].mxu1 }
  0xf6   :  { %v174_v28 = vadd.f32 %v173_v26, %v40_v24  ;;  %v184_v29 = vadd.f32 %v183_v27, %v40_v24  ;;  %v175_v30 = vpop.f32.mrb[1].mxu0  ;;  %v185_v31 = vpop.f32.mrb[1].mxu1 }
  0xf7   :  { %v176_v32 = vadd.f32 %v175_v30, %v44_v25  ;;  %v186_v33 = vadd.f32 %v185_v31, %v44_v25  ;;  %v177_v34 = vpop.f32.mrb[2].mxu0  ;;  %v187_v35 = vpop.f32.mrb[2].mxu1 }
  0xf8   :  { %274 = vtanh.f32 %v174_v28  ;;  %v178_v36 = vadd.f32 %v177_v34, %v40_v24  ;;  %v179_v37 = vpop.f32.mrb[3].mxu0  ;;  %v189_v38 = vpop.f32.mrb[3].mxu1  ;;  %v188_v39 = vadd.f32 %v187_v35, %v40_v24 }
  0xf9   :  { %276 = vtanh.f32 %v184_v29  ;;  %v180_v40 = vadd.f32 %v179_v37, %v44_v25  ;;  %v190_v41 = vadd.f32 %v189_v38, %v44_v25 }
  0xfa   :  { %278 = vtanh.f32 %v176_v32 }
  0xfb   :  { %280 = vtanh.f32 %v186_v33 }
  0xfc   :  { %282 = vtanh.f32 %v178_v36 }
  0xfd   :  { %284 = vtanh.f32 %v188_v39 }
  0xfe   :  { %286 = vtanh.f32 %v180_v40 }
  0xff   :  { %288 = vtanh.f32 %v190_v41 }
 0x102   :  { %v275_v42 = vpop.eup %274 }
 0x103   :  { %v277_v43 = vpop.eup %276  ;;  %200 = vst [vmem:[%s395_s3] sm:$0xff] %v275_v42 }
 0x104   :  { %v279_v44 = vpop.eup %278  ;;  %205 = vst [vmem:[%s395_s3 + $0x20] sm:$0xff] %v277_v43 }
 0x105   :  { %v281_v45 = vpop.eup %280  ;;  %202 = vst.msk [vmem:[%s395_s3 + $0x8] sm:$0xff] %vm201_vm0, %v279_v44 }
 0x106   :  { %v283_v46 = vpop.eup %282  ;;  %206 = vst.msk [vmem:[%s395_s3 + $0x28] sm:$0xff] %vm201_vm0, %v281_v45 }
 0x107   :  { %v285_v47 = vpop.eup %284  ;;  %203 = vst [vmem:[%s395_s3 + $0x10] sm:$0xff] %v283_v46 }
 0x108   :  { %v287_v48 = vpop.eup %286  ;;  %207 = vst [vmem:[%s395_s3 + $0x30] sm:$0xff] %v285_v47 }
 0x109   :  { %v289_v49 = vpop.eup %288  ;;  %204 = vst.msk [vmem:[%s395_s3 + $0x18] sm:$0xff] %vm201_vm0, %v287_v48 }
 0x10a   :  { %208 = vst.msk [vmem:[%s395_s3 + $0x38] sm:$0xff] %vm201_vm0, %v289_v49 }

</bundles_post_ra>
